<compile_context>
chip_gen: v5e
topology: v5e:2x2
jax: 0.10.0
libtpu: 0.0.40
codegen_flags: <defaults>
</compile_context>

<pallas_src>
import functools

import jax
import jax.numpy as jnp
from jax.experimental import pallas as pl
from jax.experimental.pallas import tpu as pltpu

EPS = 1e-5          # torch.nn.InstanceNorm2d default eps
NEG_SLOPE = 0.2     # LeakyReLU(negative_slope=0.2)


def _upsampler_kernel(xd_ref, w_ref, o_ref, sum_ref, sq_ref, *, inv_n):
    """One grid step of UpSamplerBlock.

    Grid = (N, Cout tiles, pass, row tiles).  Pass 0 accumulates InstanceNorm
    statistics; pass 1 recomputes the (cheap) matmul, normalizes and stores NCHW.

    xd_ref : (1, Cin, Ht, 2W)   column-duplicated input: xd[..., 2j+b] = x[..., j]
    w_ref  : (2, 2, Ct, Cin)    w_ref[a, b, c, k] = weight[k, c, a, b]
    o_ref  : (1, Ct, 2*Ht, 2W)  NCHW output rows 2i+a (written on pass 1 only)
    sum_ref, sq_ref : (Ct, 1)   per-channel running sum / sum of squares
    """
    p = pl.program_id(2)        # 0 = statistics pass, 1 = normalize + store pass
    t = pl.program_id(3)        # row-tile index

    _, _, ht, wo = xd_ref.shape          # wo = 2*W output columns
    ct = o_ref.shape[1]

    # Column-parity mask: even lanes take the b=0 tap, odd lanes the b=1 tap.
    lane = jax.lax.broadcasted_iota(jnp.int32, (ct, wo), 1)
    is_even = (lane & 1) == 0

    @pl.when(jnp.logical_and(p == 0, t == 0))
    def _init():
        sum_ref[...] = jnp.zeros_like(sum_ref)
        sq_ref[...] = jnp.zeros_like(sq_ref)

    def conv_row(xd, a):
        # One already-interleaved output row: y[c, 2j+b] = sum_k w[k,c,a,b] * x[k,j].
        y_b0 = jnp.dot(w_ref[a, 0], xd, preferred_element_type=jnp.float32)
        y_b1 = jnp.dot(w_ref[a, 1], xd, preferred_element_type=jnp.float32)
        return jnp.where(is_even, y_b0, y_b1)                      # (Ct, 2W)

    @pl.when(p == 0)
    def _accumulate_stats():
        s = jnp.zeros((ct, 1), jnp.float32)
        q = jnp.zeros((ct, 1), jnp.float32)
        for i in range(ht):                     # static unroll over the row tile
            xd = xd_ref[0, :, i, :]             # (Cin, 2W)
            for a in (0, 1):
                r = conv_row(xd, a)
                s = s + jnp.sum(r, axis=1, keepdims=True)
                q = q + jnp.sum(r * r, axis=1, keepdims=True)
        sum_ref[...] += s
        sq_ref[...] += q

    @pl.when(p == 1)
    def _normalize_store():
        mean = sum_ref[...] * inv_n                                   # (Ct, 1)
        var = jnp.maximum(sq_ref[...] * inv_n - mean * mean, 0.0)     # biased, as torch
        rstd = jax.lax.rsqrt(var + EPS)
        for i in range(ht):
            xd = xd_ref[0, :, i, :]
            for a in (0, 1):
                y = (conv_row(xd, a) - mean) * rstd
                y = jnp.where(y > 0, y, NEG_SLOPE * y)
                o_ref[0, :, 2 * i + a, :] = y


def upsampler_block(x, weight, bias=None, *, row_tile=None, cout_tile=None):
    """Pallas implementation of UpSamplerBlock.forward.

    x      : (N, Cin, H, W)  float32
    weight : (Cin, Cout, 2, 2)   (torch ConvTranspose2d weight layout)
    bias   : (Cout,) -- accepted for API parity; mathematically cancelled by
             InstanceNorm2d(affine=False), so it is not fed to the kernel.
    returns: (N, Cout, 2H, 2W) float32, written by the kernel directly in NCHW.
    """
    del bias  # exact no-op under InstanceNorm(affine=False, track_running_stats=False)
    N, Cin, H, W = x.shape
    Cout = weight.shape[1]

    # ---- tile selection -----------------------------------------------------
    # Row tile: second-minor block dims must be multiples of 8 (or the full extent);
    # budget a couple of MB per step so the pipeline is deep and blocks fit v7x's
    # 64 MiB VMEM (and v5e's small scoped default).
    if row_tile is None:
        per_row_bytes = (Cin * 2 * W + Cout * 4 * W) * 4      # xd row + 2 out rows (f32)
        row_tile = None
        for cand in range(8, H + 1, 8):
            if H % cand == 0 and cand * per_row_bytes <= (2 << 20):
                row_tile = cand
        if row_tile is None:
            row_tile = 8 if H % 8 == 0 else H
    assert H % row_tile == 0 and (row_tile % 8 == 0 or row_tile == H), row_tile

    # Cout tile: a second 'parallel' grid axis (keeps both v7x TensorCores busy even
    # when N == 1) and bounds the output block for very wide layers.
    if cout_tile is None:
        cout_tile = 128 if (Cout > 128 and Cout % 128 == 0) else Cout
    assert Cout % cout_tile == 0 and (cout_tile % 8 == 0 or cout_tile == Cout), cout_tile

    ht, ct = row_tile, cout_tile
    n_rt, n_ct = H // ht, Cout // ct

    # ---- layout prep (cheap XLA ops on the *small* tensors only) -------------
    # Duplicate every input column: xd[..., 2j+b] = x[..., j].  Combined with the
    # in-kernel column-parity select, the MXU then emits rows that are already
    # interleaved in NCHW order -> no post-kernel un-shuffle of the big output.
    xd = jnp.repeat(x, 2, axis=3)                               # (N, Cin, H, 2W)
    # TODO(synk): for channel-heavy layers (Cin, Cout >= 64) stream xd/w4 as bfloat16
    # (MXU-native, halves the input DMA); InstanceNorm renormalizes so the precision
    # impact is negligible.  Kept f32 here to preserve the tight reference check.
    w4 = jnp.transpose(weight, (2, 3, 1, 0))                    # (2, 2, Cout, Cin)

    inv_n = 1.0 / (4.0 * H * W)                                 # stats over 2H * 2W

    # ---- VMEM budget / cost hints --------------------------------------------
    in_blk = Cin * ht * 2 * W * 4
    out_blk = ct * 2 * ht * 2 * W * 4
    w_blk = 4 * ct * Cin * 4
    vmem_need = 2 * (in_blk + out_blk) + 2 * w_blk + (1 << 20)   # double buffers + slack
    vmem_limit = int(min(max(2 * vmem_need, 32 << 20), 64 << 20))

    flops = 64 * N * Cout * Cin * H * W            # 2 passes x 4 K=Cin taps per row pair
    bytes_accessed = 4 * (2 * n_ct * N * Cin * H * 2 * W        # xd streamed on both passes
                          + 4 * Cout * Cin
                          + N * Cout * 4 * H * W)               # output written once

    kernel = functools.partial(_upsampler_kernel, inv_n=inv_n)

    out = pl.pallas_call(
        kernel,
        out_shape=jax.ShapeDtypeStruct((N, Cout, 2 * H, 2 * W), jnp.float32),
        grid_spec=pltpu.PrefetchScalarGridSpec(
            num_scalar_prefetch=0,
            grid=(N, n_ct, 2, n_rt),
            in_specs=[
                pl.BlockSpec((1, Cin, ht, 2 * W), lambda n, c, p, t: (n, 0, t, 0)),
                pl.BlockSpec((2, 2, ct, Cin), lambda n, c, p, t: (0, 0, c, 0)),
            ],
            # Pass 0 parks the output window on block 0 and never writes it (no
            # garbage reaches HBM); pass 1 walks the row tiles and writes each
            # output block exactly once, lane-dense (full 2W rows).
            out_specs=pl.BlockSpec(
                (1, ct, 2 * ht, 2 * W), lambda n, c, p, t: (n, c, t * p, 0)),
            scratch_shapes=[
                pltpu.VMEM((ct, 1), jnp.float32),   # per-channel running sum
                pltpu.VMEM((ct, 1), jnp.float32),   # per-channel running sum of squares
            ],
        ),
        compiler_params=pltpu.CompilerParams(
            dimension_semantics=("parallel", "parallel", "arbitrary", "arbitrary"),
            vmem_limit_bytes=vmem_limit,
        ),
        cost_estimate=pl.CostEstimate(
            flops=flops, transcendentals=2 * N * Cout, bytes_accessed=bytes_accessed),
    )(xd, w4)
    return out


def reference(x, weight, bias):
    """Pure-JAX reference matching PyTorch semantics (bias included)."""
    N, Cin, H, W = x.shape
    Cout = weight.shape[1]
    y = jnp.einsum("ncij,cdab->ndiajb", x, weight).reshape(N, Cout, 2 * H, 2 * W)
    y = y + bias[None, :, None, None]
    mean = jnp.mean(y, axis=(2, 3), keepdims=True)
    var = jnp.var(y, axis=(2, 3), keepdims=True)
    y = (y - mean) / jnp.sqrt(var + EPS)
    return jnp.where(y > 0, y, NEG_SLOPE * y)


if __name__ == "__main__":
    # UpSamplerBlock(input_dim=4, output_dim=16), input (N=2, Cin=4, H=W=16).
    N, Cin, Cout, H, W = 2, 4, 16, 16, 16
    key = jax.random.PRNGKey(0)
    kx, kw, kb = jax.random.split(key, 3)

    x = jax.random.normal(kx, (N, Cin, H, W), dtype=jnp.float32)
    # ConvTranspose2d weight shape: (in_channels, out_channels, kH, kW)
    weight = jax.random.normal(kw, (Cin, Cout, 2, 2), dtype=jnp.float32) * 0.1
    bias = jax.random.normal(kb, (Cout,), dtype=jnp.float32) * 0.1

    y_ref = reference(x, weight, bias)

    # Explicit tiling: exercises row-tile accumulation (2 row tiles) and the
    # Cout-tile 'parallel' axis (2 channel tiles).
    y = jax.block_until_ready(upsampler_block(x, weight, bias, row_tile=8, cout_tile=8))
    assert y.shape == (N, Cout, 2 * H, 2 * W)
    assert jnp.allclose(y, y_ref, atol=1e-4, rtol=1e-4), float(jnp.max(jnp.abs(y - y_ref)))

    # Default heuristic tiling (single row tile / single channel tile path).
    y2 = jax.block_until_ready(upsampler_block(x, weight, bias))
    assert jnp.allclose(y2, y_ref, atol=1e-4, rtol=1e-4), float(jnp.max(jnp.abs(y2 - y_ref)))

    print("KERNEL_OK")
</pallas_src>

<mosaic_0001>
module attributes {stable_mosaic.version = 11 : i64} {
  func.func @_upsampler_kernel(%arg0: i32, %arg1: i32, %arg2: i32, %arg3: i32, %arg4: memref<1x4x8x32xf32, #tpu.memory_space<vmem>>, %arg5: memref<2x2x8x4xf32, #tpu.memory_space<vmem>>, %arg6: memref<1x8x16x32xf32, #tpu.memory_space<vmem>>, %arg7: memref<8x1xf32, #tpu.memory_space<vmem>>, %arg8: memref<8x1xf32, #tpu.memory_space<vmem>>) attributes {dimension_semantics = [#tpu.dimension_semantics<parallel>, #tpu.dimension_semantics<parallel>, #tpu.dimension_semantics<arbitrary>, #tpu.dimension_semantics<arbitrary>], iteration_bounds = array<i64: 2, 2, 2, 2>, scalar_prefetch = 0 : i64, scratch_operands = 2 : i64, tpu.core_type = #tpu.core_type<tc>, window_params = [{transform_indices = @transform_0, window_bounds = array<i64: 1, 4, 8, 32>}, {transform_indices = @transform_1, window_bounds = array<i64: 2, 2, 8, 4>}, {transform_indices = @transform_2, window_bounds = array<i64: 1, 8, 16, 32>}]} {
    %0 = tpu.iota {dimensions = array<i32: 1>} : vector<8x32xi32>
    %c1_i32 = arith.constant 1 : i32
    %1 = vector.broadcast %c1_i32 : i32 to vector<8x32xi32>
    %2 = arith.andi %0, %1 : vector<8x32xi32>
    %c0_i32 = arith.constant 0 : i32
    %3 = vector.broadcast %c0_i32 : i32 to vector<8x32xi32>
    %4 = arith.cmpi eq, %2, %3 : vector<8x32xi32>
    %c0_i32_0 = arith.constant 0 : i32
    %5 = arith.cmpi eq, %arg2, %c0_i32_0 : i32
    %c0_i32_1 = arith.constant 0 : i32
    %6 = arith.cmpi eq, %arg3, %c0_i32_1 : i32
    %7 = arith.andi %5, %6 : i1
    %8 = arith.extui %7 : i1 to i32
    %c0_i32_2 = arith.constant 0 : i32
    %9 = arith.cmpi ne, %8, %c0_i32_2 : i32
    scf.if %9 {
      %cst = arith.constant 0.000000e+00 : f32
      %16 = vector.broadcast %cst : f32 to vector<8x1xf32>
      %c0 = arith.constant 0 : index
      %c0_7 = arith.constant 0 : index
      %17 = vector.load %arg7[%c0, %c0_7] : memref<8x1xf32, #tpu.memory_space<vmem>>, vector<8x1xf32>
      tpu.vector_store %arg7[%c0, %c0_7], %16 {strides = array<i32>} : memref<8x1xf32, #tpu.memory_space<vmem>>, vector<8x1xf32>,
      %cst_8 = arith.constant 0.000000e+00 : f32
      %18 = vector.broadcast %cst_8 : f32 to vector<8x1xf32>
      %c0_9 = arith.constant 0 : index
      %c0_10 = arith.constant 0 : index
      %19 = vector.load %arg8[%c0_9, %c0_10] : memref<8x1xf32, #tpu.memory_space<vmem>>, vector<8x1xf32>
      tpu.vector_store %arg8[%c0_9, %c0_10], %18 {strides = array<i32>} : memref<8x1xf32, #tpu.memory_space<vmem>>, vector<8x1xf32>,
    } else {
    }
    %c0_i32_3 = arith.constant 0 : i32
    %10 = arith.cmpi eq, %arg2, %c0_i32_3 : i32
    %11 = arith.extui %10 : i1 to i32
    %c0_i32_4 = arith.constant 0 : i32
    %12 = arith.cmpi ne, %11, %c0_i32_4 : i32
    scf.if %12 {
      %cst = arith.constant 0.000000e+00 : f32
      %16 = vector.broadcast %cst : f32 to vector<8x1xf32>
      %cst_7 = arith.constant 0.000000e+00 : f32
      %17 = vector.broadcast %cst_7 : f32 to vector<8x1xf32>
      %c0 = arith.constant 0 : index
      %c0_8 = arith.constant 0 : index
      %c0_9 = arith.constant 0 : index
      %c0_10 = arith.constant 0 : index
      %18 = vector.load %arg4[%c0, %c0_8, %c0_9, %c0_10] : memref<1x4x8x32xf32, #tpu.memory_space<vmem>>, vector<1x4x1x32xf32>
      %19 = vector.shape_cast %18 : vector<1x4x1x32xf32> to vector<4x32xf32>
      %c0_11 = arith.constant 0 : index
      %c0_12 = arith.constant 0 : index
      %c0_13 = arith.constant 0 : index
      %c0_14 = arith.constant 0 : index
      %20 = vector.load %arg5[%c0_11, %c0_12, %c0_13, %c0_14] : memref<2x2x8x4xf32, #tpu.memory_space<vmem>>, vector<1x1x8x4xf32>
      %21 = vector.shape_cast %20 : vector<1x1x8x4xf32> to vector<8x4xf32>
      %cst_15 = arith.constant dense<0.000000e+00> : vector<8x32xf32>
      %22 = tpu.matmul %21, %19, %cst_15 {dimension_numbers = #tpu.dot_dimension_numbers<[1], [0], [0], [1], [0, 0, 1, 1], [], []>} : vector<8x4xf32>, vector<4x32xf32>, vector<8x32xf32> -> vector<8x32xf32>
      %c0_16 = arith.constant 0 : index
      %c1 = arith.constant 1 : index
      %c0_17 = arith.constant 0 : index
      %c0_18 = arith.constant 0 : index
      %23 = vector.load %arg5[%c0_16, %c1, %c0_17, %c0_18] : memref<2x2x8x4xf32, #tpu.memory_space<vmem>>, vector<1x1x8x4xf32>
      %24 = vector.shape_cast %23 : vector<1x1x8x4xf32> to vector<8x4xf32>
      %cst_19 = arith.constant dense<0.000000e+00> : vector<8x32xf32>
      %25 = tpu.matmul %24, %19, %cst_19 {dimension_numbers = #tpu.dot_dimension_numbers<[1], [0], [0], [1], [0, 0, 1, 1], [], []>} : vector<8x4xf32>, vector<4x32xf32>, vector<8x32xf32> -> vector<8x32xf32>
      %26 = arith.select %4, %22, %25 : vector<8x32xi1>, vector<8x32xf32>
      %cst_20 = arith.constant dense<0.000000e+00> : vector<8xf32>
      %27 = vector.multi_reduction <add>, %26, %cst_20 [1] : vector<8x32xf32> to vector<8xf32>
      %28 = vector.shape_cast %27 : vector<8xf32> to vector<8x1xf32>
      %29 = arith.addf %16, %28 : vector<8x1xf32>
      %30 = arith.mulf %26, %26 : vector<8x32xf32>
      %cst_21 = arith.constant dense<0.000000e+00> : vector<8xf32>
      %31 = vector.multi_reduction <add>, %30, %cst_21 [1] : vector<8x32xf32> to vector<8xf32>
      %32 = vector.shape_cast %31 : vector<8xf32> to vector<8x1xf32>
      %33 = arith.addf %17, %32 : vector<8x1xf32>
      %c1_22 = arith.constant 1 : index
      %c0_23 = arith.constant 0 : index
      %c0_24 = arith.constant 0 : index
      %c0_25 = arith.constant 0 : index
      %34 = vector.load %arg5[%c1_22, %c0_23, %c0_24, %c0_25] : memref<2x2x8x4xf32, #tpu.memory_space<vmem>>, vector<1x1x8x4xf32>
      %35 = vector.shape_cast %34 : vector<1x1x8x4xf32> to vector<8x4xf32>
      %cst_26 = arith.constant dense<0.000000e+00> : vector<8x32xf32>
      %36 = tpu.matmul %35, %19, %cst_26 {dimension_numbers = #tpu.dot_dimension_numbers<[1], [0], [0], [1], [0, 0, 1, 1], [], []>} : vector<8x4xf32>, vector<4x32xf32>, vector<8x32xf32> -> vector<8x32xf32>
      %c1_27 = arith.constant 1 : index
      %c1_28 = arith.constant 1 : index
      %c0_29 = arith.constant 0 : index
      %c0_30 = arith.constant 0 : index
      %37 = vector.load %arg5[%c1_27, %c1_28, %c0_29, %c0_30] : memref<2x2x8x4xf32, #tpu.memory_space<vmem>>, vector<1x1x8x4xf32>
      %38 = vector.shape_cast %37 : vector<1x1x8x4xf32> to vector<8x4xf32>
      %cst_31 = arith.constant dense<0.000000e+00> : vector<8x32xf32>
      %39 = tpu.matmul %38, %19, %cst_31 {dimension_numbers = #tpu.dot_dimension_numbers<[1], [0], [0], [1], [0, 0, 1, 1], [], []>} : vector<8x4xf32>, vector<4x32xf32>, vector<8x32xf32> -> vector<8x32xf32>
      %40 = arith.select %4, %36, %39 : vector<8x32xi1>, vector<8x32xf32>
      %cst_32 = arith.constant dense<0.000000e+00> : vector<8xf32>
      %41 = vector.multi_reduction <add>, %40, %cst_32 [1] : vector<8x32xf32> to vector<8xf32>
      %42 = vector.shape_cast %41 : vector<8xf32> to vector<8x1xf32>
      %43 = arith.addf %29, %42 : vector<8x1xf32>
      %44 = arith.mulf %40, %40 : vector<8x32xf32>
      %cst_33 = arith.constant dense<0.000000e+00> : vector<8xf32>
      %45 = vector.multi_reduction <add>, %44, %cst_33 [1] : vector<8x32xf32> to vector<8xf32>
      %46 = vector.shape_cast %45 : vector<8xf32> to vector<8x1xf32>
      %47 = arith.addf %33, %46 : vector<8x1xf32>
      %c0_34 = arith.constant 0 : index
      %c0_35 = arith.constant 0 : index
      %c1_36 = arith.constant 1 : index
      %c0_37 = arith.constant 0 : index
      %48 = vector.load %arg4[%c0_34, %c0_35, %c1_36, %c0_37] : memref<1x4x8x32xf32, #tpu.memory_space<vmem>>, vector<1x4x1x32xf32>
      %49 = vector.shape_cast %48 : vector<1x4x1x32xf32> to vector<4x32xf32>
      %c0_38 = arith.constant 0 : index
      %c0_39 = arith.constant 0 : index
      %c0_40 = arith.constant 0 : index
      %c0_41 = arith.constant 0 : index
      %50 = vector.load %arg5[%c0_38, %c0_39, %c0_40, %c0_41] : memref<2x2x8x4xf32, #tpu.memory_space<vmem>>, vector<1x1x8x4xf32>
      %51 = vector.shape_cast %50 : vector<1x1x8x4xf32> to vector<8x4xf32>
      %cst_42 = arith.constant dense<0.000000e+00> : vector<8x32xf32>
      %52 = tpu.matmul %51, %49, %cst_42 {dimension_numbers = #tpu.dot_dimension_numbers<[1], [0], [0], [1], [0, 0, 1, 1], [], []>} : vector<8x4xf32>, vector<4x32xf32>, vector<8x32xf32> -> vector<8x32xf32>
      %c0_43 = arith.constant 0 : index
      %c1_44 = arith.constant 1 : index
      %c0_45 = arith.constant 0 : index
      %c0_46 = arith.constant 0 : index
      %53 = vector.load %arg5[%c0_43, %c1_44, %c0_45, %c0_46] : memref<2x2x8x4xf32, #tpu.memory_space<vmem>>, vector<1x1x8x4xf32>
      %54 = vector.shape_cast %53 : vector<1x1x8x4xf32> to vector<8x4xf32>
      %cst_47 = arith.constant dense<0.000000e+00> : vector<8x32xf32>
      %55 = tpu.matmul %54, %49, %cst_47 {dimension_numbers = #tpu.dot_dimension_numbers<[1], [0], [0], [1], [0, 0, 1, 1], [], []>} : vector<8x4xf32>, vector<4x32xf32>, vector<8x32xf32> -> vector<8x32xf32>
      %56 = arith.select %4, %52, %55 : vector<8x32xi1>, vector<8x32xf32>
      %cst_48 = arith.constant dense<0.000000e+00> : vector<8xf32>
      %57 = vector.multi_reduction <add>, %56, %cst_48 [1] : vector<8x32xf32> to vector<8xf32>
      %58 = vector.shape_cast %57 : vector<8xf32> to vector<8x1xf32>
      %59 = arith.addf %43, %58 : vector<8x1xf32>
      %60 = arith.mulf %56, %56 : vector<8x32xf32>
      %cst_49 = arith.constant dense<0.000000e+00> : vector<8xf32>
      %61 = vector.multi_reduction <add>, %60, %cst_49 [1] : vector<8x32xf32> to vector<8xf32>
      %62 = vector.shape_cast %61 : vector<8xf32> to vector<8x1xf32>
      %63 = arith.addf %47, %62 : vector<8x1xf32>
      %c1_50 = arith.constant 1 : index
      %c0_51 = arith.constant 0 : index
      %c0_52 = arith.constant 0 : index
      %c0_53 = arith.constant 0 : index
      %64 = vector.load %arg5[%c1_50, %c0_51, %c0_52, %c0_53] : memref<2x2x8x4xf32, #tpu.memory_space<vmem>>, vector<1x1x8x4xf32>
      %65 = vector.shape_cast %64 : vector<1x1x8x4xf32> to vector<8x4xf32>
      %cst_54 = arith.constant dense<0.000000e+00> : vector<8x32xf32>
      %66 = tpu.matmul %65, %49, %cst_54 {dimension_numbers = #tpu.dot_dimension_numbers<[1], [0], [0], [1], [0, 0, 1, 1], [], []>} : vector<8x4xf32>, vector<4x32xf32>, vector<8x32xf32> -> vector<8x32xf32>
      %c1_55 = arith.constant 1 : index
      %c1_56 = arith.constant 1 : index
      %c0_57 = arith.constant 0 : index
      %c0_58 = arith.constant 0 : index
      %67 = vector.load %arg5[%c1_55, %c1_56, %c0_57, %c0_58] : memref<2x2x8x4xf32, #tpu.memory_space<vmem>>, vector<1x1x8x4xf32>
      %68 = vector.shape_cast %67 : vector<1x1x8x4xf32> to vector<8x4xf32>
      %cst_59 = arith.constant dense<0.000000e+00> : vector<8x32xf32>
      %69 = tpu.matmul %68, %49, %cst_59 {dimension_numbers = #tpu.dot_dimension_numbers<[1], [0], [0], [1], [0, 0, 1, 1], [], []>} : vector<8x4xf32>, vector<4x32xf32>, vector<8x32xf32> -> vector<8x32xf32>
      %70 = arith.select %4, %66, %69 : vector<8x32xi1>, vector<8x32xf32>
      %cst_60 = arith.constant dense<0.000000e+00> : vector<8xf32>
      %71 = vector.multi_reduction <add>, %70, %cst_60 [1] : vector<8x32xf32> to vector<8xf32>
      %72 = vector.shape_cast %71 : vector<8xf32> to vector<8x1xf32>
      %73 = arith.addf %59, %72 : vector<8x1xf32>
      %74 = arith.mulf %70, %70 : vector<8x32xf32>
      %cst_61 = arith.constant dense<0.000000e+00> : vector<8xf32>
      %75 = vector.multi_reduction <add>, %74, %cst_61 [1] : vector<8x32xf32> to vector<8xf32>
      %76 = vector.shape_cast %75 : vector<8xf32> to vector<8x1xf32>
      %77 = arith.addf %63, %76 : vector<8x1xf32>
      %c0_62 = arith.constant 0 : index
      %c0_63 = arith.constant 0 : index
      %c2 = arith.constant 2 : index
      %c0_64 = arith.constant 0 : index
      %78 = vector.load %arg4[%c0_62, %c0_63, %c2, %c0_64] : memref<1x4x8x32xf32, #tpu.memory_space<vmem>>, vector<1x4x1x32xf32>
      %79 = vector.shape_cast %78 : vector<1x4x1x32xf32> to vector<4x32xf32>
      %c0_65 = arith.constant 0 : index
      %c0_66 = arith.constant 0 : index
      %c0_67 = arith.constant 0 : index
      %c0_68 = arith.constant 0 : index
      %80 = vector.load %arg5[%c0_65, %c0_66, %c0_67, %c0_68] : memref<2x2x8x4xf32, #tpu.memory_space<vmem>>, vector<1x1x8x4xf32>
      %81 = vector.shape_cast %80 : vector<1x1x8x4xf32> to vector<8x4xf32>
      %cst_69 = arith.constant dense<0.000000e+00> : vector<8x32xf32>
      %82 = tpu.matmul %81, %79, %cst_69 {dimension_numbers = #tpu.dot_dimension_numbers<[1], [0], [0], [1], [0, 0, 1, 1], [], []>} : vector<8x4xf32>, vector<4x32xf32>, vector<8x32xf32> -> vector<8x32xf32>
      %c0_70 = arith.constant 0 : index
      %c1_71 = arith.constant 1 : index
      %c0_72 = arith.constant 0 : index
      %c0_73 = arith.constant 0 : index
      %83 = vector.load %arg5[%c0_70, %c1_71, %c0_72, %c0_73] : memref<2x2x8x4xf32, #tpu.memory_space<vmem>>, vector<1x1x8x4xf32>
      %84 = vector.shape_cast %83 : vector<1x1x8x4xf32> to vector<8x4xf32>
      %cst_74 = arith.constant dense<0.000000e+00> : vector<8x32xf32>
      %85 = tpu.matmul %84, %79, %cst_74 {dimension_numbers = #tpu.dot_dimension_numbers<[1], [0], [0], [1], [0, 0, 1, 1], [], []>} : vector<8x4xf32>, vector<4x32xf32>, vector<8x32xf32> -> vector<8x32xf32>
      %86 = arith.select %4, %82, %85 : vector<8x32xi1>, vector<8x32xf32>
      %cst_75 = arith.constant dense<0.000000e+00> : vector<8xf32>
      %87 = vector.multi_reduction <add>, %86, %cst_75 [1] : vector<8x32xf32> to vector<8xf32>
      %88 = vector.shape_cast %87 : vector<8xf32> to vector<8x1xf32>
      %89 = arith.addf %73, %88 : vector<8x1xf32>
      %90 = arith.mulf %86, %86 : vector<8x32xf32>
      %cst_76 = arith.constant dense<0.000000e+00> : vector<8xf32>
      %91 = vector.multi_reduction <add>, %90, %cst_76 [1] : vector<8x32xf32> to vector<8xf32>
      %92 = vector.shape_cast %91 : vector<8xf32> to vector<8x1xf32>
      %93 = arith.addf %77, %92 : vector<8x1xf32>
      %c1_77 = arith.constant 1 : index
      %c0_78 = arith.constant 0 : index
      %c0_79 = arith.constant 0 : index
      %c0_80 = arith.constant 0 : index
      %94 = vector.load %arg5[%c1_77, %c0_78, %c0_79, %c0_80] : memref<2x2x8x4xf32, #tpu.memory_space<vmem>>, vector<1x1x8x4xf32>
      %95 = vector.shape_cast %94 : vector<1x1x8x4xf32> to vector<8x4xf32>
      %cst_81 = arith.constant dense<0.000000e+00> : vector<8x32xf32>
      %96 = tpu.matmul %95, %79, %cst_81 {dimension_numbers = #tpu.dot_dimension_numbers<[1], [0], [0], [1], [0, 0, 1, 1], [], []>} : vector<8x4xf32>, vector<4x32xf32>, vector<8x32xf32> -> vector<8x32xf32>
      %c1_82 = arith.constant 1 : index
      %c1_83 = arith.constant 1 : index
      %c0_84 = arith.constant 0 : index
      %c0_85 = arith.constant 0 : index
      %97 = vector.load %arg5[%c1_82, %c1_83, %c0_84, %c0_85] : memref<2x2x8x4xf32, #tpu.memory_space<vmem>>, vector<1x1x8x4xf32>
      %98 = vector.shape_cast %97 : vector<1x1x8x4xf32> to vector<8x4xf32>
      %cst_86 = arith.constant dense<0.000000e+00> : vector<8x32xf32>
      %99 = tpu.matmul %98, %79, %cst_86 {dimension_numbers = #tpu.dot_dimension_numbers<[1], [0], [0], [1], [0, 0, 1, 1], [], []>} : vector<8x4xf32>, vector<4x32xf32>, vector<8x32xf32> -> vector<8x32xf32>
      %100 = arith.select %4, %96, %99 : vector<8x32xi1>, vector<8x32xf32>
      %cst_87 = arith.constant dense<0.000000e+00> : vector<8xf32>
      %101 = vector.multi_reduction <add>, %100, %cst_87 [1] : vector<8x32xf32> to vector<8xf32>
      %102 = vector.shape_cast %101 : vector<8xf32> to vector<8x1xf32>
      %103 = arith.addf %89, %102 : vector<8x1xf32>
      %104 = arith.mulf %100, %100 : vector<8x32xf32>
      %cst_88 = arith.constant dense<0.000000e+00> : vector<8xf32>
      %105 = vector.multi_reduction <add>, %104, %cst_88 [1] : vector<8x32xf32> to vector<8xf32>
      %106 = vector.shape_cast %105 : vector<8xf32> to vector<8x1xf32>
      %107 = arith.addf %93, %106 : vector<8x1xf32>
      %c0_89 = arith.constant 0 : index
      %c0_90 = arith.constant 0 : index
      %c3 = arith.constant 3 : index
      %c0_91 = arith.constant 0 : index
      %108 = vector.load %arg4[%c0_89, %c0_90, %c3, %c0_91] : memref<1x4x8x32xf32, #tpu.memory_space<vmem>>, vector<1x4x1x32xf32>
      %109 = vector.shape_cast %108 : vector<1x4x1x32xf32> to vector<4x32xf32>
      %c0_92 = arith.constant 0 : index
      %c0_93 = arith.constant 0 : index
      %c0_94 = arith.constant 0 : index
      %c0_95 = arith.constant 0 : index
      %110 = vector.load %arg5[%c0_92, %c0_93, %c0_94, %c0_95] : memref<2x2x8x4xf32, #tpu.memory_space<vmem>>, vector<1x1x8x4xf32>
      %111 = vector.shape_cast %110 : vector<1x1x8x4xf32> to vector<8x4xf32>
      %cst_96 = arith.constant dense<0.000000e+00> : vector<8x32xf32>
      %112 = tpu.matmul %111, %109, %cst_96 {dimension_numbers = #tpu.dot_dimension_numbers<[1], [0], [0], [1], [0, 0, 1, 1], [], []>} : vector<8x4xf32>, vector<4x32xf32>, vector<8x32xf32> -> vector<8x32xf32>
      %c0_97 = arith.constant 0 : index
      %c1_98 = arith.constant 1 : index
      %c0_99 = arith.constant 0 : index
      %c0_100 = arith.constant 0 : index
      %113 = vector.load %arg5[%c0_97, %c1_98, %c0_99, %c0_100] : memref<2x2x8x4xf32, #tpu.memory_space<vmem>>, vector<1x1x8x4xf32>
      %114 = vector.shape_cast %113 : vector<1x1x8x4xf32> to vector<8x4xf32>
      %cst_101 = arith.constant dense<0.000000e+00> : vector<8x32xf32>
      %115 = tpu.matmul %114, %109, %cst_101 {dimension_numbers = #tpu.dot_dimension_numbers<[1], [0], [0], [1], [0, 0, 1, 1], [], []>} : vector<8x4xf32>, vector<4x32xf32>, vector<8x32xf32> -> vector<8x32xf32>
      %116 = arith.select %4, %112, %115 : vector<8x32xi1>, vector<8x32xf32>
      %cst_102 = arith.constant dense<0.000000e+00> : vector<8xf32>
      %117 = vector.multi_reduction <add>, %116, %cst_102 [1] : vector<8x32xf32> to vector<8xf32>
      %118 = vector.shape_cast %117 : vector<8xf32> to vector<8x1xf32>
      %119 = arith.addf %103, %118 : vector<8x1xf32>
      %120 = arith.mulf %116, %116 : vector<8x32xf32>
      %cst_103 = arith.constant dense<0.000000e+00> : vector<8xf32>
      %121 = vector.multi_reduction <add>, %120, %cst_103 [1] : vector<8x32xf32> to vector<8xf32>
      %122 = vector.shape_cast %121 : vector<8xf32> to vector<8x1xf32>
      %123 = arith.addf %107, %122 : vector<8x1xf32>
      %c1_104 = arith.constant 1 : index
      %c0_105 = arith.constant 0 : index
      %c0_106 = arith.constant 0 : index
      %c0_107 = arith.constant 0 : index
      %124 = vector.load %arg5[%c1_104, %c0_105, %c0_106, %c0_107] : memref<2x2x8x4xf32, #tpu.memory_space<vmem>>, vector<1x1x8x4xf32>
      %125 = vector.shape_cast %124 : vector<1x1x8x4xf32> to vector<8x4xf32>
      %cst_108 = arith.constant dense<0.000000e+00> : vector<8x32xf32>
      %126 = tpu.matmul %125, %109, %cst_108 {dimension_numbers = #tpu.dot_dimension_numbers<[1], [0], [0], [1], [0, 0, 1, 1], [], []>} : vector<8x4xf32>, vector<4x32xf32>, vector<8x32xf32> -> vector<8x32xf32>
      %c1_109 = arith.constant 1 : index
      %c1_110 = arith.constant 1 : index
      %c0_111 = arith.constant 0 : index
      %c0_112 = arith.constant 0 : index
      %127 = vector.load %arg5[%c1_109, %c1_110, %c0_111, %c0_112] : memref<2x2x8x4xf32, #tpu.memory_space<vmem>>, vector<1x1x8x4xf32>
      %128 = vector.shape_cast %127 : vector<1x1x8x4xf32> to vector<8x4xf32>
      %cst_113 = arith.constant dense<0.000000e+00> : vector<8x32xf32>
      %129 = tpu.matmul %128, %109, %cst_113 {dimension_numbers = #tpu.dot_dimension_numbers<[1], [0], [0], [1], [0, 0, 1, 1], [], []>} : vector<8x4xf32>, vector<4x32xf32>, vector<8x32xf32> -> vector<8x32xf32>
      %130 = arith.select %4, %126, %129 : vector<8x32xi1>, vector<8x32xf32>
      %cst_114 = arith.constant dense<0.000000e+00> : vector<8xf32>
      %131 = vector.multi_reduction <add>, %130, %cst_114 [1] : vector<8x32xf32> to vector<8xf32>
      %132 = vector.shape_cast %131 : vector<8xf32> to vector<8x1xf32>
      %133 = arith.addf %119, %132 : vector<8x1xf32>
      %134 = arith.mulf %130, %130 : vector<8x32xf32>
      %cst_115 = arith.constant dense<0.000000e+00> : vector<8xf32>
      %135 = vector.multi_reduction <add>, %134, %cst_115 [1] : vector<8x32xf32> to vector<8xf32>
      %136 = vector.shape_cast %135 : vector<8xf32> to vector<8x1xf32>
      %137 = arith.addf %123, %136 : vector<8x1xf32>
      %c0_116 = arith.constant 0 : index
      %c0_117 = arith.constant 0 : index
      %c4 = arith.constant 4 : index
      %c0_118 = arith.constant 0 : index
      %138 = vector.load %arg4[%c0_116, %c0_117, %c4, %c0_118] : memref<1x4x8x32xf32, #tpu.memory_space<vmem>>, vector<1x4x1x32xf32>
      %139 = vector.shape_cast %138 : vector<1x4x1x32xf32> to vector<4x32xf32>
      %c0_119 = arith.constant 0 : index
      %c0_120 = arith.constant 0 : index
      %c0_121 = arith.constant 0 : index
      %c0_122 = arith.constant 0 : index
      %140 = vector.load %arg5[%c0_119, %c0_120, %c0_121, %c0_122] : memref<2x2x8x4xf32, #tpu.memory_space<vmem>>, vector<1x1x8x4xf32>
      %141 = vector.shape_cast %140 : vector<1x1x8x4xf32> to vector<8x4xf32>
      %cst_123 = arith.constant dense<0.000000e+00> : vector<8x32xf32>
      %142 = tpu.matmul %141, %139, %cst_123 {dimension_numbers = #tpu.dot_dimension_numbers<[1], [0], [0], [1], [0, 0, 1, 1], [], []>} : vector<8x4xf32>, vector<4x32xf32>, vector<8x32xf32> -> vector<8x32xf32>
      %c0_124 = arith.constant 0 : index
      %c1_125 = arith.constant 1 : index
      %c0_126 = arith.constant 0 : index
      %c0_127 = arith.constant 0 : index
      %143 = vector.load %arg5[%c0_124, %c1_125, %c0_126, %c0_127] : memref<2x2x8x4xf32, #tpu.memory_space<vmem>>, vector<1x1x8x4xf32>
      %144 = vector.shape_cast %143 : vector<1x1x8x4xf32> to vector<8x4xf32>
      %cst_128 = arith.constant dense<0.000000e+00> : vector<8x32xf32>
      %145 = tpu.matmul %144, %139, %cst_128 {dimension_numbers = #tpu.dot_dimension_numbers<[1], [0], [0], [1], [0, 0, 1, 1], [], []>} : vector<8x4xf32>, vector<4x32xf32>, vector<8x32xf32> -> vector<8x32xf32>
      %146 = arith.select %4, %142, %145 : vector<8x32xi1>, vector<8x32xf32>
      %cst_129 = arith.constant dense<0.000000e+00> : vector<8xf32>
      %147 = vector.multi_reduction <add>, %146, %cst_129 [1] : vector<8x32xf32> to vector<8xf32>
      %148 = vector.shape_cast %147 : vector<8xf32> to vector<8x1xf32>
      %149 = arith.addf %133, %148 : vector<8x1xf32>
      %150 = arith.mulf %146, %146 : vector<8x32xf32>
      %cst_130 = arith.constant dense<0.000000e+00> : vector<8xf32>
      %151 = vector.multi_reduction <add>, %150, %cst_130 [1] : vector<8x32xf32> to vector<8xf32>
      %152 = vector.shape_cast %151 : vector<8xf32> to vector<8x1xf32>
      %153 = arith.addf %137, %152 : vector<8x1xf32>
      %c1_131 = arith.constant 1 : index
      %c0_132 = arith.constant 0 : index
      %c0_133 = arith.constant 0 : index
      %c0_134 = arith.constant 0 : index
      %154 = vector.load %arg5[%c1_131, %c0_132, %c0_133, %c0_134] : memref<2x2x8x4xf32, #tpu.memory_space<vmem>>, vector<1x1x8x4xf32>
      %155 = vector.shape_cast %154 : vector<1x1x8x4xf32> to vector<8x4xf32>
      %cst_135 = arith.constant dense<0.000000e+00> : vector<8x32xf32>
      %156 = tpu.matmul %155, %139, %cst_135 {dimension_numbers = #tpu.dot_dimension_numbers<[1], [0], [0], [1], [0, 0, 1, 1], [], []>} : vector<8x4xf32>, vector<4x32xf32>, vector<8x32xf32> -> vector<8x32xf32>
      %c1_136 = arith.constant 1 : index
      %c1_137 = arith.constant 1 : index
      %c0_138 = arith.constant 0 : index
      %c0_139 = arith.constant 0 : index
      %157 = vector.load %arg5[%c1_136, %c1_137, %c0_138, %c0_139] : memref<2x2x8x4xf32, #tpu.memory_space<vmem>>, vector<1x1x8x4xf32>
      %158 = vector.shape_cast %157 : vector<1x1x8x4xf32> to vector<8x4xf32>
      %cst_140 = arith.constant dense<0.000000e+00> : vector<8x32xf32>
      %159 = tpu.matmul %158, %139, %cst_140 {dimension_numbers = #tpu.dot_dimension_numbers<[1], [0], [0], [1], [0, 0, 1, 1], [], []>} : vector<8x4xf32>, vector<4x32xf32>, vector<8x32xf32> -> vector<8x32xf32>
      %160 = arith.select %4, %156, %159 : vector<8x32xi1>, vector<8x32xf32>
      %cst_141 = arith.constant dense<0.000000e+00> : vector<8xf32>
      %161 = vector.multi_reduction <add>, %160, %cst_141 [1] : vector<8x32xf32> to vector<8xf32>
      %162 = vector.shape_cast %161 : vector<8xf32> to vector<8x1xf32>
      %163 = arith.addf %149, %162 : vector<8x1xf32>
      %164 = arith.mulf %160, %160 : vector<8x32xf32>
      %cst_142 = arith.constant dense<0.000000e+00> : vector<8xf32>
      %165 = vector.multi_reduction <add>, %164, %cst_142 [1] : vector<8x32xf32> to vector<8xf32>
      %166 = vector.shape_cast %165 : vector<8xf32> to vector<8x1xf32>
      %167 = arith.addf %153, %166 : vector<8x1xf32>
      %c0_143 = arith.constant 0 : index
      %c0_144 = arith.constant 0 : index
      %c5 = arith.constant 5 : index
      %c0_145 = arith.constant 0 : index
      %168 = vector.load %arg4[%c0_143, %c0_144, %c5, %c0_145] : memref<1x4x8x32xf32, #tpu.memory_space<vmem>>, vector<1x4x1x32xf32>
      %169 = vector.shape_cast %168 : vector<1x4x1x32xf32> to vector<4x32xf32>
      %c0_146 = arith.constant 0 : index
      %c0_147 = arith.constant 0 : index
      %c0_148 = arith.constant 0 : index
      %c0_149 = arith.constant 0 : index
      %170 = vector.load %arg5[%c0_146, %c0_147, %c0_148, %c0_149] : memref<2x2x8x4xf32, #tpu.memory_space<vmem>>, vector<1x1x8x4xf32>
      %171 = vector.shape_cast %170 : vector<1x1x8x4xf32> to vector<8x4xf32>
      %cst_150 = arith.constant dense<0.000000e+00> : vector<8x32xf32>
      %172 = tpu.matmul %171, %169, %cst_150 {dimension_numbers = #tpu.dot_dimension_numbers<[1], [0], [0], [1], [0, 0, 1, 1], [], []>} : vector<8x4xf32>, vector<4x32xf32>, vector<8x32xf32> -> vector<8x32xf32>
      %c0_151 = arith.constant 0 : index
      %c1_152 = arith.constant 1 : index
      %c0_153 = arith.constant 0 : index
      %c0_154 = arith.constant 0 : index
      %173 = vector.load %arg5[%c0_151, %c1_152, %c0_153, %c0_154] : memref<2x2x8x4xf32, #tpu.memory_space<vmem>>, vector<1x1x8x4xf32>
      %174 = vector.shape_cast %173 : vector<1x1x8x4xf32> to vector<8x4xf32>
      %cst_155 = arith.constant dense<0.000000e+00> : vector<8x32xf32>
      %175 = tpu.matmul %174, %169, %cst_155 {dimension_numbers = #tpu.dot_dimension_numbers<[1], [0], [0], [1], [0, 0, 1, 1], [], []>} : vector<8x4xf32>, vector<4x32xf32>, vector<8x32xf32> -> vector<8x32xf32>
      %176 = arith.select %4, %172, %175 : vector<8x32xi1>, vector<8x32xf32>
      %cst_156 = arith.constant dense<0.000000e+00> : vector<8xf32>
      %177 = vector.multi_reduction <add>, %176, %cst_156 [1] : vector<8x32xf32> to vector<8xf32>
      %178 = vector.shape_cast %177 : vector<8xf32> to vector<8x1xf32>
      %179 = arith.addf %163, %178 : vector<8x1xf32>
      %180 = arith.mulf %176, %176 : vector<8x32xf32>
      %cst_157 = arith.constant dense<0.000000e+00> : vector<8xf32>
      %181 = vector.multi_reduction <add>, %180, %cst_157 [1] : vector<8x32xf32> to vector<8xf32>
      %182 = vector.shape_cast %181 : vector<8xf32> to vector<8x1xf32>
      %183 = arith.addf %167, %182 : vector<8x1xf32>
      %c1_158 = arith.constant 1 : index
      %c0_159 = arith.constant 0 : index
      %c0_160 = arith.constant 0 : index
      %c0_161 = arith.constant 0 : index
      %184 = vector.load %arg5[%c1_158, %c0_159, %c0_160, %c0_161] : memref<2x2x8x4xf32, #tpu.memory_space<vmem>>, vector<1x1x8x4xf32>
      %185 = vector.shape_cast %184 : vector<1x1x8x4xf32> to vector<8x4xf32>
      %cst_162 = arith.constant dense<0.000000e+00> : vector<8x32xf32>
      %186 = tpu.matmul %185, %169, %cst_162 {dimension_numbers = #tpu.dot_dimension_numbers<[1], [0], [0], [1], [0, 0, 1, 1], [], []>} : vector<8x4xf32>, vector<4x32xf32>, vector<8x32xf32> -> vector<8x32xf32>
      %c1_163 = arith.constant 1 : index
      %c1_164 = arith.constant 1 : index
      %c0_165 = arith.constant 0 : index
      %c0_166 = arith.constant 0 : index
      %187 = vector.load %arg5[%c1_163, %c1_164, %c0_165, %c0_166] : memref<2x2x8x4xf32, #tpu.memory_space<vmem>>, vector<1x1x8x4xf32>
      %188 = vector.shape_cast %187 : vector<1x1x8x4xf32> to vector<8x4xf32>
      %cst_167 = arith.constant dense<0.000000e+00> : vector<8x32xf32>
      %189 = tpu.matmul %188, %169, %cst_167 {dimension_numbers = #tpu.dot_dimension_numbers<[1], [0], [0], [1], [0, 0, 1, 1], [], []>} : vector<8x4xf32>, vector<4x32xf32>, vector<8x32xf32> -> vector<8x32xf32>
      %190 = arith.select %4, %186, %189 : vector<8x32xi1>, vector<8x32xf32>
      %cst_168 = arith.constant dense<0.000000e+00> : vector<8xf32>
      %191 = vector.multi_reduction <add>, %190, %cst_168 [1] : vector<8x32xf32> to vector<8xf32>
      %192 = vector.shape_cast %191 : vector<8xf32> to vector<8x1xf32>
      %193 = arith.addf %179, %192 : vector<8x1xf32>
      %194 = arith.mulf %190, %190 : vector<8x32xf32>
      %cst_169 = arith.constant dense<0.000000e+00> : vector<8xf32>
      %195 = vector.multi_reduction <add>, %194, %cst_169 [1] : vector<8x32xf32> to vector<8xf32>
      %196 = vector.shape_cast %195 : vector<8xf32> to vector<8x1xf32>
      %197 = arith.addf %183, %196 : vector<8x1xf32>
      %c0_170 = arith.constant 0 : index
      %c0_171 = arith.constant 0 : index
      %c6 = arith.constant 6 : index
      %c0_172 = arith.constant 0 : index
      %198 = vector.load %arg4[%c0_170, %c0_171, %c6, %c0_172] : memref<1x4x8x32xf32, #tpu.memory_space<vmem>>, vector<1x4x1x32xf32>
      %199 = vector.shape_cast %198 : vector<1x4x1x32xf32> to vector<4x32xf32>
      %c0_173 = arith.constant 0 : index
      %c0_174 = arith.constant 0 : index
      %c0_175 = arith.constant 0 : index
      %c0_176 = arith.constant 0 : index
      %200 = vector.load %arg5[%c0_173, %c0_174, %c0_175, %c0_176] : memref<2x2x8x4xf32, #tpu.memory_space<vmem>>, vector<1x1x8x4xf32>
      %201 = vector.shape_cast %200 : vector<1x1x8x4xf32> to vector<8x4xf32>
      %cst_177 = arith.constant dense<0.000000e+00> : vector<8x32xf32>
      %202 = tpu.matmul %201, %199, %cst_177 {dimension_numbers = #tpu.dot_dimension_numbers<[1], [0], [0], [1], [0, 0, 1, 1], [], []>} : vector<8x4xf32>, vector<4x32xf32>, vector<8x32xf32> -> vector<8x32xf32>
      %c0_178 = arith.constant 0 : index
      %c1_179 = arith.constant 1 : index
      %c0_180 = arith.constant 0 : index
      %c0_181 = arith.constant 0 : index
      %203 = vector.load %arg5[%c0_178, %c1_179, %c0_180, %c0_181] : memref<2x2x8x4xf32, #tpu.memory_space<vmem>>, vector<1x1x8x4xf32>
      %204 = vector.shape_cast %203 : vector<1x1x8x4xf32> to vector<8x4xf32>
      %cst_182 = arith.constant dense<0.000000e+00> : vector<8x32xf32>
      %205 = tpu.matmul %204, %199, %cst_182 {dimension_numbers = #tpu.dot_dimension_numbers<[1], [0], [0], [1], [0, 0, 1, 1], [], []>} : vector<8x4xf32>, vector<4x32xf32>, vector<8x32xf32> -> vector<8x32xf32>
      %206 = arith.select %4, %202, %205 : vector<8x32xi1>, vector<8x32xf32>
      %cst_183 = arith.constant dense<0.000000e+00> : vector<8xf32>
      %207 = vector.multi_reduction <add>, %206, %cst_183 [1] : vector<8x32xf32> to vector<8xf32>
      %208 = vector.shape_cast %207 : vector<8xf32> to vector<8x1xf32>
      %209 = arith.addf %193, %208 : vector<8x1xf32>
      %210 = arith.mulf %206, %206 : vector<8x32xf32>
      %cst_184 = arith.constant dense<0.000000e+00> : vector<8xf32>
      %211 = vector.multi_reduction <add>, %210, %cst_184 [1] : vector<8x32xf32> to vector<8xf32>
      %212 = vector.shape_cast %211 : vector<8xf32> to vector<8x1xf32>
      %213 = arith.addf %197, %212 : vector<8x1xf32>
      %c1_185 = arith.constant 1 : index
      %c0_186 = arith.constant 0 : index
      %c0_187 = arith.constant 0 : index
      %c0_188 = arith.constant 0 : index
      %214 = vector.load %arg5[%c1_185, %c0_186, %c0_187, %c0_188] : memref<2x2x8x4xf32, #tpu.memory_space<vmem>>, vector<1x1x8x4xf32>
      %215 = vector.shape_cast %214 : vector<1x1x8x4xf32> to vector<8x4xf32>
      %cst_189 = arith.constant dense<0.000000e+00> : vector<8x32xf32>
      %216 = tpu.matmul %215, %199, %cst_189 {dimension_numbers = #tpu.dot_dimension_numbers<[1], [0], [0], [1], [0, 0, 1, 1], [], []>} : vector<8x4xf32>, vector<4x32xf32>, vector<8x32xf32> -> vector<8x32xf32>
      %c1_190 = arith.constant 1 : index
      %c1_191 = arith.constant 1 : index
      %c0_192 = arith.constant 0 : index
      %c0_193 = arith.constant 0 : index
      %217 = vector.load %arg5[%c1_190, %c1_191, %c0_192, %c0_193] : memref<2x2x8x4xf32, #tpu.memory_space<vmem>>, vector<1x1x8x4xf32>
      %218 = vector.shape_cast %217 : vector<1x1x8x4xf32> to vector<8x4xf32>
      %cst_194 = arith.constant dense<0.000000e+00> : vector<8x32xf32>
      %219 = tpu.matmul %218, %199, %cst_194 {dimension_numbers = #tpu.dot_dimension_numbers<[1], [0], [0], [1], [0, 0, 1, 1], [], []>} : vector<8x4xf32>, vector<4x32xf32>, vector<8x32xf32> -> vector<8x32xf32>
      %220 = arith.select %4, %216, %219 : vector<8x32xi1>, vector<8x32xf32>
      %cst_195 = arith.constant dense<0.000000e+00> : vector<8xf32>
      %221 = vector.multi_reduction <add>, %220, %cst_195 [1] : vector<8x32xf32> to vector<8xf32>
      %222 = vector.shape_cast %221 : vector<8xf32> to vector<8x1xf32>
      %223 = arith.addf %209, %222 : vector<8x1xf32>
      %224 = arith.mulf %220, %220 : vector<8x32xf32>
      %cst_196 = arith.constant dense<0.000000e+00> : vector<8xf32>
      %225 = vector.multi_reduction <add>, %224, %cst_196 [1] : vector<8x32xf32> to vector<8xf32>
      %226 = vector.shape_cast %225 : vector<8xf32> to vector<8x1xf32>
      %227 = arith.addf %213, %226 : vector<8x1xf32>
      %c0_197 = arith.constant 0 : index
      %c0_198 = arith.constant 0 : index
      %c7 = arith.constant 7 : index
      %c0_199 = arith.constant 0 : index
      %228 = vector.load %arg4[%c0_197, %c0_198, %c7, %c0_199] : memref<1x4x8x32xf32, #tpu.memory_space<vmem>>, vector<1x4x1x32xf32>
      %229 = vector.shape_cast %228 : vector<1x4x1x32xf32> to vector<4x32xf32>
      %c0_200 = arith.constant 0 : index
      %c0_201 = arith.constant 0 : index
      %c0_202 = arith.constant 0 : index
      %c0_203 = arith.constant 0 : index
      %230 = vector.load %arg5[%c0_200, %c0_201, %c0_202, %c0_203] : memref<2x2x8x4xf32, #tpu.memory_space<vmem>>, vector<1x1x8x4xf32>
      %231 = vector.shape_cast %230 : vector<1x1x8x4xf32> to vector<8x4xf32>
      %cst_204 = arith.constant dense<0.000000e+00> : vector<8x32xf32>
      %232 = tpu.matmul %231, %229, %cst_204 {dimension_numbers = #tpu.dot_dimension_numbers<[1], [0], [0], [1], [0, 0, 1, 1], [], []>} : vector<8x4xf32>, vector<4x32xf32>, vector<8x32xf32> -> vector<8x32xf32>
      %c0_205 = arith.constant 0 : index
      %c1_206 = arith.constant 1 : index
      %c0_207 = arith.constant 0 : index
      %c0_208 = arith.constant 0 : index
      %233 = vector.load %arg5[%c0_205, %c1_206, %c0_207, %c0_208] : memref<2x2x8x4xf32, #tpu.memory_space<vmem>>, vector<1x1x8x4xf32>
      %234 = vector.shape_cast %233 : vector<1x1x8x4xf32> to vector<8x4xf32>
      %cst_209 = arith.constant dense<0.000000e+00> : vector<8x32xf32>
      %235 = tpu.matmul %234, %229, %cst_209 {dimension_numbers = #tpu.dot_dimension_numbers<[1], [0], [0], [1], [0, 0, 1, 1], [], []>} : vector<8x4xf32>, vector<4x32xf32>, vector<8x32xf32> -> vector<8x32xf32>
      %236 = arith.select %4, %232, %235 : vector<8x32xi1>, vector<8x32xf32>
      %cst_210 = arith.constant dense<0.000000e+00> : vector<8xf32>
      %237 = vector.multi_reduction <add>, %236, %cst_210 [1] : vector<8x32xf32> to vector<8xf32>
      %238 = vector.shape_cast %237 : vector<8xf32> to vector<8x1xf32>
      %239 = arith.addf %223, %238 : vector<8x1xf32>
      %240 = arith.mulf %236, %236 : vector<8x32xf32>
      %cst_211 = arith.constant dense<0.000000e+00> : vector<8xf32>
      %241 = vector.multi_reduction <add>, %240, %cst_211 [1] : vector<8x32xf32> to vector<8xf32>
      %242 = vector.shape_cast %241 : vector<8xf32> to vector<8x1xf32>
      %243 = arith.addf %227, %242 : vector<8x1xf32>
      %c1_212 = arith.constant 1 : index
      %c0_213 = arith.constant 0 : index
      %c0_214 = arith.constant 0 : index
      %c0_215 = arith.constant 0 : index
      %244 = vector.load %arg5[%c1_212, %c0_213, %c0_214, %c0_215] : memref<2x2x8x4xf32, #tpu.memory_space<vmem>>, vector<1x1x8x4xf32>
      %245 = vector.shape_cast %244 : vector<1x1x8x4xf32> to vector<8x4xf32>
      %cst_216 = arith.constant dense<0.000000e+00> : vector<8x32xf32>
      %246 = tpu.matmul %245, %229, %cst_216 {dimension_numbers = #tpu.dot_dimension_numbers<[1], [0], [0], [1], [0, 0, 1, 1], [], []>} : vector<8x4xf32>, vector<4x32xf32>, vector<8x32xf32> -> vector<8x32xf32>
      %c1_217 = arith.constant 1 : index
      %c1_218 = arith.constant 1 : index
      %c0_219 = arith.constant 0 : index
      %c0_220 = arith.constant 0 : index
      %247 = vector.load %arg5[%c1_217, %c1_218, %c0_219, %c0_220] : memref<2x2x8x4xf32, #tpu.memory_space<vmem>>, vector<1x1x8x4xf32>
      %248 = vector.shape_cast %247 : vector<1x1x8x4xf32> to vector<8x4xf32>
      %cst_221 = arith.constant dense<0.000000e+00> : vector<8x32xf32>
      %249 = tpu.matmul %248, %229, %cst_221 {dimension_numbers = #tpu.dot_dimension_numbers<[1], [0], [0], [1], [0, 0, 1, 1], [], []>} : vector<8x4xf32>, vector<4x32xf32>, vector<8x32xf32> -> vector<8x32xf32>
      %250 = arith.select %4, %246, %249 : vector<8x32xi1>, vector<8x32xf32>
      %cst_222 = arith.constant dense<0.000000e+00> : vector<8xf32>
      %251 = vector.multi_reduction <add>, %250, %cst_222 [1] : vector<8x32xf32> to vector<8xf32>
      %252 = vector.shape_cast %251 : vector<8xf32> to vector<8x1xf32>
      %253 = arith.addf %239, %252 : vector<8x1xf32>
      %254 = arith.mulf %250, %250 : vector<8x32xf32>
      %cst_223 = arith.constant dense<0.000000e+00> : vector<8xf32>
      %255 = vector.multi_reduction <add>, %254, %cst_223 [1] : vector<8x32xf32> to vector<8xf32>
      %256 = vector.shape_cast %255 : vector<8xf32> to vector<8x1xf32>
      %257 = arith.addf %243, %256 : vector<8x1xf32>
      %c0_224 = arith.constant 0 : index
      %c0_225 = arith.constant 0 : index
      %258 = vector.load %arg7[%c0_224, %c0_225] : memref<8x1xf32, #tpu.memory_space<vmem>>, vector<8x1xf32>
      %259 = arith.addf %258, %253 : vector<8x1xf32>
      %c0_226 = arith.constant 0 : index
      %c0_227 = arith.constant 0 : index
      %260 = vector.load %arg7[%c0_226, %c0_227] : memref<8x1xf32, #tpu.memory_space<vmem>>, vector<8x1xf32>
      tpu.vector_store %arg7[%c0_226, %c0_227], %259 {strides = array<i32>} : memref<8x1xf32, #tpu.memory_space<vmem>>, vector<8x1xf32>,
      %c0_228 = arith.constant 0 : index
      %c0_229 = arith.constant 0 : index
      %261 = vector.load %arg8[%c0_228, %c0_229] : memref<8x1xf32, #tpu.memory_space<vmem>>, vector<8x1xf32>
      %262 = arith.addf %261, %257 : vector<8x1xf32>
      %c0_230 = arith.constant 0 : index
      %c0_231 = arith.constant 0 : index
      %263 = vector.load %arg8[%c0_230, %c0_231] : memref<8x1xf32, #tpu.memory_space<vmem>>, vector<8x1xf32>
      tpu.vector_store %arg8[%c0_230, %c0_231], %262 {strides = array<i32>} : memref<8x1xf32, #tpu.memory_space<vmem>>, vector<8x1xf32>,
    } else {
    }
    %c1_i32_5 = arith.constant 1 : i32
    %13 = arith.cmpi eq, %arg2, %c1_i32_5 : i32
    %14 = arith.extui %13 : i1 to i32
    %c0_i32_6 = arith.constant 0 : i32
    %15 = arith.cmpi ne, %14, %c0_i32_6 : i32
    scf.if %15 {
      %c0 = arith.constant 0 : index
      %c0_7 = arith.constant 0 : index
      %16 = vector.load %arg7[%c0, %c0_7] : memref<8x1xf32, #tpu.memory_space<vmem>>, vector<8x1xf32>
      %cst = arith.constant 9.765625E-4 : f32
      %17 = vector.broadcast %cst : f32 to vector<8x1xf32>
      %18 = arith.mulf %16, %17 : vector<8x1xf32>
      %c0_8 = arith.constant 0 : index
      %c0_9 = arith.constant 0 : index
      %19 = vector.load %arg8[%c0_8, %c0_9] : memref<8x1xf32, #tpu.memory_space<vmem>>, vector<8x1xf32>
      %cst_10 = arith.constant 9.765625E-4 : f32
      %20 = vector.broadcast %cst_10 : f32 to vector<8x1xf32>
      %21 = arith.mulf %19, %20 : vector<8x1xf32>
      %22 = arith.mulf %18, %18 : vector<8x1xf32>
      %23 = arith.subf %21, %22 : vector<8x1xf32>
      %cst_11 = arith.constant 0.000000e+00 : f32
      %24 = vector.broadcast %cst_11 : f32 to vector<8x1xf32>
      %25 = arith.maximumf %23, %24 : vector<8x1xf32>
      %cst_12 = arith.constant 9.99999974E-6 : f32
      %26 = vector.broadcast %cst_12 : f32 to vector<8x1xf32>
      %27 = arith.addf %25, %26 : vector<8x1xf32>
      %28 = math.rsqrt %27 : vector<8x1xf32>
      %c0_13 = arith.constant 0 : index
      %c0_14 = arith.constant 0 : index
      %c0_15 = arith.constant 0 : index
      %c0_16 = arith.constant 0 : index
      %29 = vector.load %arg4[%c0_13, %c0_14, %c0_15, %c0_16] : memref<1x4x8x32xf32, #tpu.memory_space<vmem>>, vector<1x4x1x32xf32>
      %30 = vector.shape_cast %29 : vector<1x4x1x32xf32> to vector<4x32xf32>
      %c0_17 = arith.constant 0 : index
      %c0_18 = arith.constant 0 : index
      %c0_19 = arith.constant 0 : index
      %c0_20 = arith.constant 0 : index
      %31 = vector.load %arg5[%c0_17, %c0_18, %c0_19, %c0_20] : memref<2x2x8x4xf32, #tpu.memory_space<vmem>>, vector<1x1x8x4xf32>
      %32 = vector.shape_cast %31 : vector<1x1x8x4xf32> to vector<8x4xf32>
      %cst_21 = arith.constant dense<0.000000e+00> : vector<8x32xf32>
      %33 = tpu.matmul %32, %30, %cst_21 {dimension_numbers = #tpu.dot_dimension_numbers<[1], [0], [0], [1], [0, 0, 1, 1], [], []>} : vector<8x4xf32>, vector<4x32xf32>, vector<8x32xf32> -> vector<8x32xf32>
      %c0_22 = arith.constant 0 : index
      %c1 = arith.constant 1 : index
      %c0_23 = arith.constant 0 : index
      %c0_24 = arith.constant 0 : index
      %34 = vector.load %arg5[%c0_22, %c1, %c0_23, %c0_24] : memref<2x2x8x4xf32, #tpu.memory_space<vmem>>, vector<1x1x8x4xf32>
      %35 = vector.shape_cast %34 : vector<1x1x8x4xf32> to vector<8x4xf32>
      %cst_25 = arith.constant dense<0.000000e+00> : vector<8x32xf32>
      %36 = tpu.matmul %35, %30, %cst_25 {dimension_numbers = #tpu.dot_dimension_numbers<[1], [0], [0], [1], [0, 0, 1, 1], [], []>} : vector<8x4xf32>, vector<4x32xf32>, vector<8x32xf32> -> vector<8x32xf32>
      %37 = arith.select %4, %33, %36 : vector<8x32xi1>, vector<8x32xf32>
      %38 = vector.broadcast %18 : vector<8x1xf32> to vector<8x32xf32>
      %39 = arith.subf %37, %38 : vector<8x32xf32>
      %40 = vector.broadcast %28 : vector<8x1xf32> to vector<8x32xf32>
      %41 = arith.mulf %39, %40 : vector<8x32xf32>
      %cst_26 = arith.constant 0.000000e+00 : f32
      %42 = vector.broadcast %cst_26 : f32 to vector<8x32xf32>
      %43 = arith.cmpf ogt, %41, %42 : vector<8x32xf32>
      %cst_27 = arith.constant 2.000000e-01 : f32
      %44 = vector.broadcast %cst_27 : f32 to vector<8x32xf32>
      %45 = arith.mulf %44, %41 : vector<8x32xf32>
      %46 = arith.select %43, %41, %45 : vector<8x32xi1>, vector<8x32xf32>
      %c0_28 = arith.constant 0 : index
      %c0_29 = arith.constant 0 : index
      %c0_30 = arith.constant 0 : index
      %c0_31 = arith.constant 0 : index
      %47 = vector.load %arg6[%c0_28, %c0_29, %c0_30, %c0_31] : memref<1x8x16x32xf32, #tpu.memory_space<vmem>>, vector<1x8x1x32xf32>
      %48 = vector.shape_cast %47 : vector<1x8x1x32xf32> to vector<8x32xf32>
      %49 = vector.shape_cast %46 : vector<8x32xf32> to vector<1x8x1x32xf32>
      tpu.vector_store %arg6[%c0_28, %c0_29, %c0_30, %c0_31], %49 {strides = array<i32>} : memref<1x8x16x32xf32, #tpu.memory_space<vmem>>, vector<1x8x1x32xf32>,
      %c1_32 = arith.constant 1 : index
      %c0_33 = arith.constant 0 : index
      %c0_34 = arith.constant 0 : index
      %c0_35 = arith.constant 0 : index
      %50 = vector.load %arg5[%c1_32, %c0_33, %c0_34, %c0_35] : memref<2x2x8x4xf32, #tpu.memory_space<vmem>>, vector<1x1x8x4xf32>
      %51 = vector.shape_cast %50 : vector<1x1x8x4xf32> to vector<8x4xf32>
      %cst_36 = arith.constant dense<0.000000e+00> : vector<8x32xf32>
      %52 = tpu.matmul %51, %30, %cst_36 {dimension_numbers = #tpu.dot_dimension_numbers<[1], [0], [0], [1], [0, 0, 1, 1], [], []>} : vector<8x4xf32>, vector<4x32xf32>, vector<8x32xf32> -> vector<8x32xf32>
      %c1_37 = arith.constant 1 : index
      %c1_38 = arith.constant 1 : index
      %c0_39 = arith.constant 0 : index
      %c0_40 = arith.constant 0 : index
      %53 = vector.load %arg5[%c1_37, %c1_38, %c0_39, %c0_40] : memref<2x2x8x4xf32, #tpu.memory_space<vmem>>, vector<1x1x8x4xf32>
      %54 = vector.shape_cast %53 : vector<1x1x8x4xf32> to vector<8x4xf32>
      %cst_41 = arith.constant dense<0.000000e+00> : vector<8x32xf32>
      %55 = tpu.matmul %54, %30, %cst_41 {dimension_numbers = #tpu.dot_dimension_numbers<[1], [0], [0], [1], [0, 0, 1, 1], [], []>} : vector<8x4xf32>, vector<4x32xf32>, vector<8x32xf32> -> vector<8x32xf32>
      %56 = arith.select %4, %52, %55 : vector<8x32xi1>, vector<8x32xf32>
      %57 = vector.broadcast %18 : vector<8x1xf32> to vector<8x32xf32>
      %58 = arith.subf %56, %57 : vector<8x32xf32>
      %59 = vector.broadcast %28 : vector<8x1xf32> to vector<8x32xf32>
      %60 = arith.mulf %58, %59 : vector<8x32xf32>
      %cst_42 = arith.constant 0.000000e+00 : f32
      %61 = vector.broadcast %cst_42 : f32 to vector<8x32xf32>
      %62 = arith.cmpf ogt, %60, %61 : vector<8x32xf32>
      %cst_43 = arith.constant 2.000000e-01 : f32
      %63 = vector.broadcast %cst_43 : f32 to vector<8x32xf32>
      %64 = arith.mulf %63, %60 : vector<8x32xf32>
      %65 = arith.select %62, %60, %64 : vector<8x32xi1>, vector<8x32xf32>
      %c0_44 = arith.constant 0 : index
      %c0_45 = arith.constant 0 : index
      %c1_46 = arith.constant 1 : index
      %c0_47 = arith.constant 0 : index
      %66 = vector.load %arg6[%c0_44, %c0_45, %c1_46, %c0_47] : memref<1x8x16x32xf32, #tpu.memory_space<vmem>>, vector<1x8x1x32xf32>
      %67 = vector.shape_cast %66 : vector<1x8x1x32xf32> to vector<8x32xf32>
      %68 = vector.shape_cast %65 : vector<8x32xf32> to vector<1x8x1x32xf32>
      tpu.vector_store %arg6[%c0_44, %c0_45, %c1_46, %c0_47], %68 {strides = array<i32>} : memref<1x8x16x32xf32, #tpu.memory_space<vmem>>, vector<1x8x1x32xf32>,
      %c0_48 = arith.constant 0 : index
      %c0_49 = arith.constant 0 : index
      %c1_50 = arith.constant 1 : index
      %c0_51 = arith.constant 0 : index
      %69 = vector.load %arg4[%c0_48, %c0_49, %c1_50, %c0_51] : memref<1x4x8x32xf32, #tpu.memory_space<vmem>>, vector<1x4x1x32xf32>
      %70 = vector.shape_cast %69 : vector<1x4x1x32xf32> to vector<4x32xf32>
      %c0_52 = arith.constant 0 : index
      %c0_53 = arith.constant 0 : index
      %c0_54 = arith.constant 0 : index
      %c0_55 = arith.constant 0 : index
      %71 = vector.load %arg5[%c0_52, %c0_53, %c0_54, %c0_55] : memref<2x2x8x4xf32, #tpu.memory_space<vmem>>, vector<1x1x8x4xf32>
      %72 = vector.shape_cast %71 : vector<1x1x8x4xf32> to vector<8x4xf32>
      %cst_56 = arith.constant dense<0.000000e+00> : vector<8x32xf32>
      %73 = tpu.matmul %72, %70, %cst_56 {dimension_numbers = #tpu.dot_dimension_numbers<[1], [0], [0], [1], [0, 0, 1, 1], [], []>} : vector<8x4xf32>, vector<4x32xf32>, vector<8x32xf32> -> vector<8x32xf32>
      %c0_57 = arith.constant 0 : index
      %c1_58 = arith.constant 1 : index
      %c0_59 = arith.constant 0 : index
      %c0_60 = arith.constant 0 : index
      %74 = vector.load %arg5[%c0_57, %c1_58, %c0_59, %c0_60] : memref<2x2x8x4xf32, #tpu.memory_space<vmem>>, vector<1x1x8x4xf32>
      %75 = vector.shape_cast %74 : vector<1x1x8x4xf32> to vector<8x4xf32>
      %cst_61 = arith.constant dense<0.000000e+00> : vector<8x32xf32>
      %76 = tpu.matmul %75, %70, %cst_61 {dimension_numbers = #tpu.dot_dimension_numbers<[1], [0], [0], [1], [0, 0, 1, 1], [], []>} : vector<8x4xf32>, vector<4x32xf32>, vector<8x32xf32> -> vector<8x32xf32>
      %77 = arith.select %4, %73, %76 : vector<8x32xi1>, vector<8x32xf32>
      %78 = vector.broadcast %18 : vector<8x1xf32> to vector<8x32xf32>
      %79 = arith.subf %77, %78 : vector<8x32xf32>
      %80 = vector.broadcast %28 : vector<8x1xf32> to vector<8x32xf32>
      %81 = arith.mulf %79, %80 : vector<8x32xf32>
      %cst_62 = arith.constant 0.000000e+00 : f32
      %82 = vector.broadcast %cst_62 : f32 to vector<8x32xf32>
      %83 = arith.cmpf ogt, %81, %82 : vector<8x32xf32>
      %cst_63 = arith.constant 2.000000e-01 : f32
      %84 = vector.broadcast %cst_63 : f32 to vector<8x32xf32>
      %85 = arith.mulf %84, %81 : vector<8x32xf32>
      %86 = arith.select %83, %81, %85 : vector<8x32xi1>, vector<8x32xf32>
      %c0_64 = arith.constant 0 : index
      %c0_65 = arith.constant 0 : index
      %c2 = arith.constant 2 : index
      %c0_66 = arith.constant 0 : index
      %87 = vector.load %arg6[%c0_64, %c0_65, %c2, %c0_66] : memref<1x8x16x32xf32, #tpu.memory_space<vmem>>, vector<1x8x1x32xf32>
      %88 = vector.shape_cast %87 : vector<1x8x1x32xf32> to vector<8x32xf32>
      %89 = vector.shape_cast %86 : vector<8x32xf32> to vector<1x8x1x32xf32>
      tpu.vector_store %arg6[%c0_64, %c0_65, %c2, %c0_66], %89 {strides = array<i32>} : memref<1x8x16x32xf32, #tpu.memory_space<vmem>>, vector<1x8x1x32xf32>,
      %c1_67 = arith.constant 1 : index
      %c0_68 = arith.constant 0 : index
      %c0_69 = arith.constant 0 : index
      %c0_70 = arith.constant 0 : index
      %90 = vector.load %arg5[%c1_67, %c0_68, %c0_69, %c0_70] : memref<2x2x8x4xf32, #tpu.memory_space<vmem>>, vector<1x1x8x4xf32>
      %91 = vector.shape_cast %90 : vector<1x1x8x4xf32> to vector<8x4xf32>
      %cst_71 = arith.constant dense<0.000000e+00> : vector<8x32xf32>
      %92 = tpu.matmul %91, %70, %cst_71 {dimension_numbers = #tpu.dot_dimension_numbers<[1], [0], [0], [1], [0, 0, 1, 1], [], []>} : vector<8x4xf32>, vector<4x32xf32>, vector<8x32xf32> -> vector<8x32xf32>
      %c1_72 = arith.constant 1 : index
      %c1_73 = arith.constant 1 : index
      %c0_74 = arith.constant 0 : index
      %c0_75 = arith.constant 0 : index
      %93 = vector.load %arg5[%c1_72, %c1_73, %c0_74, %c0_75] : memref<2x2x8x4xf32, #tpu.memory_space<vmem>>, vector<1x1x8x4xf32>
      %94 = vector.shape_cast %93 : vector<1x1x8x4xf32> to vector<8x4xf32>
      %cst_76 = arith.constant dense<0.000000e+00> : vector<8x32xf32>
      %95 = tpu.matmul %94, %70, %cst_76 {dimension_numbers = #tpu.dot_dimension_numbers<[1], [0], [0], [1], [0, 0, 1, 1], [], []>} : vector<8x4xf32>, vector<4x32xf32>, vector<8x32xf32> -> vector<8x32xf32>
      %96 = arith.select %4, %92, %95 : vector<8x32xi1>, vector<8x32xf32>
      %97 = vector.broadcast %18 : vector<8x1xf32> to vector<8x32xf32>
      %98 = arith.subf %96, %97 : vector<8x32xf32>
      %99 = vector.broadcast %28 : vector<8x1xf32> to vector<8x32xf32>
      %100 = arith.mulf %98, %99 : vector<8x32xf32>
      %cst_77 = arith.constant 0.000000e+00 : f32
      %101 = vector.broadcast %cst_77 : f32 to vector<8x32xf32>
      %102 = arith.cmpf ogt, %100, %101 : vector<8x32xf32>
      %cst_78 = arith.constant 2.000000e-01 : f32
      %103 = vector.broadcast %cst_78 : f32 to vector<8x32xf32>
      %104 = arith.mulf %103, %100 : vector<8x32xf32>
      %105 = arith.select %102, %100, %104 : vector<8x32xi1>, vector<8x32xf32>
      %c0_79 = arith.constant 0 : index
      %c0_80 = arith.constant 0 : index
      %c3 = arith.constant 3 : index
      %c0_81 = arith.constant 0 : index
      %106 = vector.load %arg6[%c0_79, %c0_80, %c3, %c0_81] : memref<1x8x16x32xf32, #tpu.memory_space<vmem>>, vector<1x8x1x32xf32>
      %107 = vector.shape_cast %106 : vector<1x8x1x32xf32> to vector<8x32xf32>
      %108 = vector.shape_cast %105 : vector<8x32xf32> to vector<1x8x1x32xf32>
      tpu.vector_store %arg6[%c0_79, %c0_80, %c3, %c0_81], %108 {strides = array<i32>} : memref<1x8x16x32xf32, #tpu.memory_space<vmem>>, vector<1x8x1x32xf32>,
      %c0_82 = arith.constant 0 : index
      %c0_83 = arith.constant 0 : index
      %c2_84 = arith.constant 2 : index
      %c0_85 = arith.constant 0 : index
      %109 = vector.load %arg4[%c0_82, %c0_83, %c2_84, %c0_85] : memref<1x4x8x32xf32, #tpu.memory_space<vmem>>, vector<1x4x1x32xf32>
      %110 = vector.shape_cast %109 : vector<1x4x1x32xf32> to vector<4x32xf32>
      %c0_86 = arith.constant 0 : index
      %c0_87 = arith.constant 0 : index
      %c0_88 = arith.constant 0 : index
      %c0_89 = arith.constant 0 : index
      %111 = vector.load %arg5[%c0_86, %c0_87, %c0_88, %c0_89] : memref<2x2x8x4xf32, #tpu.memory_space<vmem>>, vector<1x1x8x4xf32>
      %112 = vector.shape_cast %111 : vector<1x1x8x4xf32> to vector<8x4xf32>
      %cst_90 = arith.constant dense<0.000000e+00> : vector<8x32xf32>
      %113 = tpu.matmul %112, %110, %cst_90 {dimension_numbers = #tpu.dot_dimension_numbers<[1], [0], [0], [1], [0, 0, 1, 1], [], []>} : vector<8x4xf32>, vector<4x32xf32>, vector<8x32xf32> -> vector<8x32xf32>
      %c0_91 = arith.constant 0 : index
      %c1_92 = arith.constant 1 : index
      %c0_93 = arith.constant 0 : index
      %c0_94 = arith.constant 0 : index
      %114 = vector.load %arg5[%c0_91, %c1_92, %c0_93, %c0_94] : memref<2x2x8x4xf32, #tpu.memory_space<vmem>>, vector<1x1x8x4xf32>
      %115 = vector.shape_cast %114 : vector<1x1x8x4xf32> to vector<8x4xf32>
      %cst_95 = arith.constant dense<0.000000e+00> : vector<8x32xf32>
      %116 = tpu.matmul %115, %110, %cst_95 {dimension_numbers = #tpu.dot_dimension_numbers<[1], [0], [0], [1], [0, 0, 1, 1], [], []>} : vector<8x4xf32>, vector<4x32xf32>, vector<8x32xf32> -> vector<8x32xf32>
      %117 = arith.select %4, %113, %116 : vector<8x32xi1>, vector<8x32xf32>
      %118 = vector.broadcast %18 : vector<8x1xf32> to vector<8x32xf32>
      %119 = arith.subf %117, %118 : vector<8x32xf32>
      %120 = vector.broadcast %28 : vector<8x1xf32> to vector<8x32xf32>
      %121 = arith.mulf %119, %120 : vector<8x32xf32>
      %cst_96 = arith.constant 0.000000e+00 : f32
      %122 = vector.broadcast %cst_96 : f32 to vector<8x32xf32>
      %123 = arith.cmpf ogt, %121, %122 : vector<8x32xf32>
      %cst_97 = arith.constant 2.000000e-01 : f32
      %124 = vector.broadcast %cst_97 : f32 to vector<8x32xf32>
      %125 = arith.mulf %124, %121 : vector<8x32xf32>
      %126 = arith.select %123, %121, %125 : vector<8x32xi1>, vector<8x32xf32>
      %c0_98 = arith.constant 0 : index
      %c0_99 = arith.constant 0 : index
      %c4 = arith.constant 4 : index
      %c0_100 = arith.constant 0 : index
      %127 = vector.load %arg6[%c0_98, %c0_99, %c4, %c0_100] : memref<1x8x16x32xf32, #tpu.memory_space<vmem>>, vector<1x8x1x32xf32>
      %128 = vector.shape_cast %127 : vector<1x8x1x32xf32> to vector<8x32xf32>
      %129 = vector.shape_cast %126 : vector<8x32xf32> to vector<1x8x1x32xf32>
      tpu.vector_store %arg6[%c0_98, %c0_99, %c4, %c0_100], %129 {strides = array<i32>} : memref<1x8x16x32xf32, #tpu.memory_space<vmem>>, vector<1x8x1x32xf32>,
      %c1_101 = arith.constant 1 : index
      %c0_102 = arith.constant 0 : index
      %c0_103 = arith.constant 0 : index
      %c0_104 = arith.constant 0 : index
      %130 = vector.load %arg5[%c1_101, %c0_102, %c0_103, %c0_104] : memref<2x2x8x4xf32, #tpu.memory_space<vmem>>, vector<1x1x8x4xf32>
      %131 = vector.shape_cast %130 : vector<1x1x8x4xf32> to vector<8x4xf32>
      %cst_105 = arith.constant dense<0.000000e+00> : vector<8x32xf32>
      %132 = tpu.matmul %131, %110, %cst_105 {dimension_numbers = #tpu.dot_dimension_numbers<[1], [0], [0], [1], [0, 0, 1, 1], [], []>} : vector<8x4xf32>, vector<4x32xf32>, vector<8x32xf32> -> vector<8x32xf32>
      %c1_106 = arith.constant 1 : index
      %c1_107 = arith.constant 1 : index
      %c0_108 = arith.constant 0 : index
      %c0_109 = arith.constant 0 : index
      %133 = vector.load %arg5[%c1_106, %c1_107, %c0_108, %c0_109] : memref<2x2x8x4xf32, #tpu.memory_space<vmem>>, vector<1x1x8x4xf32>
      %134 = vector.shape_cast %133 : vector<1x1x8x4xf32> to vector<8x4xf32>
      %cst_110 = arith.constant dense<0.000000e+00> : vector<8x32xf32>
      %135 = tpu.matmul %134, %110, %cst_110 {dimension_numbers = #tpu.dot_dimension_numbers<[1], [0], [0], [1], [0, 0, 1, 1], [], []>} : vector<8x4xf32>, vector<4x32xf32>, vector<8x32xf32> -> vector<8x32xf32>
      %136 = arith.select %4, %132, %135 : vector<8x32xi1>, vector<8x32xf32>
      %137 = vector.broadcast %18 : vector<8x1xf32> to vector<8x32xf32>
      %138 = arith.subf %136, %137 : vector<8x32xf32>
      %139 = vector.broadcast %28 : vector<8x1xf32> to vector<8x32xf32>
      %140 = arith.mulf %138, %139 : vector<8x32xf32>
      %cst_111 = arith.constant 0.000000e+00 : f32
      %141 = vector.broadcast %cst_111 : f32 to vector<8x32xf32>
      %142 = arith.cmpf ogt, %140, %141 : vector<8x32xf32>
      %cst_112 = arith.constant 2.000000e-01 : f32
      %143 = vector.broadcast %cst_112 : f32 to vector<8x32xf32>
      %144 = arith.mulf %143, %140 : vector<8x32xf32>
      %145 = arith.select %142, %140, %144 : vector<8x32xi1>, vector<8x32xf32>
      %c0_113 = arith.constant 0 : index
      %c0_114 = arith.constant 0 : index
      %c5 = arith.constant 5 : index
      %c0_115 = arith.constant 0 : index
      %146 = vector.load %arg6[%c0_113, %c0_114, %c5, %c0_115] : memref<1x8x16x32xf32, #tpu.memory_space<vmem>>, vector<1x8x1x32xf32>
      %147 = vector.shape_cast %146 : vector<1x8x1x32xf32> to vector<8x32xf32>
      %148 = vector.shape_cast %145 : vector<8x32xf32> to vector<1x8x1x32xf32>
      tpu.vector_store %arg6[%c0_113, %c0_114, %c5, %c0_115], %148 {strides = array<i32>} : memref<1x8x16x32xf32, #tpu.memory_space<vmem>>, vector<1x8x1x32xf32>,
      %c0_116 = arith.constant 0 : index
      %c0_117 = arith.constant 0 : index
      %c3_118 = arith.constant 3 : index
      %c0_119 = arith.constant 0 : index
      %149 = vector.load %arg4[%c0_116, %c0_117, %c3_118, %c0_119] : memref<1x4x8x32xf32, #tpu.memory_space<vmem>>, vector<1x4x1x32xf32>
      %150 = vector.shape_cast %149 : vector<1x4x1x32xf32> to vector<4x32xf32>
      %c0_120 = arith.constant 0 : index
      %c0_121 = arith.constant 0 : index
      %c0_122 = arith.constant 0 : index
      %c0_123 = arith.constant 0 : index
      %151 = vector.load %arg5[%c0_120, %c0_121, %c0_122, %c0_123] : memref<2x2x8x4xf32, #tpu.memory_space<vmem>>, vector<1x1x8x4xf32>
      %152 = vector.shape_cast %151 : vector<1x1x8x4xf32> to vector<8x4xf32>
      %cst_124 = arith.constant dense<0.000000e+00> : vector<8x32xf32>
      %153 = tpu.matmul %152, %150, %cst_124 {dimension_numbers = #tpu.dot_dimension_numbers<[1], [0], [0], [1], [0, 0, 1, 1], [], []>} : vector<8x4xf32>, vector<4x32xf32>, vector<8x32xf32> -> vector<8x32xf32>
      %c0_125 = arith.constant 0 : index
      %c1_126 = arith.constant 1 : index
      %c0_127 = arith.constant 0 : index
      %c0_128 = arith.constant 0 : index
      %154 = vector.load %arg5[%c0_125, %c1_126, %c0_127, %c0_128] : memref<2x2x8x4xf32, #tpu.memory_space<vmem>>, vector<1x1x8x4xf32>
      %155 = vector.shape_cast %154 : vector<1x1x8x4xf32> to vector<8x4xf32>
      %cst_129 = arith.constant dense<0.000000e+00> : vector<8x32xf32>
      %156 = tpu.matmul %155, %150, %cst_129 {dimension_numbers = #tpu.dot_dimension_numbers<[1], [0], [0], [1], [0, 0, 1, 1], [], []>} : vector<8x4xf32>, vector<4x32xf32>, vector<8x32xf32> -> vector<8x32xf32>
      %157 = arith.select %4, %153, %156 : vector<8x32xi1>, vector<8x32xf32>
      %158 = vector.broadcast %18 : vector<8x1xf32> to vector<8x32xf32>
      %159 = arith.subf %157, %158 : vector<8x32xf32>
      %160 = vector.broadcast %28 : vector<8x1xf32> to vector<8x32xf32>
      %161 = arith.mulf %159, %160 : vector<8x32xf32>
      %cst_130 = arith.constant 0.000000e+00 : f32
      %162 = vector.broadcast %cst_130 : f32 to vector<8x32xf32>
      %163 = arith.cmpf ogt, %161, %162 : vector<8x32xf32>
      %cst_131 = arith.constant 2.000000e-01 : f32
      %164 = vector.broadcast %cst_131 : f32 to vector<8x32xf32>
      %165 = arith.mulf %164, %161 : vector<8x32xf32>
      %166 = arith.select %163, %161, %165 : vector<8x32xi1>, vector<8x32xf32>
      %c0_132 = arith.constant 0 : index
      %c0_133 = arith.constant 0 : index
      %c6 = arith.constant 6 : index
      %c0_134 = arith.constant 0 : index
      %167 = vector.load %arg6[%c0_132, %c0_133, %c6, %c0_134] : memref<1x8x16x32xf32, #tpu.memory_space<vmem>>, vector<1x8x1x32xf32>
      %168 = vector.shape_cast %167 : vector<1x8x1x32xf32> to vector<8x32xf32>
      %169 = vector.shape_cast %166 : vector<8x32xf32> to vector<1x8x1x32xf32>
      tpu.vector_store %arg6[%c0_132, %c0_133, %c6, %c0_134], %169 {strides = array<i32>} : memref<1x8x16x32xf32, #tpu.memory_space<vmem>>, vector<1x8x1x32xf32>,
      %c1_135 = arith.constant 1 : index
      %c0_136 = arith.constant 0 : index
      %c0_137 = arith.constant 0 : index
      %c0_138 = arith.constant 0 : index
      %170 = vector.load %arg5[%c1_135, %c0_136, %c0_137, %c0_138] : memref<2x2x8x4xf32, #tpu.memory_space<vmem>>, vector<1x1x8x4xf32>
      %171 = vector.shape_cast %170 : vector<1x1x8x4xf32> to vector<8x4xf32>
      %cst_139 = arith.constant dense<0.000000e+00> : vector<8x32xf32>
      %172 = tpu.matmul %171, %150, %cst_139 {dimension_numbers = #tpu.dot_dimension_numbers<[1], [0], [0], [1], [0, 0, 1, 1], [], []>} : vector<8x4xf32>, vector<4x32xf32>, vector<8x32xf32> -> vector<8x32xf32>
      %c1_140 = arith.constant 1 : index
      %c1_141 = arith.constant 1 : index
      %c0_142 = arith.constant 0 : index
      %c0_143 = arith.constant 0 : index
      %173 = vector.load %arg5[%c1_140, %c1_141, %c0_142, %c0_143] : memref<2x2x8x4xf32, #tpu.memory_space<vmem>>, vector<1x1x8x4xf32>
      %174 = vector.shape_cast %173 : vector<1x1x8x4xf32> to vector<8x4xf32>
      %cst_144 = arith.constant dense<0.000000e+00> : vector<8x32xf32>
      %175 = tpu.matmul %174, %150, %cst_144 {dimension_numbers = #tpu.dot_dimension_numbers<[1], [0], [0], [1], [0, 0, 1, 1], [], []>} : vector<8x4xf32>, vector<4x32xf32>, vector<8x32xf32> -> vector<8x32xf32>
      %176 = arith.select %4, %172, %175 : vector<8x32xi1>, vector<8x32xf32>
      %177 = vector.broadcast %18 : vector<8x1xf32> to vector<8x32xf32>
      %178 = arith.subf %176, %177 : vector<8x32xf32>
      %179 = vector.broadcast %28 : vector<8x1xf32> to vector<8x32xf32>
      %180 = arith.mulf %178, %179 : vector<8x32xf32>
      %cst_145 = arith.constant 0.000000e+00 : f32
      %181 = vector.broadcast %cst_145 : f32 to vector<8x32xf32>
      %182 = arith.cmpf ogt, %180, %181 : vector<8x32xf32>
      %cst_146 = arith.constant 2.000000e-01 : f32
      %183 = vector.broadcast %cst_146 : f32 to vector<8x32xf32>
      %184 = arith.mulf %183, %180 : vector<8x32xf32>
      %185 = arith.select %182, %180, %184 : vector<8x32xi1>, vector<8x32xf32>
      %c0_147 = arith.constant 0 : index
      %c0_148 = arith.constant 0 : index
      %c7 = arith.constant 7 : index
      %c0_149 = arith.constant 0 : index
      %186 = vector.load %arg6[%c0_147, %c0_148, %c7, %c0_149] : memref<1x8x16x32xf32, #tpu.memory_space<vmem>>, vector<1x8x1x32xf32>
      %187 = vector.shape_cast %186 : vector<1x8x1x32xf32> to vector<8x32xf32>
      %188 = vector.shape_cast %185 : vector<8x32xf32> to vector<1x8x1x32xf32>
      tpu.vector_store %arg6[%c0_147, %c0_148, %c7, %c0_149], %188 {strides = array<i32>} : memref<1x8x16x32xf32, #tpu.memory_space<vmem>>, vector<1x8x1x32xf32>,
      %c0_150 = arith.constant 0 : index
      %c0_151 = arith.constant 0 : index
      %c4_152 = arith.constant 4 : index
      %c0_153 = arith.constant 0 : index
      %189 = vector.load %arg4[%c0_150, %c0_151, %c4_152, %c0_153] : memref<1x4x8x32xf32, #tpu.memory_space<vmem>>, vector<1x4x1x32xf32>
      %190 = vector.shape_cast %189 : vector<1x4x1x32xf32> to vector<4x32xf32>
      %c0_154 = arith.constant 0 : index
      %c0_155 = arith.constant 0 : index
      %c0_156 = arith.constant 0 : index
      %c0_157 = arith.constant 0 : index
      %191 = vector.load %arg5[%c0_154, %c0_155, %c0_156, %c0_157] : memref<2x2x8x4xf32, #tpu.memory_space<vmem>>, vector<1x1x8x4xf32>
      %192 = vector.shape_cast %191 : vector<1x1x8x4xf32> to vector<8x4xf32>
      %cst_158 = arith.constant dense<0.000000e+00> : vector<8x32xf32>
      %193 = tpu.matmul %192, %190, %cst_158 {dimension_numbers = #tpu.dot_dimension_numbers<[1], [0], [0], [1], [0, 0, 1, 1], [], []>} : vector<8x4xf32>, vector<4x32xf32>, vector<8x32xf32> -> vector<8x32xf32>
      %c0_159 = arith.constant 0 : index
      %c1_160 = arith.constant 1 : index
      %c0_161 = arith.constant 0 : index
      %c0_162 = arith.constant 0 : index
      %194 = vector.load %arg5[%c0_159, %c1_160, %c0_161, %c0_162] : memref<2x2x8x4xf32, #tpu.memory_space<vmem>>, vector<1x1x8x4xf32>
      %195 = vector.shape_cast %194 : vector<1x1x8x4xf32> to vector<8x4xf32>
      %cst_163 = arith.constant dense<0.000000e+00> : vector<8x32xf32>
      %196 = tpu.matmul %195, %190, %cst_163 {dimension_numbers = #tpu.dot_dimension_numbers<[1], [0], [0], [1], [0, 0, 1, 1], [], []>} : vector<8x4xf32>, vector<4x32xf32>, vector<8x32xf32> -> vector<8x32xf32>
      %197 = arith.select %4, %193, %196 : vector<8x32xi1>, vector<8x32xf32>
      %198 = vector.broadcast %18 : vector<8x1xf32> to vector<8x32xf32>
      %199 = arith.subf %197, %198 : vector<8x32xf32>
      %200 = vector.broadcast %28 : vector<8x1xf32> to vector<8x32xf32>
      %201 = arith.mulf %199, %200 : vector<8x32xf32>
      %cst_164 = arith.constant 0.000000e+00 : f32
      %202 = vector.broadcast %cst_164 : f32 to vector<8x32xf32>
      %203 = arith.cmpf ogt, %201, %202 : vector<8x32xf32>
      %cst_165 = arith.constant 2.000000e-01 : f32
      %204 = vector.broadcast %cst_165 : f32 to vector<8x32xf32>
      %205 = arith.mulf %204, %201 : vector<8x32xf32>
      %206 = arith.select %203, %201, %205 : vector<8x32xi1>, vector<8x32xf32>
      %c0_166 = arith.constant 0 : index
      %c0_167 = arith.constant 0 : index
      %c8 = arith.constant 8 : index
      %c0_168 = arith.constant 0 : index
      %207 = vector.load %arg6[%c0_166, %c0_167, %c8, %c0_168] : memref<1x8x16x32xf32, #tpu.memory_space<vmem>>, vector<1x8x1x32xf32>
      %208 = vector.shape_cast %207 : vector<1x8x1x32xf32> to vector<8x32xf32>
      %209 = vector.shape_cast %206 : vector<8x32xf32> to vector<1x8x1x32xf32>
      tpu.vector_store %arg6[%c0_166, %c0_167, %c8, %c0_168], %209 {strides = array<i32>} : memref<1x8x16x32xf32, #tpu.memory_space<vmem>>, vector<1x8x1x32xf32>,
      %c1_169 = arith.constant 1 : index
      %c0_170 = arith.constant 0 : index
      %c0_171 = arith.constant 0 : index
      %c0_172 = arith.constant 0 : index
      %210 = vector.load %arg5[%c1_169, %c0_170, %c0_171, %c0_172] : memref<2x2x8x4xf32, #tpu.memory_space<vmem>>, vector<1x1x8x4xf32>
      %211 = vector.shape_cast %210 : vector<1x1x8x4xf32> to vector<8x4xf32>
      %cst_173 = arith.constant dense<0.000000e+00> : vector<8x32xf32>
      %212 = tpu.matmul %211, %190, %cst_173 {dimension_numbers = #tpu.dot_dimension_numbers<[1], [0], [0], [1], [0, 0, 1, 1], [], []>} : vector<8x4xf32>, vector<4x32xf32>, vector<8x32xf32> -> vector<8x32xf32>
      %c1_174 = arith.constant 1 : index
      %c1_175 = arith.constant 1 : index
      %c0_176 = arith.constant 0 : index
      %c0_177 = arith.constant 0 : index
      %213 = vector.load %arg5[%c1_174, %c1_175, %c0_176, %c0_177] : memref<2x2x8x4xf32, #tpu.memory_space<vmem>>, vector<1x1x8x4xf32>
      %214 = vector.shape_cast %213 : vector<1x1x8x4xf32> to vector<8x4xf32>
      %cst_178 = arith.constant dense<0.000000e+00> : vector<8x32xf32>
      %215 = tpu.matmul %214, %190, %cst_178 {dimension_numbers = #tpu.dot_dimension_numbers<[1], [0], [0], [1], [0, 0, 1, 1], [], []>} : vector<8x4xf32>, vector<4x32xf32>, vector<8x32xf32> -> vector<8x32xf32>
      %216 = arith.select %4, %212, %215 : vector<8x32xi1>, vector<8x32xf32>
      %217 = vector.broadcast %18 : vector<8x1xf32> to vector<8x32xf32>
      %218 = arith.subf %216, %217 : vector<8x32xf32>
      %219 = vector.broadcast %28 : vector<8x1xf32> to vector<8x32xf32>
      %220 = arith.mulf %218, %219 : vector<8x32xf32>
      %cst_179 = arith.constant 0.000000e+00 : f32
      %221 = vector.broadcast %cst_179 : f32 to vector<8x32xf32>
      %222 = arith.cmpf ogt, %220, %221 : vector<8x32xf32>
      %cst_180 = arith.constant 2.000000e-01 : f32
      %223 = vector.broadcast %cst_180 : f32 to vector<8x32xf32>
      %224 = arith.mulf %223, %220 : vector<8x32xf32>
      %225 = arith.select %222, %220, %224 : vector<8x32xi1>, vector<8x32xf32>
      %c0_181 = arith.constant 0 : index
      %c0_182 = arith.constant 0 : index
      %c9 = arith.constant 9 : index
      %c0_183 = arith.constant 0 : index
      %226 = vector.load %arg6[%c0_181, %c0_182, %c9, %c0_183] : memref<1x8x16x32xf32, #tpu.memory_space<vmem>>, vector<1x8x1x32xf32>
      %227 = vector.shape_cast %226 : vector<1x8x1x32xf32> to vector<8x32xf32>
      %228 = vector.shape_cast %225 : vector<8x32xf32> to vector<1x8x1x32xf32>
      tpu.vector_store %arg6[%c0_181, %c0_182, %c9, %c0_183], %228 {strides = array<i32>} : memref<1x8x16x32xf32, #tpu.memory_space<vmem>>, vector<1x8x1x32xf32>,
      %c0_184 = arith.constant 0 : index
      %c0_185 = arith.constant 0 : index
      %c5_186 = arith.constant 5 : index
      %c0_187 = arith.constant 0 : index
      %229 = vector.load %arg4[%c0_184, %c0_185, %c5_186, %c0_187] : memref<1x4x8x32xf32, #tpu.memory_space<vmem>>, vector<1x4x1x32xf32>
      %230 = vector.shape_cast %229 : vector<1x4x1x32xf32> to vector<4x32xf32>
      %c0_188 = arith.constant 0 : index
      %c0_189 = arith.constant 0 : index
      %c0_190 = arith.constant 0 : index
      %c0_191 = arith.constant 0 : index
      %231 = vector.load %arg5[%c0_188, %c0_189, %c0_190, %c0_191] : memref<2x2x8x4xf32, #tpu.memory_space<vmem>>, vector<1x1x8x4xf32>
      %232 = vector.shape_cast %231 : vector<1x1x8x4xf32> to vector<8x4xf32>
      %cst_192 = arith.constant dense<0.000000e+00> : vector<8x32xf32>
      %233 = tpu.matmul %232, %230, %cst_192 {dimension_numbers = #tpu.dot_dimension_numbers<[1], [0], [0], [1], [0, 0, 1, 1], [], []>} : vector<8x4xf32>, vector<4x32xf32>, vector<8x32xf32> -> vector<8x32xf32>
      %c0_193 = arith.constant 0 : index
      %c1_194 = arith.constant 1 : index
      %c0_195 = arith.constant 0 : index
      %c0_196 = arith.constant 0 : index
      %234 = vector.load %arg5[%c0_193, %c1_194, %c0_195, %c0_196] : memref<2x2x8x4xf32, #tpu.memory_space<vmem>>, vector<1x1x8x4xf32>
      %235 = vector.shape_cast %234 : vector<1x1x8x4xf32> to vector<8x4xf32>
      %cst_197 = arith.constant dense<0.000000e+00> : vector<8x32xf32>
      %236 = tpu.matmul %235, %230, %cst_197 {dimension_numbers = #tpu.dot_dimension_numbers<[1], [0], [0], [1], [0, 0, 1, 1], [], []>} : vector<8x4xf32>, vector<4x32xf32>, vector<8x32xf32> -> vector<8x32xf32>
      %237 = arith.select %4, %233, %236 : vector<8x32xi1>, vector<8x32xf32>
      %238 = vector.broadcast %18 : vector<8x1xf32> to vector<8x32xf32>
      %239 = arith.subf %237, %238 : vector<8x32xf32>
      %240 = vector.broadcast %28 : vector<8x1xf32> to vector<8x32xf32>
      %241 = arith.mulf %239, %240 : vector<8x32xf32>
      %cst_198 = arith.constant 0.000000e+00 : f32
      %242 = vector.broadcast %cst_198 : f32 to vector<8x32xf32>
      %243 = arith.cmpf ogt, %241, %242 : vector<8x32xf32>
      %cst_199 = arith.constant 2.000000e-01 : f32
      %244 = vector.broadcast %cst_199 : f32 to vector<8x32xf32>
      %245 = arith.mulf %244, %241 : vector<8x32xf32>
      %246 = arith.select %243, %241, %245 : vector<8x32xi1>, vector<8x32xf32>
      %c0_200 = arith.constant 0 : index
      %c0_201 = arith.constant 0 : index
      %c10 = arith.constant 10 : index
      %c0_202 = arith.constant 0 : index
      %247 = vector.load %arg6[%c0_200, %c0_201, %c10, %c0_202] : memref<1x8x16x32xf32, #tpu.memory_space<vmem>>, vector<1x8x1x32xf32>
      %248 = vector.shape_cast %247 : vector<1x8x1x32xf32> to vector<8x32xf32>
      %249 = vector.shape_cast %246 : vector<8x32xf32> to vector<1x8x1x32xf32>
      tpu.vector_store %arg6[%c0_200, %c0_201, %c10, %c0_202], %249 {strides = array<i32>} : memref<1x8x16x32xf32, #tpu.memory_space<vmem>>, vector<1x8x1x32xf32>,
      %c1_203 = arith.constant 1 : index
      %c0_204 = arith.constant 0 : index
      %c0_205 = arith.constant 0 : index
      %c0_206 = arith.constant 0 : index
      %250 = vector.load %arg5[%c1_203, %c0_204, %c0_205, %c0_206] : memref<2x2x8x4xf32, #tpu.memory_space<vmem>>, vector<1x1x8x4xf32>
      %251 = vector.shape_cast %250 : vector<1x1x8x4xf32> to vector<8x4xf32>
      %cst_207 = arith.constant dense<0.000000e+00> : vector<8x32xf32>
      %252 = tpu.matmul %251, %230, %cst_207 {dimension_numbers = #tpu.dot_dimension_numbers<[1], [0], [0], [1], [0, 0, 1, 1], [], []>} : vector<8x4xf32>, vector<4x32xf32>, vector<8x32xf32> -> vector<8x32xf32>
      %c1_208 = arith.constant 1 : index
      %c1_209 = arith.constant 1 : index
      %c0_210 = arith.constant 0 : index
      %c0_211 = arith.constant 0 : index
      %253 = vector.load %arg5[%c1_208, %c1_209, %c0_210, %c0_211] : memref<2x2x8x4xf32, #tpu.memory_space<vmem>>, vector<1x1x8x4xf32>
      %254 = vector.shape_cast %253 : vector<1x1x8x4xf32> to vector<8x4xf32>
      %cst_212 = arith.constant dense<0.000000e+00> : vector<8x32xf32>
      %255 = tpu.matmul %254, %230, %cst_212 {dimension_numbers = #tpu.dot_dimension_numbers<[1], [0], [0], [1], [0, 0, 1, 1], [], []>} : vector<8x4xf32>, vector<4x32xf32>, vector<8x32xf32> -> vector<8x32xf32>
      %256 = arith.select %4, %252, %255 : vector<8x32xi1>, vector<8x32xf32>
      %257 = vector.broadcast %18 : vector<8x1xf32> to vector<8x32xf32>
      %258 = arith.subf %256, %257 : vector<8x32xf32>
      %259 = vector.broadcast %28 : vector<8x1xf32> to vector<8x32xf32>
      %260 = arith.mulf %258, %259 : vector<8x32xf32>
      %cst_213 = arith.constant 0.000000e+00 : f32
      %261 = vector.broadcast %cst_213 : f32 to vector<8x32xf32>
      %262 = arith.cmpf ogt, %260, %261 : vector<8x32xf32>
      %cst_214 = arith.constant 2.000000e-01 : f32
      %263 = vector.broadcast %cst_214 : f32 to vector<8x32xf32>
      %264 = arith.mulf %263, %260 : vector<8x32xf32>
      %265 = arith.select %262, %260, %264 : vector<8x32xi1>, vector<8x32xf32>
      %c0_215 = arith.constant 0 : index
      %c0_216 = arith.constant 0 : index
      %c11 = arith.constant 11 : index
      %c0_217 = arith.constant 0 : index
      %266 = vector.load %arg6[%c0_215, %c0_216, %c11, %c0_217] : memref<1x8x16x32xf32, #tpu.memory_space<vmem>>, vector<1x8x1x32xf32>
      %267 = vector.shape_cast %266 : vector<1x8x1x32xf32> to vector<8x32xf32>
      %268 = vector.shape_cast %265 : vector<8x32xf32> to vector<1x8x1x32xf32>
      tpu.vector_store %arg6[%c0_215, %c0_216, %c11, %c0_217], %268 {strides = array<i32>} : memref<1x8x16x32xf32, #tpu.memory_space<vmem>>, vector<1x8x1x32xf32>,
      %c0_218 = arith.constant 0 : index
      %c0_219 = arith.constant 0 : index
      %c6_220 = arith.constant 6 : index
      %c0_221 = arith.constant 0 : index
      %269 = vector.load %arg4[%c0_218, %c0_219, %c6_220, %c0_221] : memref<1x4x8x32xf32, #tpu.memory_space<vmem>>, vector<1x4x1x32xf32>
      %270 = vector.shape_cast %269 : vector<1x4x1x32xf32> to vector<4x32xf32>
      %c0_222 = arith.constant 0 : index
      %c0_223 = arith.constant 0 : index
      %c0_224 = arith.constant 0 : index
      %c0_225 = arith.constant 0 : index
      %271 = vector.load %arg5[%c0_222, %c0_223, %c0_224, %c0_225] : memref<2x2x8x4xf32, #tpu.memory_space<vmem>>, vector<1x1x8x4xf32>
      %272 = vector.shape_cast %271 : vector<1x1x8x4xf32> to vector<8x4xf32>
      %cst_226 = arith.constant dense<0.000000e+00> : vector<8x32xf32>
      %273 = tpu.matmul %272, %270, %cst_226 {dimension_numbers = #tpu.dot_dimension_numbers<[1], [0], [0], [1], [0, 0, 1, 1], [], []>} : vector<8x4xf32>, vector<4x32xf32>, vector<8x32xf32> -> vector<8x32xf32>
      %c0_227 = arith.constant 0 : index
      %c1_228 = arith.constant 1 : index
      %c0_229 = arith.constant 0 : index
      %c0_230 = arith.constant 0 : index
      %274 = vector.load %arg5[%c0_227, %c1_228, %c0_229, %c0_230] : memref<2x2x8x4xf32, #tpu.memory_space<vmem>>, vector<1x1x8x4xf32>
      %275 = vector.shape_cast %274 : vector<1x1x8x4xf32> to vector<8x4xf32>
      %cst_231 = arith.constant dense<0.000000e+00> : vector<8x32xf32>
      %276 = tpu.matmul %275, %270, %cst_231 {dimension_numbers = #tpu.dot_dimension_numbers<[1], [0], [0], [1], [0, 0, 1, 1], [], []>} : vector<8x4xf32>, vector<4x32xf32>, vector<8x32xf32> -> vector<8x32xf32>
      %277 = arith.select %4, %273, %276 : vector<8x32xi1>, vector<8x32xf32>
      %278 = vector.broadcast %18 : vector<8x1xf32> to vector<8x32xf32>
      %279 = arith.subf %277, %278 : vector<8x32xf32>
      %280 = vector.broadcast %28 : vector<8x1xf32> to vector<8x32xf32>
      %281 = arith.mulf %279, %280 : vector<8x32xf32>
      %cst_232 = arith.constant 0.000000e+00 : f32
      %282 = vector.broadcast %cst_232 : f32 to vector<8x32xf32>
      %283 = arith.cmpf ogt, %281, %282 : vector<8x32xf32>
      %cst_233 = arith.constant 2.000000e-01 : f32
      %284 = vector.broadcast %cst_233 : f32 to vector<8x32xf32>
      %285 = arith.mulf %284, %281 : vector<8x32xf32>
      %286 = arith.select %283, %281, %285 : vector<8x32xi1>, vector<8x32xf32>
      %c0_234 = arith.constant 0 : index
      %c0_235 = arith.constant 0 : index
      %c12 = arith.constant 12 : index
      %c0_236 = arith.constant 0 : index
      %287 = vector.load %arg6[%c0_234, %c0_235, %c12, %c0_236] : memref<1x8x16x32xf32, #tpu.memory_space<vmem>>, vector<1x8x1x32xf32>
      %288 = vector.shape_cast %287 : vector<1x8x1x32xf32> to vector<8x32xf32>
      %289 = vector.shape_cast %286 : vector<8x32xf32> to vector<1x8x1x32xf32>
      tpu.vector_store %arg6[%c0_234, %c0_235, %c12, %c0_236], %289 {strides = array<i32>} : memref<1x8x16x32xf32, #tpu.memory_space<vmem>>, vector<1x8x1x32xf32>,
      %c1_237 = arith.constant 1 : index
      %c0_238 = arith.constant 0 : index
      %c0_239 = arith.constant 0 : index
      %c0_240 = arith.constant 0 : index
      %290 = vector.load %arg5[%c1_237, %c0_238, %c0_239, %c0_240] : memref<2x2x8x4xf32, #tpu.memory_space<vmem>>, vector<1x1x8x4xf32>
      %291 = vector.shape_cast %290 : vector<1x1x8x4xf32> to vector<8x4xf32>
      %cst_241 = arith.constant dense<0.000000e+00> : vector<8x32xf32>
      %292 = tpu.matmul %291, %270, %cst_241 {dimension_numbers = #tpu.dot_dimension_numbers<[1], [0], [0], [1], [0, 0, 1, 1], [], []>} : vector<8x4xf32>, vector<4x32xf32>, vector<8x32xf32> -> vector<8x32xf32>
      %c1_242 = arith.constant 1 : index
      %c1_243 = arith.constant 1 : index
      %c0_244 = arith.constant 0 : index
      %c0_245 = arith.constant 0 : index
      %293 = vector.load %arg5[%c1_242, %c1_243, %c0_244, %c0_245] : memref<2x2x8x4xf32, #tpu.memory_space<vmem>>, vector<1x1x8x4xf32>
      %294 = vector.shape_cast %293 : vector<1x1x8x4xf32> to vector<8x4xf32>
      %cst_246 = arith.constant dense<0.000000e+00> : vector<8x32xf32>
      %295 = tpu.matmul %294, %270, %cst_246 {dimension_numbers = #tpu.dot_dimension_numbers<[1], [0], [0], [1], [0, 0, 1, 1], [], []>} : vector<8x4xf32>, vector<4x32xf32>, vector<8x32xf32> -> vector<8x32xf32>
      %296 = arith.select %4, %292, %295 : vector<8x32xi1>, vector<8x32xf32>
      %297 = vector.broadcast %18 : vector<8x1xf32> to vector<8x32xf32>
      %298 = arith.subf %296, %297 : vector<8x32xf32>
      %299 = vector.broadcast %28 : vector<8x1xf32> to vector<8x32xf32>
      %300 = arith.mulf %298, %299 : vector<8x32xf32>
      %cst_247 = arith.constant 0.000000e+00 : f32
      %301 = vector.broadcast %cst_247 : f32 to vector<8x32xf32>
      %302 = arith.cmpf ogt, %300, %301 : vector<8x32xf32>
      %cst_248 = arith.constant 2.000000e-01 : f32
      %303 = vector.broadcast %cst_248 : f32 to vector<8x32xf32>
      %304 = arith.mulf %303, %300 : vector<8x32xf32>
      %305 = arith.select %302, %300, %304 : vector<8x32xi1>, vector<8x32xf32>
      %c0_249 = arith.constant 0 : index
      %c0_250 = arith.constant 0 : index
      %c13 = arith.constant 13 : index
      %c0_251 = arith.constant 0 : index
      %306 = vector.load %arg6[%c0_249, %c0_250, %c13, %c0_251] : memref<1x8x16x32xf32, #tpu.memory_space<vmem>>, vector<1x8x1x32xf32>
      %307 = vector.shape_cast %306 : vector<1x8x1x32xf32> to vector<8x32xf32>
      %308 = vector.shape_cast %305 : vector<8x32xf32> to vector<1x8x1x32xf32>
      tpu.vector_store %arg6[%c0_249, %c0_250, %c13, %c0_251], %308 {strides = array<i32>} : memref<1x8x16x32xf32, #tpu.memory_space<vmem>>, vector<1x8x1x32xf32>,
      %c0_252 = arith.constant 0 : index
      %c0_253 = arith.constant 0 : index
      %c7_254 = arith.constant 7 : index
      %c0_255 = arith.constant 0 : index
      %309 = vector.load %arg4[%c0_252, %c0_253, %c7_254, %c0_255] : memref<1x4x8x32xf32, #tpu.memory_space<vmem>>, vector<1x4x1x32xf32>
      %310 = vector.shape_cast %309 : vector<1x4x1x32xf32> to vector<4x32xf32>
      %c0_256 = arith.constant 0 : index
      %c0_257 = arith.constant 0 : index
      %c0_258 = arith.constant 0 : index
      %c0_259 = arith.constant 0 : index
      %311 = vector.load %arg5[%c0_256, %c0_257, %c0_258, %c0_259] : memref<2x2x8x4xf32, #tpu.memory_space<vmem>>, vector<1x1x8x4xf32>
      %312 = vector.shape_cast %311 : vector<1x1x8x4xf32> to vector<8x4xf32>
      %cst_260 = arith.constant dense<0.000000e+00> : vector<8x32xf32>
      %313 = tpu.matmul %312, %310, %cst_260 {dimension_numbers = #tpu.dot_dimension_numbers<[1], [0], [0], [1], [0, 0, 1, 1], [], []>} : vector<8x4xf32>, vector<4x32xf32>, vector<8x32xf32> -> vector<8x32xf32>
      %c0_261 = arith.constant 0 : index
      %c1_262 = arith.constant 1 : index
      %c0_263 = arith.constant 0 : index
      %c0_264 = arith.constant 0 : index
      %314 = vector.load %arg5[%c0_261, %c1_262, %c0_263, %c0_264] : memref<2x2x8x4xf32, #tpu.memory_space<vmem>>, vector<1x1x8x4xf32>
      %315 = vector.shape_cast %314 : vector<1x1x8x4xf32> to vector<8x4xf32>
      %cst_265 = arith.constant dense<0.000000e+00> : vector<8x32xf32>
      %316 = tpu.matmul %315, %310, %cst_265 {dimension_numbers = #tpu.dot_dimension_numbers<[1], [0], [0], [1], [0, 0, 1, 1], [], []>} : vector<8x4xf32>, vector<4x32xf32>, vector<8x32xf32> -> vector<8x32xf32>
      %317 = arith.select %4, %313, %316 : vector<8x32xi1>, vector<8x32xf32>
      %318 = vector.broadcast %18 : vector<8x1xf32> to vector<8x32xf32>
      %319 = arith.subf %317, %318 : vector<8x32xf32>
      %320 = vector.broadcast %28 : vector<8x1xf32> to vector<8x32xf32>
      %321 = arith.mulf %319, %320 : vector<8x32xf32>
      %cst_266 = arith.constant 0.000000e+00 : f32
      %322 = vector.broadcast %cst_266 : f32 to vector<8x32xf32>
      %323 = arith.cmpf ogt, %321, %322 : vector<8x32xf32>
      %cst_267 = arith.constant 2.000000e-01 : f32
      %324 = vector.broadcast %cst_267 : f32 to vector<8x32xf32>
      %325 = arith.mulf %324, %321 : vector<8x32xf32>
      %326 = arith.select %323, %321, %325 : vector<8x32xi1>, vector<8x32xf32>
      %c0_268 = arith.constant 0 : index
      %c0_269 = arith.constant 0 : index
      %c14 = arith.constant 14 : index
      %c0_270 = arith.constant 0 : index
      %327 = vector.load %arg6[%c0_268, %c0_269, %c14, %c0_270] : memref<1x8x16x32xf32, #tpu.memory_space<vmem>>, vector<1x8x1x32xf32>
      %328 = vector.shape_cast %327 : vector<1x8x1x32xf32> to vector<8x32xf32>
      %329 = vector.shape_cast %326 : vector<8x32xf32> to vector<1x8x1x32xf32>
      tpu.vector_store %arg6[%c0_268, %c0_269, %c14, %c0_270], %329 {strides = array<i32>} : memref<1x8x16x32xf32, #tpu.memory_space<vmem>>, vector<1x8x1x32xf32>,
      %c1_271 = arith.constant 1 : index
      %c0_272 = arith.constant 0 : index
      %c0_273 = arith.constant 0 : index
      %c0_274 = arith.constant 0 : index
      %330 = vector.load %arg5[%c1_271, %c0_272, %c0_273, %c0_274] : memref<2x2x8x4xf32, #tpu.memory_space<vmem>>, vector<1x1x8x4xf32>
      %331 = vector.shape_cast %330 : vector<1x1x8x4xf32> to vector<8x4xf32>
      %cst_275 = arith.constant dense<0.000000e+00> : vector<8x32xf32>
      %332 = tpu.matmul %331, %310, %cst_275 {dimension_numbers = #tpu.dot_dimension_numbers<[1], [0], [0], [1], [0, 0, 1, 1], [], []>} : vector<8x4xf32>, vector<4x32xf32>, vector<8x32xf32> -> vector<8x32xf32>
      %c1_276 = arith.constant 1 : index
      %c1_277 = arith.constant 1 : index
      %c0_278 = arith.constant 0 : index
      %c0_279 = arith.constant 0 : index
      %333 = vector.load %arg5[%c1_276, %c1_277, %c0_278, %c0_279] : memref<2x2x8x4xf32, #tpu.memory_space<vmem>>, vector<1x1x8x4xf32>
      %334 = vector.shape_cast %333 : vector<1x1x8x4xf32> to vector<8x4xf32>
      %cst_280 = arith.constant dense<0.000000e+00> : vector<8x32xf32>
      %335 = tpu.matmul %334, %310, %cst_280 {dimension_numbers = #tpu.dot_dimension_numbers<[1], [0], [0], [1], [0, 0, 1, 1], [], []>} : vector<8x4xf32>, vector<4x32xf32>, vector<8x32xf32> -> vector<8x32xf32>
      %336 = arith.select %4, %332, %335 : vector<8x32xi1>, vector<8x32xf32>
      %337 = vector.broadcast %18 : vector<8x1xf32> to vector<8x32xf32>
      %338 = arith.subf %336, %337 : vector<8x32xf32>
      %339 = vector.broadcast %28 : vector<8x1xf32> to vector<8x32xf32>
      %340 = arith.mulf %338, %339 : vector<8x32xf32>
      %cst_281 = arith.constant 0.000000e+00 : f32
      %341 = vector.broadcast %cst_281 : f32 to vector<8x32xf32>
      %342 = arith.cmpf ogt, %340, %341 : vector<8x32xf32>
      %cst_282 = arith.constant 2.000000e-01 : f32
      %343 = vector.broadcast %cst_282 : f32 to vector<8x32xf32>
      %344 = arith.mulf %343, %340 : vector<8x32xf32>
      %345 = arith.select %342, %340, %344 : vector<8x32xi1>, vector<8x32xf32>
      %c0_283 = arith.constant 0 : index
      %c0_284 = arith.constant 0 : index
      %c15 = arith.constant 15 : index
      %c0_285 = arith.constant 0 : index
      %346 = vector.load %arg6[%c0_283, %c0_284, %c15, %c0_285] : memref<1x8x16x32xf32, #tpu.memory_space<vmem>>, vector<1x8x1x32xf32>
      %347 = vector.shape_cast %346 : vector<1x8x1x32xf32> to vector<8x32xf32>
      %348 = vector.shape_cast %345 : vector<8x32xf32> to vector<1x8x1x32xf32>
      tpu.vector_store %arg6[%c0_283, %c0_284, %c15, %c0_285], %348 {strides = array<i32>} : memref<1x8x16x32xf32, #tpu.memory_space<vmem>>, vector<1x8x1x32xf32>,
    } else {
    }
    return
  }
  func.func @transform_0(%arg0: i32, %arg1: i32, %arg2: i32, %arg3: i32) -> (i32, i32, i32, i32) {
    %c0_i32 = arith.constant 0 : i32
    %c0_i32_0 = arith.constant 0 : i32
    %c0_i32_1 = arith.constant 0 : i32
    return %arg0, %c0_i32, %arg3, %c0_i32_0 : i32, i32, i32, i32
  }
  func.func @transform_1(%arg0: i32, %arg1: i32, %arg2: i32, %arg3: i32) -> (i32, i32, i32, i32) {
    %c0_i32 = arith.constant 0 : i32
    %c0_i32_0 = arith.constant 0 : i32
    %c0_i32_1 = arith.constant 0 : i32
    %c0_i32_2 = arith.constant 0 : i32
    return %c0_i32, %c0_i32_0, %arg1, %c0_i32_1 : i32, i32, i32, i32
  }
  func.func @transform_2(%arg0: i32, %arg1: i32, %arg2: i32, %arg3: i32) -> (i32, i32, i32, i32) {
    %0 = arith.muli %arg3, %arg2 : i32
    %c0_i32 = arith.constant 0 : i32
    %c0_i32_0 = arith.constant 0 : i32
    return %arg0, %arg1, %0, %c0_i32 : i32, i32, i32, i32
  }
}

</mosaic_0001>

<bundles_post_ra>
// kernel: tpu_custom_call.1
= control target key start
LH: loop header
LB: loop body
LE: loop exit
PB: predicated region body
PF: predicated region fallthrough
CT: control target
= control target key end

     0   :  { %s4374_s0 = inlined_call_operand.hbm [shape: f32[2,4,16,32], index: 0, kind: input, shape index: {}]   ;;  %s4375_s1 = inlined_call_operand.vmem [shape: f32[2,2,16,4], index: 1, kind: input, shape index: {}]   ;;  %s4376_s2 = inlined_call_operand.hbm [shape: f32[2,16,32,32], index: 2, kind: output, shape index: {}]  }
   0x1   :  { %4387 = sst [smem:[#allocation27_spill]] %s4376_s2 }
   0x2   :  { %7 = vsyncpa [#allocation5], 0 }
   0x3   :  { %9 = vsyncpa [#allocation5 + $0x1], 0 }
   0x4   :  { %10 = vsyncpa [#allocation6], 0 }
   0x5   :  { %12 = vsyncpa [#allocation6 + $0x1], 0  ;;  %s3356_s9 = smov 0   ;;  %s3358_s10 = smov 0  }
   0x6   :  { %s3360_s11 = smov 0   ;;  %s3362_s12 = smov 0  }
   0x7   :  { %s3364_s13 = smov 0   ;;  %s3366_s14 = smov 0  }
   0x8   :  { %s3368_s15 = smov 0   ;;  %s3370_s16 = smov 0  }
   0x9   :  { %s3372_s17 = smov 0   ;;  %s3374_s18 = smov 0  }
   0xa   :  { %s3376_s19 = smov 0   ;;  %s3378_s20 = smov 0  }
   0xb   :  { %s3380_s21 = smov 0   ;;  %s3382_s22 = smov 0  }
   0xc   :  { %s3384_s23 = smov 0   ;;  %s3386_s24 = smov 0  }
   0xd   :  { %s3388_s25 = smov 0  }
   0xe LB: > { %4388 = sst [smem:[#allocation13_spill]] %s3275_s12  ;;  %s4377_s26 = sadd.s32 4294967295, %s3327_s25   ;;  %s3327_s25 = sphi %s3388_s25, %s18_s25   ;;  %s3323_s24 = sphi %s3386_s24, %s4448_s24   ;;  %s3319_s23 = sphi %s3384_s23, %s4447_s23   ;;  %s3315_s22 = sphi %s3382_s22, %s4432_s22   ;;  %s3311_s21 = sphi %s3380_s21, %s4446_s21   ;;  %s3307_s20 = sphi %s3378_s20, %s4445_s20   ;;  %s3303_s19 = sphi %s3376_s19, %s4444_s19   ;;  %s3299_s18 = sphi %s3374_s18, %s4430_s18   ;;  %s3295_s17 = sphi %s3372_s17, %s4443_s17   ;;  %s3291_s16 = sphi %s3370_s16, %s4442_s16   ;;  %s3287_s15 = sphi %s3368_s15, %s4441_s15   ;;  %s3283_s14 = sphi %s3366_s14, %s4428_s14   ;;  %s3279_s13 = sphi %s3364_s13, %s4440_s13   ;;  %s3275_s12 = sphi %s3362_s12, %s4439_s12   ;;  %s3271_s11 = sphi %s3360_s11, %s4438_s11   ;;  %s3267_s10 = sphi %s3358_s10, %s4436_s10   ;;  %s3263_s9 = sphi %s3356_s9, %s4435_s9  }
   0xf   : > { %4389 = sst [smem:[#allocation14_spill]] %s3287_s15  ;;  %s33_s28 = sadd.s32 1, %s3311_s21 }
  0x10   : > { %4390 = sst [smem:[#allocation15_spill]] %s3295_s17  ;;  %s36_s29 = sadd.s32 1, %s3315_s22 }
  0x11   : > { %4391 = sst [smem:[#allocation16_spill]] %s3299_s18  ;;  %p34_p0 = scmp.ge.s32.totalorder %s33_s28, 2 }
  0x12   : > { %4392 = sst [smem:[#allocation17_spill]] %s3303_s19  ;;  %s40_s30 = sadd.s32 1, %s3319_s23 }
  0x13   : > { %4393 = sst [smem:[#allocation18_spill]] %s3307_s20  ;;  %s44_s3 = sadd.s32 1, %s3323_s24 }
  0x14   : > { %4394 = sst [smem:[#allocation19_spill]] %s3315_s22  ;;  %s4450_s28 = smov (%p34_p0, %s33_s28), 0 }
  0x15   : > { %4395 = sst [smem:[#allocation20_spill]] %s4450_s28  ;;  %s4452_s29 = smov (!%p34_p0, %s36_s29), %s3315_s22 }
  0x16   : > { %s49_s5 = ssub.s32 %s3311_s21, %s4450_s28  ;;  %p60_p1 = scmp.ne.s32.totalorder %s3291_s16, %s3287_s15 }
  0x17   : > { %p38_p2 = scmp.ge.s32.totalorder %s4452_s29, 2  ;;  %p61_p3 = scmp.eq.s32.totalorder %s3327_s25, 0 }
  0x18   : > { %p66_p4 = scmp.ne.s32.totalorder %s3287_s15, %s3283_s14  ;;  %p67_p5 = scmp.eq.s32.totalorder %s4377_s26, 0 }
  0x19   : > { %s4454_s29 = smov (%p38_p2, %s4452_s29), 0  ;;  %s4456_s30 = smov (!%p38_p2, %s40_s30), %s3319_s23 }
  0x1a   : > { %4396 = sst [smem:[#allocation21_spill]] %s4454_s29  ;;  %p3465_p6 = por %p61_p3, %p60_p1 }
  0x1b   : > { %p3469_p7 = por %p67_p5, %p66_p4  ;;  %p42_p8 = scmp.ge.s32.totalorder %s4456_s30, 2 }
  0x1c   : > { %s79_s8 = sadd.s32 1, %s3279_s13  ;;  %p86_p9 = scmp.ne.s32.totalorder %s3279_s13, %s3275_s12 }
  0x1d   : > { %s4398_s7 = scalar_select %p3469_p7, 1, 0 }
  0x1e   : > { %s102_s14 = smul.u32 %s3311_s21, %s3315_s22  ;;  %s4458_s30 = smov (%p42_p8, %s4456_s30), 0 }
  0x1f   : > { %4399 = sst [smem:[#allocation22_spill]] %s4398_s7  ;;  %s4460_s3 = smov (!%p42_p8, %s44_s3), %s3323_s24 }
  0x20   : > { %4400 = sst [smem:[#allocation23_spill]] %s4458_s30  ;;  %s76_s27 = ssub.s32 %s3319_s23, %s4458_s30 }
  0x21   : > { %p3485_p10 = por %p86_p9, %p61_p3  ;;  %p46_p11 = scmp.ge.s32.totalorder %s4460_s3, 2 }
  0x22   : > { %p77_p12 = scmp.eq.s32.totalorder %s76_s27, 0  ;;  %s103_s4 = smul.u32 %s4454_s29, %s4450_s28 }
  0x23   : > { %s111_s22 = sadd.s32 1, %s3271_s11  ;;  %s4462_s3 = smov (%p46_p11, %s4460_s3), 0 }
  0x24   : > { %4402 = sst [smem:[#allocation24_spill]] %s4462_s3  ;;  %s48_s2 = ssub.s32 %s3323_s24, %s4462_s3 }
  0x25   : > { %s3495_s30 = scalar_select %p77_p12, %s3279_s13, %s79_s8  }
  0x26   : > { %s107_s20 = ssub.s32 %s102_s14, %s103_s4  ;;  %s50_s19 = sor.u32 %s49_s5, %s48_s2 }
  0x27   : > { %4403 = sst [smem:[#allocation25_spill]] %s3495_s30  ;;  %s106_s17 = sor.u32 %s76_s27, %s48_s2 }
  0x28   : > { %p51_p13 = scmp.eq.s32.totalorder %s50_s19, 0  ;;  %s108_s18 = sor.u32 %s107_s20, %s106_s17 }
  0x29   : > { %p109_p0 = scmp.eq.s32.totalorder %s108_s18, 0  ;;  %p121_p1 = scmp.ne.s32.totalorder %s3271_s11, %s3267_s10 }
  0x2a   : > { %s4404_s12 = sadd.s32 1, %s3291_s16  ;;  %s4406_s29 = sadd.s32 4294967295, %s3327_s25  }
  0x2b   : > { %s3504_s7 = scalar_select %p51_p13, %s3291_s16, %s4404_s12  }
  0x2c   : > { %s3507_s15 = scalar_select %p109_p0, %s3271_s11, %s111_s22  }
  0x2d   : > { %4405 = sst [smem:[#allocation26_spill]] %s3504_s7  ;;  %p122_p2 = scmp.eq.s32.totalorder %s4406_s29, 15 }
  0x2e   : > { %p127_p3 = scmp.ne.s32.totalorder %s3267_s10, %s3263_s9  ;;  %s4407_s28 = sadd.s32 4294967294, %s3327_s25  }
  0x2f   : > { %p128_p4 = scmp.eq.s32.totalorder %s4407_s28, 15  ;;  %p3515_p5 = por %p122_p2, %p121_p1 }
  0x30   : > { %p2815_p9 = scmp.ge.s32.totalorder %s3327_s25, 16 }
  0x31   : > { %p3519_p8 = por %p128_p4, %p127_p3  ;;  %s148_s12 = sand.u32 (!%p2815_p9), 1, %s3291_s16  }
  0x32   : > { %144 = sbr.rel (%p2815_p9) target bundleno = 65 (0x41), region = 16  ;;  %s2817_s17 = sshll.u32 (!%p2815_p9), %s3323_s24, 3 }
  0x33   : > { %s2816_s18 = sshll.u32 (!%p2815_p9), %s148_s12, 5  ;;  %s156_s19 = sadd.s32 (!%p2815_p9), %s3311_s21, %s2817_s17 }
  0x34   : > { %s2818_s20 = sshll.u32 (!%p2815_p9), %s156_s19, 3  ;;  %s152_s22 = scalar_lea.vmem (!%p2815_p9), [#allocation4], %s2816_s18 }
  0x35   : > { %s161_s27 = sshll.u32 (!%p2815_p9), %s152_s22, 4  ;;  %s158_s4 = scalar_lea.hbm (!%p2815_p9), %s4374_s0, %s2818_s20  ;;  %s162_s27 = int_to_ptr.vmem [resolvable:$true] %s161_s27 }
  0x36   : > { %s159_s5 = sshll.u32 (!%p2815_p9), %s158_s4, 4  ;;  %s149_s14 = scalar_lea.sflag (!%p2815_p9), [#allocation5], %s148_s12  ;;  %s160_s5 = int_to_ptr.hbm [resolvable:$true] %s159_s5 }
  0x37   : > { %s3329_s3 = smov 256   ;;  %s3330_s7 = smov 128  }
  0x38   : > { %s3331_s30 = smov 8   ;;  %170 = sbr.rel (!%p3485_p10) target bundleno = 65 (0x41), region = 24 }
  0x39   : > { %2991 = dma.hbm_to_vmem [thread:$0]  (%p3465_p6), %s160_s5, 512, %s162_s27, %s149_s14, %s3329_s3, %s3330_s7, %s3331_s30  }
  0x3a   : > { %s172_s17 = sand.u32 (%p3485_p10), 1, %s3279_s13   ;;  %s2820_s18 = sshll.u32 (%p3485_p10), %s3319_s23, 3 }
  0x3b   : > { %s2819_s19 = sshll.u32 (%p3485_p10), %s172_s17, 5  ;;  %s176_s20 = scalar_lea.vmem (%p3485_p10), %s4375_s1, %s2820_s18 }
  0x3c   : > { %v211_v0 = vld [vmem:[%s176_s20] sm:$0xff] (%p3485_p10)  ;;  %v213_v1 = vld [vmem:[%s176_s20 + $0x10] sm:$0xff] (%p3485_p10)  ;;  %s174_s12 = scalar_lea.vmem (%p3485_p10), [#allocation7], %s2819_s19 }
  0x3d   : > { %v215_v2 = vld [vmem:[%s176_s20 + $0x20] sm:$0xff]  ;;  %212 = vst [vmem:[%s174_s12] sm:$0xff] %v211_v0  ;;  %v217_v3 = vld [vmem:[%s176_s20 + $0x30] sm:$0xff] }
  0x3e   : > { %214 = vst [vmem:[%s174_s12 + $0x8] sm:$0xff] %v213_v1 }
  0x3f   : > { %216 = vst [vmem:[%s174_s12 + $0x10] sm:$0xff] %v215_v2 }
  0x40   : > { %218 = vst [vmem:[%s174_s12 + $0x18] sm:$0xff] %v217_v3 }
  0x41 PF: > { %p2821_p6 = scmp.ge.s32.totalorder %s3327_s25, 1  ;;  %p223_p10 = scmp.lt.s32.totalorder %s3327_s25, 17 }
  0x43   : > { %p224_p11 = pnand %p2821_p6, %p223_p10 }
  0x44   : > { %s4410_s26 = sld [smem:[#allocation14_spill]] (!%p224_p11) }
  0x45   : > { %227 = sbr.rel (%p224_p11) target bundleno = 772 (0x304), region = 62 }
  0x4a   : > { %s229_s3 = sand.u32 1, %s4410_s26  }
  0x4b   : > { %s2822_s6 = sshll.u32 %s229_s3, 5  ;;  %s230_s7 = scalar_lea.sflag [#allocation5], %s229_s3 }
  0x4c   : > { %s3542_s27 = scalar_lea.vmem [#allocation4], %s2822_s6 }
  0x4d   : > { %3254 = dma.done.wait (%p3469_p7), %s230_s7, 512  }
  0x4e   : > { %3256 = vsyncadd (%p3469_p7), %s230_s7, 4294966784  ;;  %s4412_s29 = sld [smem:[#allocation13_spill]]  ;;  %s263_s17 = sand.u32 1, %s3267_s10   ;;  %v269_v4 = vlaneseq }
  0x4f   : > { %s4413_s4 = sld [smem:[#allocation16_spill]]  ;;  %s2824_s19 = sshll.u32 %s263_s17, 7 }
  0x50   : > { %s4414_s5 = sld [smem:[#allocation15_spill]]  ;;  %v270_v5 = vand.u32 127, %v269_v4  ;;  %s3560_s28 = scalar_lea.vmem [#allocation8], %s2824_s19 }
  0x52   : > { %v271_v6 = vand.u32 1, %v270_v5 }
  0x54   : > { %s240_s14 = sand.u32 1, %s4412_s29   ;;  %vm3554_vm0 = vcmp.eq.s32.totalorder %v271_v6, 0 }
  0x55   : > { %s2823_s18 = sshll.u32 %s240_s14, 5  ;;  %p273_p12 = scmp.eq.s32.totalorder %s4413_s4, 0 }
  0x56   : > { %p274_p13 = scmp.eq.s32.totalorder %s4414_s5, 0  ;;  %s3558_s22 = scalar_lea.vmem [#allocation7], %s2823_s18 }
  0x58   : > { %p275_p0 = pnand %p274_p13, %p273_p12 }
  0x5a   : > { %278 = sbr.rel (%p275_p0) target bundleno = 98 (0x62), region = 74 }
  0x5f   : > { %vm279_vm1 = vcmask 7168   ;;  %v3332_v8 = vmov 0.0  }
  0x60   : > { %280 = vst.msk [vmem:[#allocation2] sm:$0xff] %vm279_vm1, %v3332_v8 }
  0x61   : > { %281 = vst.msk [vmem:[#allocation3] sm:$0xff] %vm279_vm1, %v3332_v8 }
  0x62 PF: > { %s4417_s20 = sld [smem:[#allocation16_spill]] }
  0x68   : > { %p2825_p7 = scmp.ne.s32.totalorder %s4417_s20, 0 }
  0x6a   : > { %284 = sbr.rel (%p2825_p7) target bundleno = 455 (0x1c7), region = 78 }
  0x6f   : > { %v285_v9 = vld [vmem:[%s3542_s27] sm:$0x1]  ;;  %v286_v10 = vld [vmem:[%s3542_s27 + $0x8] sm:$0x1]  ;;  %v287_v11 = vld [vmem:[%s3542_s27 + $0x10] sm:$0x1] }
  0x70   : > { %v288_v12 = vld [vmem:[%s3542_s27 + $0x18] sm:$0x1]  ;;  %v294_v13 = vrot.slane %v286_v10, 7  ;;  %vm295_vm2 = vcmask 1041409   ;;  %v297_v14 = vrot.slane %v287_v11, 6  ;;  %vm298_vm3 = vcmask 1042434  }
  0x71   : > { %v300_v15 = vrot.slane %v288_v12, 5  ;;  %vm301_vm4 = vcmask 1043459   ;;  %vm307_vm5 = vcmask 1043456   ;;  %v3569_v17 = vld [vmem:[%s3558_s22] sm:$0xff]  ;;  %vm303_vm6 = vcmask 31744   ;;  %v3572_v18 = vld [vmem:[%s3558_s22 + $0x8] sm:$0xff] }
  0x72   : > { %v296_v16 = vsel %vm295_vm2, %v294_v13, %v285_v9  ;;  %v426_v19 = vld [vmem:[%s3542_s27 + $0x1] sm:$0x1]  ;;  %v3577_v21 = vld [vmem:[%s3558_s22 + $0x10] sm:$0xff]  ;;  %v427_v22 = vld [vmem:[%s3542_s27 + $0x9] sm:$0x1]  ;;  %vm356_vm7 = vcmask 261120  }
  0x73   : > { %v299_v20 = vsel %vm298_vm3, %v297_v14, %v296_v16  ;;  %v428_v23 = vld [vmem:[%s3542_s27 + $0x11] sm:$0x1]  ;;  %v429_v24 = vld [vmem:[%s3542_s27 + $0x19] sm:$0x1]  ;;  %v434_v27 = vrot.slane %v427_v22, 7  ;;  %vm1240_vm8 = vcmask 7168  }
  0x74   : > { %v302_v25 = vsel %vm301_vm4, %v300_v15, %v299_v20  ;;  %v3584_v26 = vld [vmem:[%s3558_s22 + $0x18] sm:$0xff]  ;;  %v436_v28 = vrot.slane %v428_v23, 6  ;;  %v438_v29 = vrot.slane %v429_v24, 5  ;;  %v542_v30 = vld [vmem:[%s3542_s27 + $0x2] sm:$0x1] }
  0x75   : > { %2826 = vmatpush.msk.msra.mxu0 %vm307_vm5, %v302_v25  ;;  %2829 = vmatpush.msk.msra.mxu1 %vm307_vm5, %v302_v25  ;;  %v543_v31 = vld [vmem:[%s3542_s27 + $0xa] sm:$0x1]  ;;  %v544_v32 = vld [vmem:[%s3542_s27 + $0x12] sm:$0x1]  ;;  %v545_v33 = vld [vmem:[%s3542_s27 + $0x1a] sm:$0x1]  ;;  %v435_v34 = vsel %vm295_vm2, %v434_v27, %v426_v19 }
  0x76   : > { %2832 = vmatpush.msk.msra.mxu2 %vm307_vm5, %v302_v25  ;;  %2835 = vmatpush.msk.msra.mxu3 %vm307_vm5, %v302_v25  ;;  %v550_v35 = vrot.slane %v543_v31, 7  ;;  %v552_v36 = vrot.slane %v544_v32, 6  ;;  %v554_v37 = vrot.slane %v545_v33, 5  ;;  %v658_v38 = vld [vmem:[%s3542_s27 + $0x3] sm:$0x1]  ;;  %v437_v39 = vsel %vm298_vm3, %v436_v28, %v435_v34 }
  0x77   : > { %2827 = vmatmul.msk.f32.vlgmr.msra.gmra.mxu0 %vm303_vm6, %v3569_v17  ;;  %2830 = vmatmul.msk.f32.vlgmr.msra.gmra.mxu1 %vm303_vm6, %v3572_v18  ;;  %v659_v40 = vld [vmem:[%s3542_s27 + $0xb] sm:$0x1]  ;;  %v660_v41 = vld [vmem:[%s3542_s27 + $0x13] sm:$0x1]  ;;  %v661_v42 = vld [vmem:[%s3542_s27 + $0x1b] sm:$0x1]  ;;  %v439_v43 = vsel %vm301_vm4, %v438_v29, %v437_v39 }
  0x78   : > { %2833 = vmatmul.msk.f32.vlgmr.msra.gmra.mxu2 %vm303_vm6, %v3577_v21  ;;  %2836 = vmatmul.msk.f32.vlgmr.msra.gmra.mxu3 %vm303_vm6, %v3584_v26  ;;  %v551_v44 = vsel %vm295_vm2, %v550_v35, %v542_v30  ;;  %v666_v45 = vrot.slane %v659_v40, 7  ;;  %v668_v46 = vrot.slane %v660_v41, 6  ;;  %v670_v50 = vrot.slane %v661_v42, 5  ;;  %v775_v51 = vld [vmem:[%s3542_s27 + $0xc] sm:$0x1] }
  0x79   : > { %2837 = vmatpush.msk.msrb.mxu0 %vm307_vm5, %v439_v43  ;;  %2839 = vmatpush.msk.msrb.mxu1 %vm307_vm5, %v439_v43  ;;  %v553_v47 = vsel %vm298_vm3, %v552_v36, %v551_v44  ;;  %v776_v53 = vld [vmem:[%s3542_s27 + $0x14] sm:$0x1]  ;;  %v782_v54 = vrot.slane %v775_v51, 7  ;;  %v774_v56 = vld [vmem:[%s3542_s27 + $0x4] sm:$0x1] }
  0x7a   : > { %2841 = vmatpush.msk.msrb.mxu2 %vm307_vm5, %v439_v43  ;;  %2843 = vmatpush.msk.msrb.mxu3 %vm307_vm5, %v439_v43  ;;  %v555_v48 = vsel %vm301_vm4, %v554_v37, %v553_v47  ;;  %v667_v49 = vsel %vm295_vm2, %v666_v45, %v658_v38  ;;  %v777_v57 = vld [vmem:[%s3542_s27 + $0x1c] sm:$0x1]  ;;  %v784_v58 = vrot.slane %v776_v53, 6  ;;  %v891_v60 = vld [vmem:[%s3542_s27 + $0xd] sm:$0x1] }
  0x7b   : > { %v669_v52 = vsel %vm298_vm3, %v668_v46, %v667_v49  ;;  %2845 = vmatpush.msk.msra.mxu0 %vm307_vm5, %v555_v48  ;;  %2847 = vmatpush.msk.msra.mxu1 %vm307_vm5, %v555_v48  ;;  %v783_v59 = vsel %vm295_vm2, %v782_v54, %v774_v56  ;;  %v786_v61 = vrot.slane %v777_v57, 5  ;;  %v892_v63 = vld [vmem:[%s3542_s27 + $0x15] sm:$0x1]  ;;  %v898_v0 = vrot.slane %v891_v60, 7  ;;  %v890_v1 = vld [vmem:[%s3542_s27 + $0x5] sm:$0x1] }
  0x7c   : > { %2849 = vmatpush.msk.msra.mxu2 %vm307_vm5, %v555_v48  ;;  %2851 = vmatpush.msk.msra.mxu3 %vm307_vm5, %v555_v48  ;;  %v671_v55 = vsel %vm301_vm4, %v670_v50, %v669_v52  ;;  %v785_v62 = vsel %vm298_vm3, %v784_v58, %v783_v59  ;;  %v893_v3 = vld [vmem:[%s3542_s27 + $0x1d] sm:$0x1]  ;;  %v900_v4 = vrot.slane %v892_v63, 6  ;;  %v1007_v6 = vld [vmem:[%s3542_s27 + $0xe] sm:$0x1] }
  0x7d   : > { %v787_v2 = vsel %vm301_vm4, %v786_v61, %v785_v62  ;;  %v899_v5 = vsel %vm295_vm2, %v898_v0, %v890_v1  ;;  %v902_v8 = vrot.slane %v893_v3, 5  ;;  %v1008_v10 = vld [vmem:[%s3542_s27 + $0x16] sm:$0x1]  ;;  %v1014_v11 = vrot.slane %v1007_v6, 7  ;;  %v1006_v12 = vld [vmem:[%s3542_s27 + $0x6] sm:$0x1] }
  0x7e   : > { %v901_v9 = vsel %vm298_vm3, %v900_v4, %v899_v5  ;;  %v1009_v14 = vld [vmem:[%s3542_s27 + $0x1e] sm:$0x1]  ;;  %v1016_v15 = vrot.slane %v1008_v10, 6  ;;  %v1123_v20 = vld [vmem:[%s3542_s27 + $0xf] sm:$0x1] }
  0x7f   : > { %2838 = vmatmul.msk.f32.vlgmr.msrb.gmra.mxu0 %vm303_vm6, %v3569_v17  ;;  %2840 = vmatmul.msk.f32.vlgmr.msrb.gmra.mxu1 %vm303_vm6, %v3572_v18  ;;  %v903_v13 = vsel %vm301_vm4, %v902_v8, %v901_v9  ;;  %v1015_v16 = vsel %vm295_vm2, %v1014_v11, %v1006_v12  ;;  %v1018_v19 = vrot.slane %v1009_v14, 5  ;;  %v1124_v23 = vld [vmem:[%s3542_s27 + $0x17] sm:$0x1]  ;;  %v1130_v24 = vrot.slane %v1123_v20, 7  ;;  %v1122_v27 = vld [vmem:[%s3542_s27 + $0x7] sm:$0x1] }
  0x80   : > { %2842 = vmatmul.msk.f32.vlgmr.msrb.gmra.mxu2 %vm303_vm6, %v3577_v21  ;;  %2844 = vmatmul.msk.f32.vlgmr.msrb.gmra.mxu3 %vm303_vm6, %v3584_v26  ;;  %v1017_v22 = vsel %vm298_vm3, %v1016_v15, %v1015_v16  ;;  %v1125_v28 = vld [vmem:[%s3542_s27 + $0x1f] sm:$0x1]  ;;  %v1132_v29 = vrot.slane %v1124_v23, 6 }
  0x81   : > { %2853 = vmatpush.msk.msrb.mxu0 %vm307_vm5, %v671_v55  ;;  %2855 = vmatpush.msk.msrb.mxu1 %vm307_vm5, %v671_v55  ;;  %v1019_v25 = vsel %vm301_vm4, %v1018_v19, %v1017_v22  ;;  %v1131_v30 = vsel %vm295_vm2, %v1130_v24, %v1122_v27  ;;  %v1134_v31 = vrot.slane %v1125_v28, 5 }
  0x82   : > { %2857 = vmatpush.msk.msrb.mxu2 %vm307_vm5, %v671_v55  ;;  %2859 = vmatpush.msk.msrb.mxu3 %vm307_vm5, %v671_v55  ;;  %v1133_v32 = vsel %vm298_vm3, %v1132_v29, %v1131_v30 }
  0x83   : > { %v1135_v33 = vsel %vm301_vm4, %v1134_v31, %v1133_v32 }
  0x87   : > { %2846 = vmatmul.msk.f32.vlgmr.msra.gmra.mxu0 %vm303_vm6, %v3569_v17  ;;  %2848 = vmatmul.msk.f32.vlgmr.msra.gmra.mxu1 %vm303_vm6, %v3572_v18 }
  0x88   : > { %2850 = vmatmul.msk.f32.vlgmr.msra.gmra.mxu2 %vm303_vm6, %v3577_v21  ;;  %2852 = vmatmul.msk.f32.vlgmr.msra.gmra.mxu3 %vm303_vm6, %v3584_v26 }
  0x89   : > { %2861 = vmatpush.msk.msra.mxu0 %vm307_vm5, %v787_v2  ;;  %2863 = vmatpush.msk.msra.mxu1 %vm307_vm5, %v787_v2 }
  0x8a   : > { %2865 = vmatpush.msk.msra.mxu2 %vm307_vm5, %v787_v2  ;;  %2867 = vmatpush.msk.msra.mxu3 %vm307_vm5, %v787_v2 }
  0x8f   : > { %2854 = vmatmul.msk.f32.vlgmr.msrb.gmra.mxu0 %vm303_vm6, %v3569_v17  ;;  %2856 = vmatmul.msk.f32.vlgmr.msrb.gmra.mxu1 %vm303_vm6, %v3572_v18 }
  0x90   : > { %2858 = vmatmul.msk.f32.vlgmr.msrb.gmra.mxu2 %vm303_vm6, %v3577_v21  ;;  %2860 = vmatmul.msk.f32.vlgmr.msrb.gmra.mxu3 %vm303_vm6, %v3584_v26 }
  0x91   : > { %2873 = vmatpush.msk.msrb.mxu2 %vm307_vm5, %v903_v13  ;;  %2875 = vmatpush.msk.msrb.mxu3 %vm307_vm5, %v903_v13 }
  0x92   : > { %2869 = vmatpush.msk.msrb.mxu0 %vm307_vm5, %v903_v13  ;;  %2871 = vmatpush.msk.msrb.mxu1 %vm307_vm5, %v903_v13 }
  0x97   : > { %2862 = vmatmul.msk.f32.vlgmr.msra.gmra.mxu0 %vm303_vm6, %v3569_v17  ;;  %2864 = vmatmul.msk.f32.vlgmr.msra.gmra.mxu1 %vm303_vm6, %v3572_v18 }
  0x98   : > { %2866 = vmatmul.msk.f32.vlgmr.msra.gmra.mxu2 %vm303_vm6, %v3577_v21  ;;  %2868 = vmatmul.msk.f32.vlgmr.msra.gmra.mxu3 %vm303_vm6, %v3584_v26 }
  0x99   : > { %2877 = vmatpush.msk.msra.mxu0 %vm307_vm5, %v1019_v25  ;;  %2879 = vmatpush.msk.msra.mxu1 %vm307_vm5, %v1019_v25 }
  0x9a   : > { %2881 = vmatpush.msk.msra.mxu2 %vm307_vm5, %v1019_v25  ;;  %2883 = vmatpush.msk.msra.mxu3 %vm307_vm5, %v1019_v25 }
  0x9f   : > { %2870 = vmatmul.msk.f32.vlgmr.msrb.gmra.mxu0 %vm303_vm6, %v3569_v17  ;;  %2872 = vmatmul.msk.f32.vlgmr.msrb.gmra.mxu1 %vm303_vm6, %v3572_v18 }
  0xa0   : > { %2874 = vmatmul.msk.f32.vlgmr.msrb.gmra.mxu2 %vm303_vm6, %v3577_v21  ;;  %2876 = vmatmul.msk.f32.vlgmr.msrb.gmra.mxu3 %vm303_vm6, %v3584_v26 }
  0xa1   : > { %2885 = vmatpush.msk.msrb.mxu0 %vm307_vm5, %v1135_v33  ;;  %2887 = vmatpush.msk.msrb.mxu1 %vm307_vm5, %v1135_v33 }
  0xa2   : > { %2889 = vmatpush.msk.msrb.mxu2 %vm307_vm5, %v1135_v33  ;;  %2891 = vmatpush.msk.msrb.mxu3 %vm307_vm5, %v1135_v33 }
  0xa7   : > { %2878 = vmatmul.msk.f32.vlgmr.msra.gmra.mxu0 %vm303_vm6, %v3569_v17  ;;  %2880 = vmatmul.msk.f32.vlgmr.msra.gmra.mxu1 %vm303_vm6, %v3572_v18 }
  0xa8   : > { %2882 = vmatmul.msk.f32.vlgmr.msra.gmra.mxu2 %vm303_vm6, %v3577_v21  ;;  %2884 = vmatmul.msk.f32.vlgmr.msra.gmra.mxu3 %vm303_vm6, %v3584_v26 }
  0xaf   : > { %2886 = vmatmul.msk.f32.vlgmr.msrb.gmra.mxu0 %vm303_vm6, %v3569_v17  ;;  %2888 = vmatmul.msk.f32.vlgmr.msrb.gmra.mxu1 %vm303_vm6, %v3572_v18 }
  0xb0   : > { %2890 = vmatmul.msk.f32.vlgmr.msrb.gmra.mxu2 %vm303_vm6, %v3577_v21  ;;  %2892 = vmatmul.msk.f32.vlgmr.msrb.gmra.mxu3 %vm303_vm6, %v3584_v26 }
  0xf4   : > { %v327_v34 = vpop.f32.mrf.mxu0  ;;  %v352_v35 = vpop.f32.mrf.mxu1 }
  0xf5   : > { %v355_v36 = vsel %vm3554_vm0, %v327_v34, %v352_v35 }
  0xf6   : > { %v357_v37 = vsel %vm356_vm7, %v355_v36, 0.0  ;;  %v361_v38 = vmul.f32 %v355_v36, %v355_v36 }
  0xf7   : > { %358 = vadd.xlane.f32.xlu0 %v357_v37 }
  0xf8   : > { %v362_v43 = vsel %vm356_vm7, %v361_v38, 0.0 }
  0xfb   : > { %v388_v17 = vpop.f32.mrf.mxu2  ;;  %v413_v39 = vpop.f32.mrf.mxu3 }
  0xfc   : > { %v416_v18 = vsel %vm3554_vm0, %v388_v17, %v413_v39  ;;  %v459_v40 = vpop.f32.mrf.mxu0  ;;  %v479_v21 = vpop.f32.mrf.mxu1 }
  0xfd   : > { %v482_v26 = vsel %vm3554_vm0, %v459_v40, %v479_v21  ;;  %v417_v41 = vsel %vm356_vm7, %v416_v18, 0.0  ;;  %v421_v44 = vmul.f32 %v416_v18, %v416_v18 }
  0xfe   : > { %418 = vadd.xlane.f32.xlu1 %v417_v41  ;;  %v483_v42 = vsel %vm356_vm7, %v482_v26, 0.0  ;;  %v487_v45 = vmul.f32 %v482_v26, %v482_v26 }
  0xff   : > { %484 = vadd.xlane.f32.xlu2 %v483_v42  ;;  %363 = vadd.xlane.f32.xlu0 %v362_v43  ;;  %v422_v51 = vsel %vm356_vm7, %v421_v44, 0.0 }
 0x100   : > { %v488_v54 = vsel %vm356_vm7, %v487_v45, 0.0 }
 0x103   : > { %v509_v46 = vpop.f32.mrf.mxu2  ;;  %v529_v47 = vpop.f32.mrf.mxu3 }
 0x104   : > { %v532_v48 = vsel %vm3554_vm0, %v509_v46, %v529_v47  ;;  %v575_v49 = vpop.f32.mrf.mxu0  ;;  %v595_v50 = vpop.f32.mrf.mxu1 }
 0x105   : > { %v533_v52 = vsel %vm356_vm7, %v532_v48, 0.0  ;;  %v598_v53 = vsel %vm3554_vm0, %v575_v49, %v595_v50  ;;  %v537_v55 = vmul.f32 %v532_v48, %v532_v48 }
 0x106   : > { %423 = vadd.xlane.f32.xlu1 %v422_v51  ;;  %v603_v56 = vmul.f32 %v598_v53, %v598_v53  ;;  %v599_v60 = vsel %vm356_vm7, %v598_v53, 0.0 }
 0x107   : > { %489 = vadd.xlane.f32.xlu2 %v488_v54  ;;  %534 = vadd.xlane.f32.xlu0 %v533_v52  ;;  %v538_v57 = vsel %vm356_vm7, %v537_v55, 0.0 }
 0x108   : > { %v604_v61 = vsel %vm356_vm7, %v603_v56, 0.0 }
 0x10b   : > { %v625_v58 = vpop.f32.mrf.mxu2  ;;  %v645_v59 = vpop.f32.mrf.mxu3 }
 0x10c   : > { %v648_v62 = vsel %vm3554_vm0, %v625_v58, %v645_v59  ;;  %v691_v63 = vpop.f32.mrf.mxu0  ;;  %v711_v0 = vpop.f32.mrf.mxu1 }
 0x10d   : > { %v653_v1 = vmul.f32 %v648_v62, %v648_v62  ;;  %v714_v2 = vsel %vm3554_vm0, %v691_v63, %v711_v0  ;;  %v649_v3 = vsel %vm356_vm7, %v648_v62, 0.0 }
 0x10e   : > { %539 = vadd.xlane.f32.xlu1 %v538_v57  ;;  %v715_v8 = vsel %vm356_vm7, %v714_v2, 0.0  ;;  %v719_v10 = vmul.f32 %v714_v2, %v714_v2 }
 0x10f   : > { %600 = vadd.xlane.f32.xlu2 %v599_v60  ;;  %605 = vadd.xlane.f32.xlu0 %v604_v61  ;;  %v654_v6 = vsel %vm356_vm7, %v653_v1, 0.0 }
 0x110   : > { %v720_v14 = vsel %vm356_vm7, %v719_v10, 0.0 }
 0x113   : > { %v741_v4 = vpop.f32.mrf.mxu2  ;;  %v761_v5 = vpop.f32.mrf.mxu3 }
 0x114   : > { %v764_v9 = vsel %vm3554_vm0, %v741_v4, %v761_v5  ;;  %v807_v12 = vpop.f32.mrf.mxu0  ;;  %v827_v13 = vpop.f32.mrf.mxu1 }
 0x115   : > { %v769_v11 = vmul.f32 %v764_v9, %v764_v9  ;;  %v765_v15 = vsel %vm356_vm7, %v764_v9, 0.0  ;;  %v830_v19 = vsel %vm3554_vm0, %v807_v12, %v827_v13 }
 0x116   : > { %650 = vadd.xlane.f32.xlu1 %v649_v3  ;;  %v835_v23 = vmul.f32 %v830_v19, %v830_v19  ;;  %v831_v28 = vsel %vm356_vm7, %v830_v19, 0.0 }
 0x117   : > { %655 = vadd.xlane.f32.xlu2 %v654_v6  ;;  %716 = vadd.xlane.f32.xlu0 %v715_v8  ;;  %v770_v16 = vsel %vm356_vm7, %v769_v11, 0.0 }
 0x118   : > { %v836_v29 = vsel %vm356_vm7, %v835_v23, 0.0 }
 0x11b   : > { %v857_v20 = vpop.f32.mrf.mxu2  ;;  %v877_v22 = vpop.f32.mrf.mxu3 }
 0x11c   : > { %v880_v24 = vsel %vm3554_vm0, %v857_v20, %v877_v22  ;;  %v923_v25 = vpop.f32.mrf.mxu0  ;;  %v943_v27 = vpop.f32.mrf.mxu1 }
 0x11d   : > { %v881_v30 = vsel %vm356_vm7, %v880_v24, 0.0  ;;  %v946_v31 = vsel %vm3554_vm0, %v923_v25, %v943_v27  ;;  %v885_v32 = vmul.f32 %v880_v24, %v880_v24 }
 0x11e   : > { %721 = vadd.xlane.f32.xlu1 %v720_v14  ;;  %v951_v33 = vmul.f32 %v946_v31, %v946_v31  ;;  %v947_v37 = vsel %vm356_vm7, %v946_v31, 0.0 }
 0x11f   : > { %766 = vadd.xlane.f32.xlu2 %v765_v15  ;;  %771 = vadd.xlane.f32.xlu0 %v770_v16  ;;  %v886_v36 = vsel %vm356_vm7, %v885_v32, 0.0 }
 0x120   : > { %v952_v38 = vsel %vm356_vm7, %v951_v33, 0.0 }
 0x123   : > { %v973_v34 = vpop.f32.mrf.mxu2  ;;  %v993_v35 = vpop.f32.mrf.mxu3 }
 0x124   : > { %v996_v17 = vsel %vm3554_vm0, %v973_v34, %v993_v35  ;;  %v1039_v39 = vpop.f32.mrf.mxu0  ;;  %v1059_v18 = vpop.f32.mrf.mxu1 }
 0x125   : > { %v1001_v40 = vmul.f32 %v996_v17, %v996_v17  ;;  %v1062_v21 = vsel %vm3554_vm0, %v1039_v39, %v1059_v18  ;;  %v997_v42 = vsel %vm356_vm7, %v996_v17, 0.0 }
 0x126   : > { %832 = vadd.xlane.f32.xlu1 %v831_v28  ;;  %v1063_v44 = vsel %vm356_vm7, %v1062_v21, 0.0  ;;  %v1067_v46 = vmul.f32 %v1062_v21, %v1062_v21 }
 0x127   : > { %837 = vadd.xlane.f32.xlu2 %v836_v29  ;;  %882 = vadd.xlane.f32.xlu0 %v881_v30  ;;  %v1002_v43 = vsel %vm356_vm7, %v1001_v40, 0.0 }
 0x128   : > { %v1068_v50 = vsel %vm356_vm7, %v1067_v46, 0.0 }
 0x12b   : > { %v1089_v26 = vpop.f32.mrf.mxu2  ;;  %v1109_v41 = vpop.f32.mrf.mxu3 }
 0x12c   : > { %v1112_v45 = vsel %vm3554_vm0, %v1089_v26, %v1109_v41  ;;  %v1155_v48 = vpop.f32.mrf.mxu0  ;;  %v1175_v49 = vpop.f32.mrf.mxu1 }
 0x12d   : > { %v1117_v47 = vmul.f32 %v1112_v45, %v1112_v45  ;;  %v1113_v51 = vsel %vm356_vm7, %v1112_v45, 0.0  ;;  %v1178_v53 = vsel %vm3554_vm0, %v1155_v48, %v1175_v49 }
 0x12e   : > { %887 = vadd.xlane.f32.xlu1 %v886_v36  ;;  %v1183_v56 = vmul.f32 %v1178_v53, %v1178_v53  ;;  %v1179_v58 = vsel %vm356_vm7, %v1178_v53, 0.0 }
 0x12f   : > { %948 = vadd.xlane.f32.xlu2 %v947_v37  ;;  %953 = vadd.xlane.f32.xlu0 %v952_v38  ;;  %v1118_v52 = vsel %vm356_vm7, %v1117_v47, 0.0 }
 0x130   : > { %v1184_v59 = vsel %vm356_vm7, %v1183_v56, 0.0  ;;  %v1238_v56 = vld [vmem:[#allocation2] sm:$0xff] }
 0x133   : > { %v1205_v54 = vpop.f32.mrf.mxu2  ;;  %v1225_v55 = vpop.f32.mrf.mxu3 }
 0x134   : > { %v1228_v57 = vsel %vm3554_vm0, %v1205_v54, %v1225_v55 }
 0x135   : > { %v1229_v60 = vsel %vm356_vm7, %v1228_v57, 0.0  ;;  %v1233_v61 = vmul.f32 %v1228_v57, %v1228_v57 }
 0x136   : > { %998 = vadd.xlane.f32.xlu1 %v997_v42 }
 0x137   : > { %1003 = vadd.xlane.f32.xlu2 %v1002_v43  ;;  %1064 = vadd.xlane.f32.xlu0 %v1063_v44  ;;  %v1234_v62 = vsel %vm356_vm7, %v1233_v61, 0.0 }
 0x13e   : > { %1069 = vadd.xlane.f32.xlu1 %v1068_v50 }
 0x13f   : > { %1114 = vadd.xlane.f32.xlu2 %v1113_v51  ;;  %1119 = vadd.xlane.f32.xlu0 %v1118_v52 }
 0x146   : > { %1180 = vadd.xlane.f32.xlu1 %v1179_v58 }
 0x147   : > { %1185 = vadd.xlane.f32.xlu2 %v1184_v59  ;;  %1230 = vadd.xlane.f32.xlu0 %v1229_v60 }
 0x14e   : > { %1235 = vadd.xlane.f32.xlu1 %v1234_v62  ;;  %v1242_v62 = vld [vmem:[#allocation3] sm:$0xff] }
 0x16a   : > { %v359_v63 = vpop.xlane.xlu0 %358 }
 0x171   : > { %v419_v0 = vpop.xlane.xlu1 %418 }
 0x172   : > { %v485_v1 = vpop.xlane.xlu2 %484  ;;  %v364_v2 = vpop.xlane.xlu0 %363  ;;  %v420_v16 = vadd.f32 %v419_v0, %v359_v63 }
 0x174   : > { %v486_v23 = vadd.f32 %v485_v1, %v420_v16 }
 0x179   : > { %v424_v3 = vpop.xlane.xlu1 %423 }
 0x17a   : > { %v490_v4 = vpop.xlane.xlu2 %489  ;;  %v535_v5 = vpop.xlane.xlu0 %534  ;;  %v425_v24 = vadd.f32 %v424_v3, %v364_v2 }
 0x17b   : > { %v536_v25 = vadd.f32 %v535_v5, %v486_v23 }
 0x17c   : > { %v491_v27 = vadd.f32 %v490_v4, %v425_v24 }
 0x181   : > { %v540_v6 = vpop.xlane.xlu1 %539 }
 0x182   : > { %v601_v8 = vpop.xlane.xlu2 %600  ;;  %v606_v9 = vpop.xlane.xlu0 %605  ;;  %v541_v30 = vadd.f32 %v540_v6, %v491_v27 }
 0x183   : > { %v602_v28 = vadd.f32 %v601_v8, %v536_v25 }
 0x184   : > { %v607_v34 = vadd.f32 %v606_v9, %v541_v30 }
 0x189   : > { %v651_v10 = vpop.xlane.xlu1 %650 }
 0x18a   : > { %v656_v11 = vpop.xlane.xlu2 %655  ;;  %v717_v12 = vpop.xlane.xlu0 %716  ;;  %v652_v31 = vadd.f32 %v651_v10, %v602_v28 }
 0x18b   : > { %v657_v36 = vadd.f32 %v656_v11, %v607_v34 }
 0x18c   : > { %v718_v35 = vadd.f32 %v717_v12, %v652_v31 }
 0x191   : > { %v722_v13 = vpop.xlane.xlu1 %721 }
 0x192   : > { %v767_v14 = vpop.xlane.xlu2 %766  ;;  %v772_v15 = vpop.xlane.xlu0 %771  ;;  %v723_v17 = vadd.f32 %v722_v13, %v657_v36 }
 0x193   : > { %v768_v37 = vadd.f32 %v767_v14, %v718_v35 }
 0x194   : > { %v773_v21 = vadd.f32 %v772_v15, %v723_v17 }
 0x199   : > { %v833_v19 = vpop.xlane.xlu1 %832 }
 0x19a   : > { %v838_v20 = vpop.xlane.xlu2 %837  ;;  %v883_v22 = vpop.xlane.xlu0 %882  ;;  %v834_v39 = vadd.f32 %v833_v19, %v768_v37 }
 0x19b   : > { %v839_v41 = vadd.f32 %v838_v20, %v773_v21 }
 0x19c   : > { %v884_v26 = vadd.f32 %v883_v22, %v834_v39 }
 0x1a1   : > { %v888_v29 = vpop.xlane.xlu1 %887 }
 0x1a2   : > { %v949_v32 = vpop.xlane.xlu2 %948  ;;  %v954_v33 = vpop.xlane.xlu0 %953  ;;  %v889_v44 = vadd.f32 %v888_v29, %v839_v41 }
 0x1a3   : > { %v950_v42 = vadd.f32 %v949_v32, %v884_v26 }
 0x1a4   : > { %v955_v48 = vadd.f32 %v954_v33, %v889_v44 }
 0x1a9   : > { %v999_v38 = vpop.xlane.xlu1 %998 }
 0x1aa   : > { %v1004_v18 = vpop.xlane.xlu2 %1003  ;;  %v1065_v40 = vpop.xlane.xlu0 %1064  ;;  %v1000_v45 = vadd.f32 %v999_v38, %v950_v42 }
 0x1ab   : > { %v1005_v50 = vadd.f32 %v1004_v18, %v955_v48 }
 0x1ac   : > { %v1066_v49 = vadd.f32 %v1065_v40, %v1000_v45 }
 0x1b1   : > { %v1070_v43 = vpop.xlane.xlu1 %1069 }
 0x1b2   : > { %v1120_v46 = vpop.xlane.xlu0 %1119  ;;  %v1115_v47 = vpop.xlane.xlu2 %1114  ;;  %v1071_v53 = vadd.f32 %v1070_v43, %v1005_v50 }
 0x1b3   : > { %v1116_v51 = vadd.f32 %v1115_v47, %v1066_v49 }
 0x1b4   : > { %v1121_v59 = vadd.f32 %v1120_v46, %v1071_v53 }
 0x1b9   : > { %v1181_v52 = vpop.xlane.xlu1 %1180 }
 0x1ba   : > { %v1182_v54 = vadd.f32 %v1181_v52, %v1116_v51  ;;  %v1231_v55 = vpop.xlane.xlu0 %1230  ;;  %v1186_v58 = vpop.xlane.xlu2 %1185 }
 0x1bb   : > { %v1187_v61 = vadd.f32 %v1186_v58, %v1121_v59 }
 0x1bc   : > { %v1232_v57 = vadd.f32 %v1231_v55, %v1182_v54 }
 0x1be   : > { %v1239_v60 = vadd.f32 %v1238_v56, %v1232_v57 }
 0x1c0   : > { %1241 = vst.msk [vmem:[#allocation2] sm:$0xff] %vm1240_vm8, %v1239_v60 }
 0x1c1   : > { %v1236_v63 = vpop.xlane.xlu1 %1235 }
 0x1c2   : > { %v1237_v0 = vadd.f32 %v1236_v63, %v1187_v61 }
 0x1c4   : > { %v1243_v1 = vadd.f32 %v1242_v62, %v1237_v0 }
 0x1c6   : > { %1244 = vst.msk [vmem:[#allocation3] sm:$0xff] %vm1240_vm8, %v1243_v1 }
 0x1c7 PF: > { %s4418_s12 = sld [smem:[#allocation16_spill]] }
 0x1cd   : > { %p2893_p1 = scmp.ne.s32.totalorder %s4418_s12, 1 }
 0x1cf   : > { %1248 = sbr.rel (%p2893_p1) target bundleno = 752 (0x2f0), region = 82 }
 0x1d4   : > { %v1267_v2 = vld [vmem:[%s3542_s27] sm:$0x1]  ;;  %v1268_v3 = vld [vmem:[%s3542_s27 + $0x8] sm:$0x1]  ;;  %v1269_v4 = vld [vmem:[%s3542_s27 + $0x10] sm:$0x1] }
 0x1d5   : > { %v1270_v5 = vld [vmem:[%s3542_s27 + $0x18] sm:$0x1]  ;;  %v1276_v6 = vrot.slane %v1268_v3, 7  ;;  %vm1277_vm9 = vcmask 1041409   ;;  %v1279_v8 = vrot.slane %v1269_v4, 6  ;;  %vm1280_vm10 = vcmask 1042434  }
 0x1d6   : > { %v1282_v9 = vrot.slane %v1270_v5, 5  ;;  %vm1283_vm11 = vcmask 1043459   ;;  %vm1289_vm12 = vcmask 1043456   ;;  %v3798_v11 = vld [vmem:[%s3558_s22] sm:$0xff]  ;;  %vm1285_vm13 = vcmask 31744   ;;  %v3801_v12 = vld [vmem:[%s3558_s22 + $0x8] sm:$0xff] }
 0x1d7   : > { %v1278_v10 = vsel %vm1277_vm9, %v1276_v6, %v1267_v2  ;;  %v1456_v13 = vld [vmem:[%s3542_s27 + $0x1] sm:$0x1]  ;;  %v3806_v15 = vld [vmem:[%s3558_s22 + $0x10] sm:$0xff]  ;;  %v3809_v16 = vld [vmem:[%s3558_s22 + $0x18] sm:$0xff]  ;;  %v3333_v23 = vmov 0   ;;  %vm1368_vm2 = vcmask 253952  }
 0x1d8   : > { %v1281_v14 = vsel %vm1280_vm10, %v1279_v8, %v1278_v10  ;;  %v1457_v19 = vld [vmem:[%s3542_s27 + $0x9] sm:$0x1]  ;;  %v1458_v20 = vld [vmem:[%s3542_s27 + $0x11] sm:$0x1]  ;;  %v1459_v22 = vld [vmem:[%s3542_s27 + $0x19] sm:$0x1]  ;;  %3154 = vset.pattern.permute.xlu0 %v3333_v23 }
 0x1d9   : > { %v1284_v24 = vsel %vm1283_vm11, %v1282_v9, %v1281_v14  ;;  %v1465_v25 = vrot.slane %v1457_v19, 7  ;;  %v1467_v27 = vrot.slane %v1458_v20, 6  ;;  %v1469_v28 = vrot.slane %v1459_v22, 5  ;;  %v1626_v29 = vld [vmem:[%s3542_s27 + $0x2] sm:$0x1]  ;;  %v1249_v30 = vld [vmem:[#allocation2] sm:$0xff] }
 0x1da   : > { %2894 = vmatpush.msk.msra.mxu0 %vm1289_vm12, %v1284_v24  ;;  %2897 = vmatpush.msk.msra.mxu1 %vm1289_vm12, %v1284_v24  ;;  %v1627_v31 = vld [vmem:[%s3542_s27 + $0xa] sm:$0x1]  ;;  %v1628_v32 = vld [vmem:[%s3542_s27 + $0x12] sm:$0x1]  ;;  %v1629_v33 = vld [vmem:[%s3542_s27 + $0x1a] sm:$0x1] }
 0x1db   : > { %2900 = vmatpush.msk.msra.mxu2 %vm1289_vm12, %v1284_v24  ;;  %2903 = vmatpush.msk.msra.mxu3 %vm1289_vm12, %v1284_v24  ;;  %v1466_v34 = vsel %vm1277_vm9, %v1465_v25, %v1456_v13  ;;  %v1635_v35 = vrot.slane %v1627_v31, 7  ;;  %v1637_v36 = vrot.slane %v1628_v32, 6  ;;  %v1639_v37 = vrot.slane %v1629_v33, 5  ;;  %v1251_v38 = vld [vmem:[#allocation3] sm:$0xff]  ;;  %v1796_v17 = vld [vmem:[%s3542_s27 + $0x3] sm:$0x1] }
 0x1dc   : > { %2895 = vmatmul.msk.f32.vlgmr.msra.gmra.mxu0 %vm1285_vm13, %v3798_v11  ;;  %2898 = vmatmul.msk.f32.vlgmr.msra.gmra.mxu1 %vm1285_vm13, %v3801_v12  ;;  %v1468_v39 = vsel %vm1280_vm10, %v1467_v27, %v1466_v34  ;;  %v1250_v18 = vmul.f32 0.0009765625, %v1249_v30  ;;  %v1252_v40 = vmul.f32 0.0009765625, %v1251_v38  ;;  %v1797_v21 = vld [vmem:[%s3542_s27 + $0xb] sm:$0x1]  ;;  %v1798_v26 = vld [vmem:[%s3542_s27 + $0x13] sm:$0x1] }
 0x1dd   : > { %2901 = vmatmul.msk.f32.vlgmr.msra.gmra.mxu2 %vm1285_vm13, %v3806_v15  ;;  %2904 = vmatmul.msk.f32.vlgmr.msra.gmra.mxu3 %vm1285_vm13, %v3809_v16  ;;  %v1470_v41 = vsel %vm1283_vm11, %v1469_v28, %v1468_v39  ;;  %v1636_v42 = vsel %vm1277_vm9, %v1635_v35, %v1626_v29  ;;  %v1799_v43 = vld [vmem:[%s3542_s27 + $0x1b] sm:$0x1]  ;;  %v1805_v44 = vrot.slane %v1797_v21, 7  ;;  %v1807_v45 = vrot.slane %v1798_v26, 6  ;;  %v1967_v48 = vld [vmem:[%s3542_s27 + $0xc] sm:$0x1] }
 0x1de   : > { %2911 = vmatpush.msk.msrb.mxu2 %vm1289_vm12, %v1470_v41  ;;  %2914 = vmatpush.msk.msrb.mxu3 %vm1289_vm12, %v1470_v41  ;;  %v1638_v46 = vsel %vm1280_vm10, %v1637_v36, %v1636_v42  ;;  %v1253_v47 = vmul.f32 %v1250_v18, %v1250_v18  ;;  %v1809_v51 = vrot.slane %v1799_v43, 5  ;;  %v1968_v54 = vld [vmem:[%s3542_s27 + $0x14] sm:$0x1]  ;;  %v1975_v55 = vrot.slane %v1967_v48, 7  ;;  %v1966_v57 = vld [vmem:[%s3542_s27 + $0x4] sm:$0x1] }
 0x1df   : > { %2905 = vmatpush.msk.msrb.mxu0 %vm1289_vm12, %v1470_v41  ;;  %2908 = vmatpush.msk.msrb.mxu1 %vm1289_vm12, %v1470_v41  ;;  %v1640_v49 = vsel %vm1283_vm11, %v1639_v37, %v1638_v46  ;;  %v1806_v50 = vsel %vm1277_vm9, %v1805_v44, %v1796_v17  ;;  %v1969_v60 = vld [vmem:[%s3542_s27 + $0x1c] sm:$0x1]  ;;  %v1977_v61 = vrot.slane %v1968_v54, 6  ;;  %v2137_v63 = vld [vmem:[%s3542_s27 + $0xd] sm:$0x1] }
 0x1e0   : > { %2922 = vmatpush.msk.msra.mxu2 %vm1289_vm12, %v1640_v49  ;;  %2925 = vmatpush.msk.msra.mxu3 %vm1289_vm12, %v1640_v49  ;;  %v1254_v52 = vsub.f32 %v1252_v40, %v1253_v47  ;;  %v1808_v53 = vsel %vm1280_vm10, %v1807_v45, %v1806_v50  ;;  %v1976_v62 = vsel %vm1277_vm9, %v1975_v55, %v1966_v57  ;;  %v1979_v0 = vrot.slane %v1969_v60, 5  ;;  %v2138_v2 = vld [vmem:[%s3542_s27 + $0x15] sm:$0x1]  ;;  %v2136_v4 = vld [vmem:[%s3542_s27 + $0x5] sm:$0x1] }
 0x1e1   : > { %2916 = vmatpush.msk.msra.mxu0 %vm1289_vm12, %v1640_v49  ;;  %2919 = vmatpush.msk.msra.mxu1 %vm1289_vm12, %v1640_v49  ;;  %v1810_v58 = vsel %vm1283_vm11, %v1809_v51, %v1808_v53  ;;  %v1978_v1 = vsel %vm1280_vm10, %v1977_v61, %v1976_v62  ;;  %v2145_v3 = vrot.slane %v2137_v63, 7  ;;  %v2139_v8 = vld [vmem:[%s3542_s27 + $0x1d] sm:$0x1]  ;;  %v2147_v9 = vrot.slane %v2138_v2, 6  ;;  %v2307_v14 = vld [vmem:[%s3542_s27 + $0xe] sm:$0x1] }
 0x1e2   : > { %1340 = vperm.xlu0 %3154, %v1250_v18   ;;  %v1255_v56 = vmax.f32 %v1254_v52, 0.0  ;;  %v1980_v5 = vsel %vm1283_vm11, %v1979_v0, %v1978_v1  ;;  %v2149_v20 = vrot.slane %v2139_v8, 5  ;;  %v2308_v24 = vld [vmem:[%s3542_s27 + $0x16] sm:$0x1]  ;;  %v2315_v25 = vrot.slane %v2307_v14, 7 }
 0x1e3   : > { %v2146_v13 = vsel %vm1277_vm9, %v2145_v3, %v2136_v4  ;;  %v2306_v27 = vld [vmem:[%s3542_s27 + $0x6] sm:$0x1]  ;;  %v2309_v31 = vld [vmem:[%s3542_s27 + $0x1e] sm:$0x1]  ;;  %v2317_v32 = vrot.slane %v2308_v24, 6 }
 0x1e4   : > { %2906 = vmatmul.msk.f32.vlgmr.msrb.gmra.mxu0 %vm1285_vm13, %v3798_v11  ;;  %2909 = vmatmul.msk.f32.vlgmr.msrb.gmra.mxu1 %vm1285_vm13, %v3801_v12  ;;  %v1256_v59 = vadd.f32 1e-05, %v1255_v56  ;;  %v2148_v22 = vsel %vm1280_vm10, %v2147_v9, %v2146_v13  ;;  %v2316_v34 = vsel %vm1277_vm9, %v2315_v25, %v2306_v27  ;;  %v2477_v35 = vld [vmem:[%s3542_s27 + $0xf] sm:$0x1]  ;;  %v2319_v37 = vrot.slane %v2309_v31, 5 }
 0x1e5   : > { %2912 = vmatmul.msk.f32.vlgmr.msrb.gmra.mxu2 %vm1285_vm13, %v3806_v15  ;;  %2915 = vmatmul.msk.f32.vlgmr.msrb.gmra.mxu3 %vm1285_vm13, %v3809_v16  ;;  %v2150_v29 = vsel %vm1283_vm11, %v2149_v20, %v2148_v22  ;;  %v2318_v38 = vsel %vm1280_vm10, %v2317_v32, %v2316_v34  ;;  %v2478_v17 = vld [vmem:[%s3542_s27 + $0x17] sm:$0x1]  ;;  %v2485_v39 = vrot.slane %v2477_v35, 7  ;;  %v2476_v18 = vld [vmem:[%s3542_s27 + $0x7] sm:$0x1] }
 0x1e6   : > { %3155 = vrsqrt.f32 %v1256_v59  ;;  %2933 = vmatpush.msk.msrb.mxu2 %vm1289_vm12, %v1810_v58  ;;  %2936 = vmatpush.msk.msrb.mxu3 %vm1289_vm12, %v1810_v58  ;;  %vm1263_vm14 = vweird.f32 %v1256_v59  ;;  %v2320_v40 = vsel %vm1283_vm11, %v2319_v37, %v2318_v38  ;;  %v2479_v21 = vld [vmem:[%s3542_s27 + $0x1f] sm:$0x1]  ;;  %v2487_v26 = vrot.slane %v2478_v17, 6 }
 0x1e7   : > { %2927 = vmatpush.msk.msrb.mxu0 %vm1289_vm12, %v1810_v58  ;;  %2930 = vmatpush.msk.msrb.mxu1 %vm1289_vm12, %v1810_v58  ;;  %v2486_v41 = vsel %vm1277_vm9, %v2485_v39, %v2476_v18  ;;  %v2489_v42 = vrot.slane %v2479_v21, 5 }
 0x1e8   : > { %v2488_v43 = vsel %vm1280_vm10, %v2487_v26, %v2486_v41 }
 0x1e9   : > { %v2490_v44 = vsel %vm1283_vm11, %v2489_v42, %v2488_v43 }
 0x1ec   : > { %v3156_v6 = vpop.eup %3155  ;;  %2917 = vmatmul.msk.f32.vlgmr.msra.gmra.mxu0 %vm1285_vm13, %v3798_v11  ;;  %2920 = vmatmul.msk.f32.vlgmr.msra.gmra.mxu1 %vm1285_vm13, %v3801_v12 }
 0x1ed   : > { %v1258_v10 = vmul.f32 %v3156_v6, %v1256_v59  ;;  %2923 = vmatmul.msk.f32.vlgmr.msra.gmra.mxu2 %vm1285_vm13, %v3806_v15  ;;  %2926 = vmatmul.msk.f32.vlgmr.msra.gmra.mxu3 %vm1285_vm13, %v3809_v16  ;;  %vm1264_vm15 = vweird.f32 %v3156_v6 }
 0x1ee   : > { %2944 = vmatpush.msk.msra.mxu2 %vm1289_vm12, %v1980_v5  ;;  %2947 = vmatpush.msk.msra.mxu3 %vm1289_vm12, %v1980_v5  ;;  %vm3893_vm1 = vmor %vm1263_vm14, %vm1264_vm15 }
 0x1ef   : > { %v1259_v19 = vmul.f32 %v3156_v6, %v1258_v10  ;;  %2938 = vmatpush.msk.msra.mxu0 %vm1289_vm12, %v1980_v5  ;;  %2941 = vmatpush.msk.msra.mxu1 %vm1289_vm12, %v1980_v5 }
 0x1f1   : > { %v1260_v23 = vmul.f32 0.5, %v1259_v19 }
 0x1f3   : > { %v1261_v28 = vsub.f32 1.5, %v1260_v23 }
 0x1f4   : > { %2928 = vmatmul.msk.f32.vlgmr.msrb.gmra.mxu0 %vm1285_vm13, %v3798_v11  ;;  %2931 = vmatmul.msk.f32.vlgmr.msrb.gmra.mxu1 %vm1285_vm13, %v3801_v12 }
 0x1f5   : > { %v1262_v33 = vmul.f32 %v3156_v6, %v1261_v28  ;;  %2934 = vmatmul.msk.f32.vlgmr.msrb.gmra.mxu2 %vm1285_vm13, %v3806_v15  ;;  %2937 = vmatmul.msk.f32.vlgmr.msrb.gmra.mxu3 %vm1285_vm13, %v3809_v16 }
 0x1f6   : > { %2955 = vmatpush.msk.msrb.mxu2 %vm1289_vm12, %v2150_v29  ;;  %2958 = vmatpush.msk.msrb.mxu3 %vm1289_vm12, %v2150_v29 }
 0x1f7   : > { %v1266_v36 = vsel %vm3893_vm1, %v3156_v6, %v1262_v33  ;;  %2949 = vmatpush.msk.msrb.mxu0 %vm1289_vm12, %v2150_v29  ;;  %2952 = vmatpush.msk.msrb.mxu1 %vm1289_vm12, %v2150_v29 }
 0x1f8   : > { %1346 = vperm.xlu0 %3154, %v1266_v36  }
 0x1fc   : > { %2939 = vmatmul.msk.f32.vlgmr.msra.gmra.mxu0 %vm1285_vm13, %v3798_v11  ;;  %2942 = vmatmul.msk.f32.vlgmr.msra.gmra.mxu1 %vm1285_vm13, %v3801_v12 }
 0x1fd   : > { %2945 = vmatmul.msk.f32.vlgmr.msra.gmra.mxu2 %vm1285_vm13, %v3806_v15  ;;  %2948 = vmatmul.msk.f32.vlgmr.msra.gmra.mxu3 %vm1285_vm13, %v3809_v16 }
 0x1fe   : > { %2966 = vmatpush.msk.msra.mxu2 %vm1289_vm12, %v2320_v40  ;;  %2969 = vmatpush.msk.msra.mxu3 %vm1289_vm12, %v2320_v40 }
 0x1ff   : > { %2960 = vmatpush.msk.msra.mxu0 %vm1289_vm12, %v2320_v40  ;;  %2963 = vmatpush.msk.msra.mxu1 %vm1289_vm12, %v2320_v40 }
 0x204   : > { %2950 = vmatmul.msk.f32.vlgmr.msrb.gmra.mxu0 %vm1285_vm13, %v3798_v11  ;;  %2953 = vmatmul.msk.f32.vlgmr.msrb.gmra.mxu1 %vm1285_vm13, %v3801_v12 }
 0x205   : > { %2956 = vmatmul.msk.f32.vlgmr.msrb.gmra.mxu2 %vm1285_vm13, %v3806_v15  ;;  %2959 = vmatmul.msk.f32.vlgmr.msrb.gmra.mxu3 %vm1285_vm13, %v3809_v16 }
 0x206   : > { %2977 = vmatpush.msk.msrb.mxu2 %vm1289_vm12, %v2490_v44  ;;  %2980 = vmatpush.msk.msrb.mxu3 %vm1289_vm12, %v2490_v44 }
 0x207   : > { %2971 = vmatpush.msk.msrb.mxu0 %vm1289_vm12, %v2490_v44  ;;  %2974 = vmatpush.msk.msrb.mxu1 %vm1289_vm12, %v2490_v44 }
 0x20c   : > { %2961 = vmatmul.msk.f32.vlgmr.msra.gmra.mxu0 %vm1285_vm13, %v3798_v11  ;;  %2964 = vmatmul.msk.f32.vlgmr.msra.gmra.mxu1 %vm1285_vm13, %v3801_v12 }
 0x20d   : > { %2967 = vmatmul.msk.f32.vlgmr.msra.gmra.mxu2 %vm1285_vm13, %v3806_v15  ;;  %2970 = vmatmul.msk.f32.vlgmr.msra.gmra.mxu3 %vm1285_vm13, %v3809_v16 }
 0x214   : > { %2972 = vmatmul.msk.f32.vlgmr.msrb.gmra.mxu0 %vm1285_vm13, %v3798_v11  ;;  %2975 = vmatmul.msk.f32.vlgmr.msrb.gmra.mxu1 %vm1285_vm13, %v3801_v12 }
 0x215   : > { %2978 = vmatmul.msk.f32.vlgmr.msrb.gmra.mxu2 %vm1285_vm13, %v3806_v15  ;;  %2981 = vmatmul.msk.f32.vlgmr.msrb.gmra.mxu3 %vm1285_vm13, %v3809_v16 }
 0x254   : > { %v3962_v47 = vpop.permute.xlu0 %1340 }
 0x259   : > { %v1309_v45 = vpop.f32.mrf.mxu0  ;;  %v1334_v46 = vpop.f32.mrf.mxu1 }
 0x25a   : > { %v1337_v50 = vsel %vm3554_vm0, %v1309_v45, %v1334_v46 }
 0x25b   : > { %v1343_v15 = vsub.f32 %v1337_v50, %v3962_v47 }
 0x260   : > { %v1399_v48 = vpop.f32.mrf.mxu2  ;;  %v1424_v49 = vpop.f32.mrf.mxu3 }
 0x261   : > { %v1427_v11 = vsel %vm3554_vm0, %v1399_v48, %v1424_v49  ;;  %v1493_v51 = vpop.f32.mrf.mxu0  ;;  %v1517_v52 = vpop.f32.mrf.mxu1 }
 0x262   : > { %v1428_v12 = vsub.f32 %v1427_v11, %v3962_v47  ;;  %v1520_v53 = vsel %vm3554_vm0, %v1493_v51, %v1517_v52 }
 0x263   : > { %v1521_v58 = vsub.f32 %v1520_v53, %v3962_v47 }
 0x268   : > { %v1570_v0 = vpop.f32.mrf.mxu2  ;;  %v1594_v1 = vpop.f32.mrf.mxu3 }
 0x269   : > { %v1597_v6 = vsel %vm3554_vm0, %v1570_v0, %v1594_v1  ;;  %v1663_v27 = vpop.f32.mrf.mxu0  ;;  %v1687_v28 = vpop.f32.mrf.mxu1 }
 0x26a   : > { %v3970_v16 = vpop.permute.xlu0 %1346  ;;  %v1598_v14 = vsub.f32 %v1597_v6, %v3962_v47  ;;  %v1690_v30 = vsel %vm3554_vm0, %v1663_v27, %v1687_v28 }
 0x26b   : > { %v1349_v54 = vmul.f32 %v3970_v16, %v1343_v15  ;;  %v1429_v55 = vmul.f32 %v1428_v12, %v3970_v16  ;;  %v1522_v4 = vmul.f32 %v1521_v58, %v3970_v16  ;;  %v1691_v34 = vsub.f32 %v1690_v30, %v3962_v47 }
 0x26c   : > { %v1599_v25 = vmul.f32 %v1598_v14, %v3970_v16 }
 0x26d   : > { %vm1350_vm3 = vcmp.gt.f32.partialorder %v1349_v54, 0.0  ;;  %v1351_v56 = vmul.f32 0.2, %v1349_v54  ;;  %vm1430_vm4 = vcmp.gt.f32.partialorder %v1429_v55, 0.0  ;;  %v1431_v57 = vmul.f32 0.2, %v1429_v55 }
 0x26e   : > { %v1524_v13 = vmul.f32 0.2, %v1522_v4  ;;  %vm1523_vm5 = vcmp.gt.f32.partialorder %v1522_v4, 0.0  ;;  %v1601_v33 = vmul.f32 0.2, %v1599_v25  ;;  %vm1600_vm6 = vcmp.gt.f32.partialorder %v1599_v25, 0.0 }
 0x26f   : > { %v1352_v59 = vsel %vm1350_vm3, %v1349_v54, %v1351_v56  ;;  %v1432_v60 = vsel %vm1430_vm4, %v1429_v55, %v1431_v57  ;;  %v1692_v40 = vmul.f32 %v1691_v34, %v3970_v16 }
 0x270   : > { %v1354_v61 = vrot.slane %v1352_v59, 1  ;;  %v1355_v62 = vrot.slane %v1352_v59, 2  ;;  %v1356_v63 = vrot.slane %v1352_v59, 3  ;;  %1369 = vst.msk [vmem:[%s3560_s28] sm:$0x1] %vm1368_vm2, %v1352_v59  ;;  %v1357_v2 = vrot.slane %v1352_v59, 4  ;;  %v1740_v37 = vpop.f32.mrf.mxu2  ;;  %v1764_v38 = vpop.f32.mrf.mxu3 }
 0x271   : > { %1448 = vst.msk [vmem:[%s3560_s28 + $0x1] sm:$0x1] %vm1368_vm2, %v1432_v60  ;;  %v1358_v3 = vrot.slane %v1352_v59, 5  ;;  %v1359_v5 = vrot.slane %v1352_v59, 6  ;;  %v1360_v8 = vrot.slane %v1352_v59, 7  ;;  %v1434_v9 = vrot.slane %v1432_v60, 1  ;;  %v1833_v12 = vpop.f32.mrf.mxu0  ;;  %v1857_v51 = vpop.f32.mrf.mxu1 }
 0x272   : > { %1370 = vst.msk [vmem:[%s3560_s28 + $0x10] sm:$0x1] %vm1368_vm2, %v1354_v61  ;;  %v1435_v10 = vrot.slane %v1432_v60, 2  ;;  %v1436_v19 = vrot.slane %v1432_v60, 3  ;;  %v1437_v20 = vrot.slane %v1432_v60, 4  ;;  %v1438_v22 = vrot.slane %v1432_v60, 5 }
 0x273   : > { %1371 = vst.msk [vmem:[%s3560_s28 + $0x20] sm:$0x1] %vm1368_vm2, %v1355_v62  ;;  %v1439_v23 = vrot.slane %v1432_v60, 6  ;;  %v1525_v24 = vsel %vm1523_vm5, %v1522_v4, %v1524_v13  ;;  %v1440_v29 = vrot.slane %v1432_v60, 7  ;;  %v1602_v18 = vsel %vm1600_vm6, %v1599_v25, %v1601_v33 }
 0x274   : > { %1372 = vst.msk [vmem:[%s3560_s28 + $0x30] sm:$0x1] %vm1368_vm2, %v1356_v63  ;;  %v1527_v31 = vrot.slane %v1525_v24, 1  ;;  %v1528_v32 = vrot.slane %v1525_v24, 2  ;;  %v1529_v35 = vrot.slane %v1525_v24, 3  ;;  %v1530_v36 = vrot.slane %v1525_v24, 4 }
 0x275   : > { %1373 = vst.msk [vmem:[%s3560_s28 + $0x40] sm:$0x1] %vm1368_vm2, %v1357_v2  ;;  %v1531_v17 = vrot.slane %v1525_v24, 5  ;;  %v1532_v39 = vrot.slane %v1525_v24, 6  ;;  %v1533_v21 = vrot.slane %v1525_v24, 7  ;;  %v1767_v26 = vsel %vm3554_vm0, %v1740_v37, %v1764_v38 }
 0x276   : > { %1374 = vst.msk [vmem:[%s3560_s28 + $0x50] sm:$0x1] %vm1368_vm2, %v1358_v3  ;;  %v1604_v41 = vrot.slane %v1602_v18, 1  ;;  %v1605_v42 = vrot.slane %v1602_v18, 2  ;;  %v1694_v43 = vmul.f32 0.2, %v1692_v40  ;;  %v1768_v44 = vsub.f32 %v1767_v26, %v3962_v47 }
 0x277   : > { %1375 = vst.msk [vmem:[%s3560_s28 + $0x60] sm:$0x1] %vm1368_vm2, %v1359_v5  ;;  %v1606_v45 = vrot.slane %v1602_v18, 3  ;;  %vm1693_vm7 = vcmp.gt.f32.partialorder %v1692_v40, 0.0  ;;  %v1607_v46 = vrot.slane %v1602_v18, 4  ;;  %v1608_v48 = vrot.slane %v1602_v18, 5 }
 0x278   : > { %1376 = vst.msk [vmem:[%s3560_s28 + $0x70] sm:$0x1] %vm1368_vm2, %v1360_v8  ;;  %v1609_v49 = vrot.slane %v1602_v18, 6  ;;  %v1695_v50 = vsel %vm1693_vm7, %v1692_v40, %v1694_v43  ;;  %v1769_v11 = vmul.f32 %v1768_v44, %v3970_v16  ;;  %v1610_v15 = vrot.slane %v1602_v18, 7  ;;  %v1910_v59 = vpop.f32.mrf.mxu2  ;;  %v1934_v60 = vpop.f32.mrf.mxu3 }
 0x279   : > { %1449 = vst.msk [vmem:[%s3560_s28 + $0x11] sm:$0x1] %vm1368_vm2, %v1434_v9  ;;  %v1860_v52 = vsel %vm3554_vm0, %v1833_v12, %v1857_v51  ;;  %v1697_v53 = vrot.slane %v1695_v50, 1  ;;  %v1698_v54 = vrot.slane %v1695_v50, 2  ;;  %v1699_v57 = vrot.slane %v1695_v50, 3 }
 0x27a   : > { %1450 = vst.msk [vmem:[%s3560_s28 + $0x21] sm:$0x1] %vm1368_vm2, %v1435_v10  ;;  %v1771_v55 = vmul.f32 0.2, %v1769_v11  ;;  %v1861_v56 = vsub.f32 %v1860_v52, %v3962_v47  ;;  %vm1770_vm8 = vcmp.gt.f32.partialorder %v1769_v11, 0.0  ;;  %v1700_v58 = vrot.slane %v1695_v50, 4 }
 0x27b   : > { %1451 = vst.msk [vmem:[%s3560_s28 + $0x31] sm:$0x1] %vm1368_vm2, %v1436_v19  ;;  %v1701_v61 = vrot.slane %v1695_v50, 5  ;;  %v1702_v62 = vrot.slane %v1695_v50, 6  ;;  %v1703_v1 = vrot.slane %v1695_v50, 7  ;;  %v1937_v2 = vsel %vm3554_vm0, %v1910_v59, %v1934_v60 }
 0x27c   : > { %1452 = vst.msk [vmem:[%s3560_s28 + $0x41] sm:$0x1] %vm1368_vm2, %v1437_v20  ;;  %v1772_v63 = vsel %vm1770_vm8, %v1769_v11, %v1771_v55  ;;  %v1862_v0 = vmul.f32 %v1861_v56, %v3970_v16  ;;  %v1938_v6 = vsub.f32 %v1937_v2, %v3962_v47  ;;  %v2003_v20 = vpop.f32.mrf.mxu0 }
 0x27d   : > { %1453 = vst.msk [vmem:[%s3560_s28 + $0x51] sm:$0x1] %vm1368_vm2, %v1438_v22  ;;  %v1774_v3 = vrot.slane %v1772_v63, 1  ;;  %v1775_v4 = vrot.slane %v1772_v63, 2  ;;  %v1776_v8 = vrot.slane %v1772_v63, 3  ;;  %v1777_v9 = vrot.slane %v1772_v63, 4  ;;  %v2027_v22 = vpop.f32.mrf.mxu1 }
 0x27e   : > { %1454 = vst.msk [vmem:[%s3560_s28 + $0x61] sm:$0x1] %vm1368_vm2, %v1439_v23  ;;  %v1864_v5 = vmul.f32 0.2, %v1862_v0  ;;  %vm1863_vm9 = vcmp.gt.f32.partialorder %v1862_v0, 0.0  ;;  %v1778_v10 = vrot.slane %v1772_v63, 5  ;;  %v1939_v19 = vmul.f32 %v1938_v6, %v3970_v16 }
 0x27f   : > { %1455 = vst.msk [vmem:[%s3560_s28 + $0x71] sm:$0x1] %vm1368_vm2, %v1440_v29  ;;  %v1779_v13 = vrot.slane %v1772_v63, 6  ;;  %v1780_v23 = vrot.slane %v1772_v63, 7 }
 0x280   : > { %1541 = vst.msk [vmem:[%s3560_s28 + $0x2] sm:$0x1] %vm1368_vm2, %v1525_v24  ;;  %v1865_v14 = vsel %vm1863_vm9, %v1862_v0, %v1864_v5  ;;  %v2030_v24 = vsel %vm3554_vm0, %v2003_v20, %v2027_v22  ;;  %v1941_v28 = vmul.f32 0.2, %v1939_v19  ;;  %vm1940_vm10 = vcmp.gt.f32.partialorder %v1939_v19, 0.0  ;;  %v2104_v33 = vpop.f32.mrf.mxu3 }
 0x281   : > { %1542 = vst.msk [vmem:[%s3560_s28 + $0x12] sm:$0x1] %vm1368_vm2, %v1527_v31  ;;  %v1867_v25 = vrot.slane %v1865_v14, 1  ;;  %v1868_v27 = vrot.slane %v1865_v14, 2  ;;  %v2031_v29 = vsub.f32 %v2030_v24, %v3962_v47  ;;  %v1869_v30 = vrot.slane %v1865_v14, 3 }
 0x282   : > { %1543 = vst.msk [vmem:[%s3560_s28 + $0x22] sm:$0x1] %vm1368_vm2, %v1528_v32  ;;  %v1870_v31 = vrot.slane %v1865_v14, 4  ;;  %v2080_v32 = vpop.f32.mrf.mxu2  ;;  %v1871_v34 = vrot.slane %v1865_v14, 5  ;;  %v1873_v38 = vrot.slane %v1865_v14, 7 }
 0x283   : > { %1544 = vst.msk [vmem:[%s3560_s28 + $0x32] sm:$0x1] %vm1368_vm2, %v1529_v35  ;;  %v1872_v35 = vrot.slane %v1865_v14, 6  ;;  %v2032_v37 = vmul.f32 %v2031_v29, %v3970_v16 }
 0x284   : > { %1545 = vst.msk [vmem:[%s3560_s28 + $0x42] sm:$0x1] %vm1368_vm2, %v1530_v36  ;;  %v1942_v36 = vsel %vm1940_vm10, %v1939_v19, %v1941_v28 }
 0x285   : > { %1546 = vst.msk [vmem:[%s3560_s28 + $0x52] sm:$0x1] %vm1368_vm2, %v1531_v17  ;;  %v2107_v17 = vsel %vm3554_vm0, %v2080_v32, %v2104_v33  ;;  %v2034_v40 = vmul.f32 0.2, %v2032_v37  ;;  %v1946_v26 = vrot.slane %v1942_v36, 3  ;;  %vm2033_vm11 = vcmp.gt.f32.partialorder %v2032_v37, 0.0 }
 0x286   : > { %1547 = vst.msk [vmem:[%s3560_s28 + $0x62] sm:$0x1] %vm1368_vm2, %v1532_v39  ;;  %v1944_v39 = vrot.slane %v1942_v36, 1  ;;  %v1949_v43 = vrot.slane %v1942_v36, 6 }
 0x287   : > { %1548 = vst.msk [vmem:[%s3560_s28 + $0x72] sm:$0x1] %vm1368_vm2, %v1533_v21  ;;  %v2108_v21 = vsub.f32 %v2107_v17, %v3962_v47  ;;  %v2035_v44 = vsel %vm2033_vm11, %v2032_v37, %v2034_v40 }
 0x288   : > { %1618 = vst.msk [vmem:[%s3560_s28 + $0x3] sm:$0x1] %vm1368_vm2, %v1602_v18  ;;  %v1945_v18 = vrot.slane %v1942_v36, 2  ;;  %v2037_v11 = vrot.slane %v2035_v44, 1  ;;  %v2038_v12 = vrot.slane %v2035_v44, 2  ;;  %v2039_v52 = vrot.slane %v2035_v44, 3  ;;  %v2274_v55 = vpop.f32.mrf.mxu3 }
 0x289   : > { %1619 = vst.msk [vmem:[%s3560_s28 + $0x13] sm:$0x1] %vm1368_vm2, %v1604_v41  ;;  %v1947_v41 = vrot.slane %v1942_v36, 4  ;;  %v2041_v56 = vrot.slane %v2035_v44, 5  ;;  %v2043_v60 = vrot.slane %v2035_v44, 7 }
 0x28a   : > { %1620 = vst.msk [vmem:[%s3560_s28 + $0x23] sm:$0x1] %vm1368_vm2, %v1605_v42  ;;  %v1948_v42 = vrot.slane %v1942_v36, 5 }
 0x28b   : > { %1621 = vst.msk [vmem:[%s3560_s28 + $0x33] sm:$0x1] %vm1368_vm2, %v1606_v45  ;;  %v2109_v45 = vmul.f32 %v2108_v21, %v3970_v16 }
 0x28c   : > { %1622 = vst.msk [vmem:[%s3560_s28 + $0x43] sm:$0x1] %vm1368_vm2, %v1607_v46  ;;  %v2173_v46 = vpop.f32.mrf.mxu0 }
 0x28d   : > { %1623 = vst.msk [vmem:[%s3560_s28 + $0x53] sm:$0x1] %vm1368_vm2, %v1608_v48  ;;  %v2197_v48 = vpop.f32.mrf.mxu1  ;;  %v2111_v51 = vmul.f32 0.2, %v2109_v45  ;;  %vm2110_vm12 = vcmp.gt.f32.partialorder %v2109_v45, 0.0 }
 0x28e   : > { %1624 = vst.msk [vmem:[%s3560_s28 + $0x63] sm:$0x1] %vm1368_vm2, %v1609_v49  ;;  %v1950_v49 = vrot.slane %v1942_v36, 7 }
 0x28f   : > { %1625 = vst.msk [vmem:[%s3560_s28 + $0x73] sm:$0x1] %vm1368_vm2, %v1610_v15 }
 0x290   : > { %1711 = vst.msk [vmem:[%s3560_s28 + $0x4] sm:$0x1] %vm1368_vm2, %v1695_v50  ;;  %v2200_v50 = vsel %vm3554_vm0, %v2173_v46, %v2197_v48  ;;  %v2444_v28 = vpop.f32.mrf.mxu3 }
 0x291   : > { %1712 = vst.msk [vmem:[%s3560_s28 + $0x14] sm:$0x1] %vm1368_vm2, %v1697_v53  ;;  %v2201_v15 = vsub.f32 %v2200_v50, %v3962_v47  ;;  %v2040_v53 = vrot.slane %v2035_v44, 4 }
 0x292   : > { %1713 = vst.msk [vmem:[%s3560_s28 + $0x24] sm:$0x1] %vm1368_vm2, %v1698_v54  ;;  %v2250_v54 = vpop.f32.mrf.mxu2 }
 0x293   : > { %1714 = vst.msk [vmem:[%s3560_s28 + $0x34] sm:$0x1] %vm1368_vm2, %v1699_v57  ;;  %v2042_v57 = vrot.slane %v2035_v44, 6  ;;  %v2202_v59 = vmul.f32 %v2201_v15, %v3970_v16 }
 0x294   : > { %1715 = vst.msk [vmem:[%s3560_s28 + $0x44] sm:$0x1] %vm1368_vm2, %v1700_v58  ;;  %v2112_v58 = vsel %vm2110_vm12, %v2109_v45, %v2111_v51 }
 0x295   : > { %1716 = vst.msk [vmem:[%s3560_s28 + $0x54] sm:$0x1] %vm1368_vm2, %v1701_v61  ;;  %v2277_v61 = vsel %vm3554_vm0, %v2250_v54, %v2274_v55  ;;  %v2204_v0 = vmul.f32 0.2, %v2202_v59  ;;  %v2116_v2 = vrot.slane %v2112_v58, 3  ;;  %vm2203_vm13 = vcmp.gt.f32.partialorder %v2202_v59, 0.0 }
 0x296   : > { %1717 = vst.msk [vmem:[%s3560_s28 + $0x64] sm:$0x1] %vm1368_vm2, %v1702_v62  ;;  %v2114_v62 = vrot.slane %v2112_v58, 1  ;;  %v2119_v5 = vrot.slane %v2112_v58, 6 }
 0x297   : > { %1718 = vst.msk [vmem:[%s3560_s28 + $0x74] sm:$0x1] %vm1368_vm2, %v1703_v1  ;;  %v2278_v1 = vsub.f32 %v2277_v61, %v3962_v47  ;;  %v2205_v6 = vsel %vm2203_vm13, %v2202_v59, %v2204_v0 }
 0x298   : > { %1788 = vst.msk [vmem:[%s3560_s28 + $0x5] sm:$0x1] %vm1368_vm2, %v1772_v63  ;;  %v2115_v63 = vrot.slane %v2112_v58, 2  ;;  %v2207_v19 = vrot.slane %v2205_v6, 1  ;;  %v2208_v20 = vrot.slane %v2205_v6, 2  ;;  %v2209_v24 = vrot.slane %v2205_v6, 3  ;;  %v2614_v51 = vpop.f32.mrf.mxu3 }
 0x299   : > { %1789 = vst.msk [vmem:[%s3560_s28 + $0x15] sm:$0x1] %vm1368_vm2, %v1774_v3  ;;  %v2117_v3 = vrot.slane %v2112_v58, 4  ;;  %v2211_v29 = vrot.slane %v2205_v6, 5  ;;  %v2213_v33 = vrot.slane %v2205_v6, 7 }
 0x29a   : > { %1790 = vst.msk [vmem:[%s3560_s28 + $0x25] sm:$0x1] %vm1368_vm2, %v1775_v4  ;;  %v2118_v4 = vrot.slane %v2112_v58, 5 }
 0x29b   : > { %1791 = vst.msk [vmem:[%s3560_s28 + $0x35] sm:$0x1] %vm1368_vm2, %v1776_v8  ;;  %v2279_v8 = vmul.f32 %v2278_v1, %v3970_v16 }
 0x29c   : > { %1792 = vst.msk [vmem:[%s3560_s28 + $0x45] sm:$0x1] %vm1368_vm2, %v1777_v9  ;;  %v2343_v9 = vpop.f32.mrf.mxu0 }
 0x29d   : > { %1793 = vst.msk [vmem:[%s3560_s28 + $0x55] sm:$0x1] %vm1368_vm2, %v1778_v10  ;;  %v2367_v10 = vpop.f32.mrf.mxu1  ;;  %v2281_v22 = vmul.f32 0.2, %v2279_v8  ;;  %vm2280_vm14 = vcmp.gt.f32.partialorder %v2279_v8, 0.0 }
 0x29e   : > { %1794 = vst.msk [vmem:[%s3560_s28 + $0x65] sm:$0x1] %vm1368_vm2, %v1779_v13  ;;  %v2120_v13 = vrot.slane %v2112_v58, 7 }
 0x29f   : > { %1795 = vst.msk [vmem:[%s3560_s28 + $0x75] sm:$0x1] %vm1368_vm2, %v1780_v23 }
 0x2a0   : > { %1881 = vst.msk [vmem:[%s3560_s28 + $0x6] sm:$0x1] %vm1368_vm2, %v1865_v14  ;;  %v2370_v14 = vsel %vm3554_vm0, %v2343_v9, %v2367_v10 }
 0x2a1   : > { %1882 = vst.msk [vmem:[%s3560_s28 + $0x16] sm:$0x1] %vm1368_vm2, %v1867_v25  ;;  %v2371_v23 = vsub.f32 %v2370_v14, %v3962_v47  ;;  %v2210_v25 = vrot.slane %v2205_v6, 4 }
 0x2a2   : > { %1883 = vst.msk [vmem:[%s3560_s28 + $0x26] sm:$0x1] %vm1368_vm2, %v1868_v27  ;;  %v2420_v27 = vpop.f32.mrf.mxu2 }
 0x2a3   : > { %1884 = vst.msk [vmem:[%s3560_s28 + $0x36] sm:$0x1] %vm1368_vm2, %v1869_v30  ;;  %v2212_v30 = vrot.slane %v2205_v6, 6  ;;  %v2372_v32 = vmul.f32 %v2371_v23, %v3970_v16 }
 0x2a4   : > { %1885 = vst.msk [vmem:[%s3560_s28 + $0x46] sm:$0x1] %vm1368_vm2, %v1870_v31  ;;  %v2282_v31 = vsel %vm2280_vm14, %v2279_v8, %v2281_v22 }
 0x2a5   : > { %1886 = vst.msk [vmem:[%s3560_s28 + $0x56] sm:$0x1] %vm1368_vm2, %v1871_v34  ;;  %v2447_v34 = vsel %vm3554_vm0, %v2420_v27, %v2444_v28  ;;  %v2374_v37 = vmul.f32 0.2, %v2372_v32  ;;  %v2286_v17 = vrot.slane %v2282_v31, 3  ;;  %vm2373_vm15 = vcmp.gt.f32.partialorder %v2372_v32, 0.0  ;;  %v2537_v40 = vpop.f32.mrf.mxu1 }
 0x2a6   : > { %1887 = vst.msk [vmem:[%s3560_s28 + $0x66] sm:$0x1] %vm1368_vm2, %v1872_v35  ;;  %v2284_v35 = vrot.slane %v2282_v31, 1  ;;  %v2288_v21 = vrot.slane %v2282_v31, 5 }
 0x2a7   : > { %1888 = vst.msk [vmem:[%s3560_s28 + $0x76] sm:$0x1] %vm1368_vm2, %v1873_v38  ;;  %v2448_v38 = vsub.f32 %v2447_v34, %v3962_v47 }
 0x2a8   : > { %1958 = vst.msk [vmem:[%s3560_s28 + $0x7] sm:$0x1] %vm1368_vm2, %v1942_v36  ;;  %v2285_v36 = vrot.slane %v2282_v31, 2 }
 0x2a9   : > { %1959 = vst.msk [vmem:[%s3560_s28 + $0x17] sm:$0x1] %vm1368_vm2, %v1944_v39  ;;  %v2287_v39 = vrot.slane %v2282_v31, 4 }
 0x2aa   : > { %1960 = vst.msk [vmem:[%s3560_s28 + $0x27] sm:$0x1] %vm1368_vm2, %v1945_v18  ;;  %v2513_v18 = vpop.f32.mrf.mxu0 }
 0x2ab   : > { %1961 = vst.msk [vmem:[%s3560_s28 + $0x37] sm:$0x1] %vm1368_vm2, %v1946_v26  ;;  %v2289_v26 = vrot.slane %v2282_v31, 6 }
 0x2ac   : > { %1962 = vst.msk [vmem:[%s3560_s28 + $0x47] sm:$0x1] %vm1368_vm2, %v1947_v41  ;;  %v2375_v41 = vsel %vm2373_vm15, %v2372_v32, %v2374_v37 }
 0x2ad   : > { %1963 = vst.msk [vmem:[%s3560_s28 + $0x57] sm:$0x1] %vm1368_vm2, %v1948_v42  ;;  %v2449_v42 = vmul.f32 %v2448_v38, %v3970_v16  ;;  %v2377_v45 = vrot.slane %v2375_v41, 1  ;;  %v2378_v46 = vrot.slane %v2375_v41, 2  ;;  %v2379_v50 = vrot.slane %v2375_v41, 3 }
 0x2ae   : > { %1964 = vst.msk [vmem:[%s3560_s28 + $0x67] sm:$0x1] %vm1368_vm2, %v1949_v43  ;;  %v2290_v43 = vrot.slane %v2282_v31, 7  ;;  %v2381_v15 = vrot.slane %v2375_v41, 5  ;;  %v2383_v55 = vrot.slane %v2375_v41, 7 }
 0x2af   : > { %1965 = vst.msk [vmem:[%s3560_s28 + $0x77] sm:$0x1] %vm1368_vm2, %v1950_v49  ;;  %v2451_v48 = vmul.f32 0.2, %v2449_v42  ;;  %vm2450_vm1 = vcmp.gt.f32.partialorder %v2449_v42, 0.0 }
 0x2b0   : > { %2051 = vst.msk [vmem:[%s3560_s28 + $0x8] sm:$0x1] %vm1368_vm2, %v2035_v44  ;;  %v2540_v44 = vsel %vm3554_vm0, %v2513_v18, %v2537_v40 }
 0x2b1   : > { %2052 = vst.msk [vmem:[%s3560_s28 + $0x18] sm:$0x1] %vm1368_vm2, %v2037_v11  ;;  %v2541_v49 = vsub.f32 %v2540_v44, %v3962_v47  ;;  %v2380_v11 = vrot.slane %v2375_v41, 4 }
 0x2b2   : > { %2053 = vst.msk [vmem:[%s3560_s28 + $0x28] sm:$0x1] %vm1368_vm2, %v2038_v12  ;;  %v2590_v12 = vpop.f32.mrf.mxu2 }
 0x2b3   : > { %2054 = vst.msk [vmem:[%s3560_s28 + $0x38] sm:$0x1] %vm1368_vm2, %v2039_v52  ;;  %v2382_v52 = vrot.slane %v2375_v41, 6  ;;  %v2542_v54 = vmul.f32 %v2541_v49, %v3970_v16 }
 0x2b4   : > { %2055 = vst.msk [vmem:[%s3560_s28 + $0x48] sm:$0x1] %vm1368_vm2, %v2040_v53  ;;  %v2452_v53 = vsel %vm2450_vm1, %v2449_v42, %v2451_v48 }
 0x2b5   : > { %2056 = vst.msk [vmem:[%s3560_s28 + $0x58] sm:$0x1] %vm1368_vm2, %v2041_v56  ;;  %v2617_v56 = vsel %vm3554_vm0, %v2590_v12, %v2614_v51  ;;  %v2544_v59 = vmul.f32 0.2, %v2542_v54  ;;  %v2456_v7 = vrot.slane %v2452_v53, 3  ;;  %vm2543_vm0 = vcmp.gt.f32.partialorder %v2542_v54, 0.0 }
 0x2b6   : > { %2057 = vst.msk [vmem:[%s3560_s28 + $0x68] sm:$0x1] %vm1368_vm2, %v2042_v57  ;;  %v2454_v57 = vrot.slane %v2452_v53, 1  ;;  %v2457_v61 = vrot.slane %v2452_v53, 4  ;;  %v2460_v1 = vrot.slane %v2452_v53, 7 }
 0x2b7   : > { %2058 = vst.msk [vmem:[%s3560_s28 + $0x78] sm:$0x1] %vm1368_vm2, %v2043_v60  ;;  %v2618_v60 = vsub.f32 %v2617_v56, %v3962_v47  ;;  %v2545_v0 = vsel %vm2543_vm0, %v2542_v54, %v2544_v59 }
 0x2b8   : > { %2128 = vst.msk [vmem:[%s3560_s28 + $0x9] sm:$0x1] %vm1368_vm2, %v2112_v58  ;;  %v2455_v58 = vrot.slane %v2452_v53, 2  ;;  %v2552_v8 = vrot.slane %v2545_v0, 6  ;;  %v2553_v10 = vrot.slane %v2545_v0, 7 }
 0x2b9   : > { %2129 = vst.msk [vmem:[%s3560_s28 + $0x19] sm:$0x1] %vm1368_vm2, %v2114_v62  ;;  %v2458_v62 = vrot.slane %v2452_v53, 5  ;;  %v2619_v47 = vmul.f32 %v2618_v60, %v3970_v16  ;;  %v2549_v16 = vrot.slane %v2545_v0, 3 }
 0x2ba   : > { %2130 = vst.msk [vmem:[%s3560_s28 + $0x29] sm:$0x1] %vm1368_vm2, %v2115_v63  ;;  %v2459_v63 = vrot.slane %v2452_v53, 6 }
 0x2bb   : > { %2131 = vst.msk [vmem:[%s3560_s28 + $0x39] sm:$0x1] %vm1368_vm2, %v2116_v2  ;;  %v2547_v2 = vrot.slane %v2545_v0, 1  ;;  %vm2620_vm3 = vcmp.gt.f32.partialorder %v2619_v47, 0.0 }
 0x2bc   : > { %2132 = vst.msk [vmem:[%s3560_s28 + $0x49] sm:$0x1] %vm1368_vm2, %v2117_v3  ;;  %v2548_v3 = vrot.slane %v2545_v0, 2 }
 0x2bd   : > { %2133 = vst.msk [vmem:[%s3560_s28 + $0x59] sm:$0x1] %vm1368_vm2, %v2118_v4  ;;  %v2621_v4 = vmul.f32 0.2, %v2619_v47 }
 0x2be   : > { %2134 = vst.msk [vmem:[%s3560_s28 + $0x69] sm:$0x1] %vm1368_vm2, %v2119_v5  ;;  %v2550_v5 = vrot.slane %v2545_v0, 4 }
 0x2bf   : > { %2135 = vst.msk [vmem:[%s3560_s28 + $0x79] sm:$0x1] %vm1368_vm2, %v2120_v13  ;;  %v2622_v9 = vsel %vm2620_vm3, %v2619_v47, %v2621_v4 }
 0x2c0   : > { %2221 = vst.msk [vmem:[%s3560_s28 + $0xa] sm:$0x1] %vm1368_vm2, %v2205_v6  ;;  %v2551_v6 = vrot.slane %v2545_v0, 5  ;;  %v2624_v13 = vrot.slane %v2622_v9, 1  ;;  %v2625_v14 = vrot.slane %v2622_v9, 2  ;;  %v2628_v22 = vrot.slane %v2622_v9, 5 }
 0x2c1   : > { %2222 = vst.msk [vmem:[%s3560_s28 + $0x1a] sm:$0x1] %vm1368_vm2, %v2207_v19  ;;  %v2626_v19 = vrot.slane %v2622_v9, 3  ;;  %v2629_v23 = vrot.slane %v2622_v9, 6 }
 0x2c2   : > { %2223 = vst.msk [vmem:[%s3560_s28 + $0x2a] sm:$0x1] %vm1368_vm2, %v2208_v20  ;;  %v2627_v20 = vrot.slane %v2622_v9, 4 }
 0x2c3   : > { %2224 = vst.msk [vmem:[%s3560_s28 + $0x3a] sm:$0x1] %vm1368_vm2, %v2209_v24  ;;  %v2630_v24 = vrot.slane %v2622_v9, 7 }
 0x2c4   : > { %2225 = vst.msk [vmem:[%s3560_s28 + $0x4a] sm:$0x1] %vm1368_vm2, %v2210_v25 }
 0x2c5   : > { %2226 = vst.msk [vmem:[%s3560_s28 + $0x5a] sm:$0x1] %vm1368_vm2, %v2211_v29 }
 0x2c6   : > { %2227 = vst.msk [vmem:[%s3560_s28 + $0x6a] sm:$0x1] %vm1368_vm2, %v2212_v30 }
 0x2c7   : > { %2228 = vst.msk [vmem:[%s3560_s28 + $0x7a] sm:$0x1] %vm1368_vm2, %v2213_v33 }
 0x2c8   : > { %2298 = vst.msk [vmem:[%s3560_s28 + $0xb] sm:$0x1] %vm1368_vm2, %v2282_v31 }
 0x2c9   : > { %2299 = vst.msk [vmem:[%s3560_s28 + $0x1b] sm:$0x1] %vm1368_vm2, %v2284_v35 }
 0x2ca   : > { %2300 = vst.msk [vmem:[%s3560_s28 + $0x2b] sm:$0x1] %vm1368_vm2, %v2285_v36 }
 0x2cb   : > { %2301 = vst.msk [vmem:[%s3560_s28 + $0x3b] sm:$0x1] %vm1368_vm2, %v2286_v17 }
 0x2cc   : > { %2302 = vst.msk [vmem:[%s3560_s28 + $0x4b] sm:$0x1] %vm1368_vm2, %v2287_v39 }
 0x2cd   : > { %2303 = vst.msk [vmem:[%s3560_s28 + $0x5b] sm:$0x1] %vm1368_vm2, %v2288_v21 }
 0x2ce   : > { %2304 = vst.msk [vmem:[%s3560_s28 + $0x6b] sm:$0x1] %vm1368_vm2, %v2289_v26 }
 0x2cf   : > { %2305 = vst.msk [vmem:[%s3560_s28 + $0x7b] sm:$0x1] %vm1368_vm2, %v2290_v43 }
 0x2d0   : > { %2391 = vst.msk [vmem:[%s3560_s28 + $0xc] sm:$0x1] %vm1368_vm2, %v2375_v41 }
 0x2d1   : > { %2392 = vst.msk [vmem:[%s3560_s28 + $0x1c] sm:$0x1] %vm1368_vm2, %v2377_v45 }
 0x2d2   : > { %2393 = vst.msk [vmem:[%s3560_s28 + $0x2c] sm:$0x1] %vm1368_vm2, %v2378_v46 }
 0x2d3   : > { %2394 = vst.msk [vmem:[%s3560_s28 + $0x3c] sm:$0x1] %vm1368_vm2, %v2379_v50 }
 0x2d4   : > { %2395 = vst.msk [vmem:[%s3560_s28 + $0x4c] sm:$0x1] %vm1368_vm2, %v2380_v11 }
 0x2d5   : > { %2396 = vst.msk [vmem:[%s3560_s28 + $0x5c] sm:$0x1] %vm1368_vm2, %v2381_v15 }
 0x2d6   : > { %2397 = vst.msk [vmem:[%s3560_s28 + $0x6c] sm:$0x1] %vm1368_vm2, %v2382_v52 }
 0x2d7   : > { %2398 = vst.msk [vmem:[%s3560_s28 + $0x7c] sm:$0x1] %vm1368_vm2, %v2383_v55 }
 0x2d8   : > { %2468 = vst.msk [vmem:[%s3560_s28 + $0xd] sm:$0x1] %vm1368_vm2, %v2452_v53 }
 0x2d9   : > { %2469 = vst.msk [vmem:[%s3560_s28 + $0x1d] sm:$0x1] %vm1368_vm2, %v2454_v57 }
 0x2da   : > { %2470 = vst.msk [vmem:[%s3560_s28 + $0x2d] sm:$0x1] %vm1368_vm2, %v2455_v58 }
 0x2db   : > { %2471 = vst.msk [vmem:[%s3560_s28 + $0x3d] sm:$0x1] %vm1368_vm2, %v2456_v7 }
 0x2dc   : > { %2472 = vst.msk [vmem:[%s3560_s28 + $0x4d] sm:$0x1] %vm1368_vm2, %v2457_v61 }
 0x2dd   : > { %2473 = vst.msk [vmem:[%s3560_s28 + $0x5d] sm:$0x1] %vm1368_vm2, %v2458_v62 }
 0x2de   : > { %2474 = vst.msk [vmem:[%s3560_s28 + $0x6d] sm:$0x1] %vm1368_vm2, %v2459_v63 }
 0x2df   : > { %2475 = vst.msk [vmem:[%s3560_s28 + $0x7d] sm:$0x1] %vm1368_vm2, %v2460_v1 }
 0x2e0   : > { %2561 = vst.msk [vmem:[%s3560_s28 + $0xe] sm:$0x1] %vm1368_vm2, %v2545_v0 }
 0x2e1   : > { %2562 = vst.msk [vmem:[%s3560_s28 + $0x1e] sm:$0x1] %vm1368_vm2, %v2547_v2 }
 0x2e2   : > { %2563 = vst.msk [vmem:[%s3560_s28 + $0x2e] sm:$0x1] %vm1368_vm2, %v2548_v3 }
 0x2e3   : > { %2564 = vst.msk [vmem:[%s3560_s28 + $0x3e] sm:$0x1] %vm1368_vm2, %v2549_v16 }
 0x2e4   : > { %2565 = vst.msk [vmem:[%s3560_s28 + $0x4e] sm:$0x1] %vm1368_vm2, %v2550_v5 }
 0x2e5   : > { %2566 = vst.msk [vmem:[%s3560_s28 + $0x5e] sm:$0x1] %vm1368_vm2, %v2551_v6 }
 0x2e6   : > { %2567 = vst.msk [vmem:[%s3560_s28 + $0x6e] sm:$0x1] %vm1368_vm2, %v2552_v8 }
 0x2e7   : > { %2568 = vst.msk [vmem:[%s3560_s28 + $0x7e] sm:$0x1] %vm1368_vm2, %v2553_v10 }
 0x2e8   : > { %2638 = vst.msk [vmem:[%s3560_s28 + $0xf] sm:$0x1] %vm1368_vm2, %v2622_v9 }
 0x2e9   : > { %2639 = vst.msk [vmem:[%s3560_s28 + $0x1f] sm:$0x1] %vm1368_vm2, %v2624_v13 }
 0x2ea   : > { %2640 = vst.msk [vmem:[%s3560_s28 + $0x2f] sm:$0x1] %vm1368_vm2, %v2625_v14 }
 0x2eb   : > { %2641 = vst.msk [vmem:[%s3560_s28 + $0x3f] sm:$0x1] %vm1368_vm2, %v2626_v19 }
 0x2ec   : > { %2642 = vst.msk [vmem:[%s3560_s28 + $0x4f] sm:$0x1] %vm1368_vm2, %v2627_v20 }
 0x2ed   : > { %2643 = vst.msk [vmem:[%s3560_s28 + $0x5f] sm:$0x1] %vm1368_vm2, %v2628_v22 }
 0x2ee   : > { %2644 = vst.msk [vmem:[%s3560_s28 + $0x6f] sm:$0x1] %vm1368_vm2, %v2629_v23 }
 0x2ef   : > { %2645 = vst.msk [vmem:[%s3560_s28 + $0x7f] sm:$0x1] %vm1368_vm2, %v2630_v24 }
 0x2f0 PF: > { %s4288_s26 = scalar_lea.sflag [#allocation6], %s263_s17 }
 0x2f1   : > { %s4421_s30 = sld [smem:[#allocation16_spill]]  ;;  %s2675_s5 = sshll.u32 %s3560_s28, 4  ;;  %s2676_s5 = int_to_ptr.vmem [resolvable:$true] %s2675_s5 }
 0x2f2   : > { %s4422_s3 = sld [smem:[#allocation15_spill]]  ;;  %s3334_s19 = smov 256  }
 0x2f3   : > { %s4423_s6 = sld [smem:[#allocation17_spill]] }
 0x2f4   : > { %s4424_s7 = sld [smem:[#allocation18_spill]] }
 0x2f5   : > { %2993 = sst [smem:[#allocation10]] (%p3515_p5), %s3334_s19 }
 0x2f8   : > { %s2654_s27 = smul.u32 %s4422_s3, %s4421_s30  ;;  %s4425_s30 = sld [smem:[#allocation27_spill]] }
 0x2f9   : > { %s2990_s29 = sshll.u32 %s4423_s6, 5  ;;  %s3335_s6 = smov 512  }
 0x2fa   : > { %s2986_s4 = sshll.u32 %s4424_s7, 6  ;;  %s2984_s14 = sshll.u32 %s2654_s27, 1 }
 0x2fb   : > { %s2660_s18 = sadd.s32 %s2990_s29, %s2984_s14  ;;  %2994 = sst [smem:[#allocation10 + $0x1]] (%p3515_p5), %s3335_s6 }
 0x2fc   : > { %s2662_s17 = sadd.s32 %s2986_s4, %s2660_s18  ;;  %s3336_s7 = smov 2  }
 0x2fd   : > { %s2987_s22 = sshll.u32 %s2662_s17, 3  ;;  %2995 = sst [smem:[#allocation10 + $0x2]] (%p3515_p5), %s3336_s7 }
 0x2fe   : > { %s2664_s3 = scalar_lea.hbm %s4425_s30, %s2987_s22  ;;  %s3337_s27 = smov 128  }
 0x2ff   : > { %s2677_s28 = sshll.u32 %s2664_s3, 4  ;;  %2996 = sst [smem:[#allocation10 + $0x3]] (%p3515_p5), %s3337_s27  ;;  %s2678_s28 = int_to_ptr.hbm [resolvable:$true] %s2677_s28 }
 0x300   : > { %2997 = sst [smem:[#allocation10 + $0x4]] (%p3515_p5), %s3337_s27  ;;  %s3338_s29 = smov 8  }
 0x301   : > { %2998 = sst [smem:[#allocation10 + $0x5]] (%p3515_p5), %s3338_s29  ;;  %s3339_s4 = smov [#allocation9]  }
 0x302   : > { %s3340_s14 = smov 0  }
 0x303   : > { %2999 = dma.general (%p3515_p5), %s2676_s5, 2048, %s2678_s28, %s4288_s26, %s3339_s4, [#allocation10], %s3340_s14, 0  }
 0x304 PF: > { %p3005_p2 = scmp.ge.s32.totalorder %s3327_s25, 2  ;;  %s2705_s18 = sand.u32 1, %s3263_s9  }
 0x305   : > { %s2706_s17 = scalar_lea.sflag [#allocation6], %s2705_s18 }
 0x306   : > { %p3002_p3 = pnand %p3005_p2, %p3519_p8 }
 0x308   : > { %p3003_p4 = pneg %p3002_p3 }
 0x30a   : > { %3258 = dma.done.wait (%p3003_p4), %s2706_s17, 2048  }
 0x30b   : > { %3260 = vsyncadd (%p3003_p4), %s2706_s17, 4294965248  ;;  %s18_s25 = sadd.s32 1, %s3327_s25   ;;  %s4427_s8 = sld [smem:[#allocation25_spill]] }
 0x30c   : > { %p4318_p9 = scmp.ge.s32.totalorder %s18_s25, 18   ;;  %s4428_s14 = sld [smem:[#allocation14_spill]] }
 0x30d   : > { %s4429_s26 = sld [smem:[#allocation26_spill]]  ;;  %s4435_s9 = smov %s3267_s10 }
 0x30e   : > { %s4430_s18 = sld [smem:[#allocation19_spill]]  ;;  %s4436_s10 = smov %s3271_s11 }
 0x30f   : > { %s4431_s2 = sld [smem:[#allocation20_spill]]  ;;  %s4438_s11 = smov %s3507_s15 }
 0x310   : > { %s4432_s22 = sld [smem:[#allocation21_spill]]  ;;  %s4439_s12 = smov %s3279_s13 }
 0x311   : > { %s4433_s5 = sld [smem:[#allocation23_spill]]  ;;  %s4440_s13 = smov %s4427_s8 }
 0x312   : > { %s4434_s30 = sld [smem:[#allocation24_spill]]  ;;  %s4441_s15 = smov %s3291_s16 }
 0x313   : > { %s4442_s16 = smov %s4429_s26  ;;  %s4443_s17 = smov %s3311_s21 }
 0x314   : > { %s4444_s19 = smov %s3319_s23  ;;  %s4445_s20 = smov %s3323_s24 }
 0x315   : > { %s4446_s21 = smov %s4431_s2  ;;  %17 = sbr.rel (!%p4318_p9) target bundleno = 14 (0xe), region = 142 }
 0x317   : > { %s4447_s23 = smov %s4433_s5 }
 0x318   : > { %s4448_s24 = smov %s4434_s30 }
 0x31a   :  { %2712 = vsyncpa [#allocation5], 1 }
 0x31b   :  { %2714 = vsyncpa [#allocation5 + $0x1], 1 }
 0x31c   :  { %2715 = vsyncpa [#allocation6], 1 }
 0x31d   :  { %2717 = vsyncpa [#allocation6 + $0x1], 1 }

</bundles_post_ra>
